<compile_context>
chip_gen: v6e
topology: v6e:2x2x1
jax: 0.10.0
libtpu: 0.0.40
codegen_flags: <defaults>
</compile_context>

<pallas_src>
import numpy as np
import jax
import jax.numpy as jnp
from jax.experimental import pallas as pl
from jax.experimental.pallas import tpu as pltpu

# ----------------------------- configuration --------------------------------
B = 2                 # batch
T_LAT = 8             # latent time length of the motion code
K = 15                # SkeletonConv kernel size
PAD = (K - 1) // 2    # reflection padding = 7

E0 = 7                                   # edges (incl. root) at skeleton level 0
E1 = 4                                   # edges at level 1 (after one pooling)
TOPO0_EDGES = [(0, 1), (1, 2), (2, 3), (0, 4), (4, 5), (5, 6)]
TOPO1_EDGES = [(0, 1), (0, 2), (2, 3)]
P0 = [[0, 1], [2, 3], [4, 5], [6]]       # pooling level0 -> level1
P1 = [[0, 1], [2, 3]]                    # pooling level1 -> level2

C_LT = 24             # static (template) latent dim = 4 pooled edges * 6 ch
C_LM = 32             # dynamic (motion) latent channels = 2 pooled edges * 16 ch
HID = 64              # marker branch hidden size
OUT_SIZE = 48         # marker branch output size
Y_T_DIM = 3 * E0      # decoded template skeleton = 21

C_OUT0, T_OUT0 = 32, 2 * T_LAT           # dynamic stage 0 output: (32, 16)
C_OUT1, T_OUT1 = 28, 4 * T_LAT - 1       # dynamic stage 1 output (cropped): (28, 31)

# ----------------- packed-slab layouts (all block starts 128-aligned) -------
X_LC, X_LT, X_LM, X_ONE = 0, 64, 88, 344          # kernel input x column layout
X_DIM = 352                                       # l_c(64)|l_t(24)|l_m(256)|ones(8)

YROW_W = 128                                      # Y_t slot (0:21 real, col 127 == 1)
H_W = 384                                         # entry-layer out: y_row|m0|pad|t0|pad
COL_M0, COL_T0 = 128, 256

D0_OUT = C_OUT0 * T_OUT0                          # 512
D1_IN = 512 + YROW_W                              # 640
YM_REAL = C_OUT1 * T_OUT1                         # 868
YM_PAD = 896                                      # 7 * 128

MK_K = 64 + YROW_W                                # 192 (state rows | y_row rows)
MK_N = 640                                        # d | t_pre | r0b | r1b | out
MKC_D, MKC_T, MKC_R0B, MKC_R1B, MKC_OUT = 0, 128, 256, 384, 512

OUT_W = YM_PAD + YROW_W + YROW_W                  # 1152 = 9 * 128


# ----------------------- skeleton helper matrices ----------------------------
def find_neighbor(edges, n_nodes, dist=1):
    adj = np.eye(n_nodes, dtype=np.int32)
    for a, b in edges:
        adj[a, b] = adj[b, a] = 1
    reach = np.eye(n_nodes, dtype=np.int32)
    for _ in range(dist):
        reach = ((reach + reach @ adj) > 0).astype(np.int32)
    return [list(np.nonzero(reach[i])[0]) for i in range(n_nodes)]


def linear_mask(neighbor_list, in_per_joint, out_per_joint):
    n = len(neighbor_list)
    m = np.zeros((n * out_per_joint, n * in_per_joint), np.float32)
    for i, nb in enumerate(neighbor_list):
        for j in nb:
            m[i * out_per_joint:(i + 1) * out_per_joint,
              j * in_per_joint:(j + 1) * in_per_joint] = 1.0
    return m


def unpool_weight(pooling_list, channels_per_edge):
    out_edges = sum(len(g) for g in pooling_list)
    W = np.zeros((out_edges * channels_per_edge,
                  len(pooling_list) * channels_per_edge), np.float32)
    for i, group in enumerate(pooling_list):
        for j in group:
            for c in range(channels_per_edge):
                W[j * channels_per_edge + c, i * channels_per_edge + c] = 1.0
    return W


def linear_upsample_matrix(t_in):
    # PyTorch nn.Upsample(scale_factor=2, mode='linear', align_corners=False)
    t_out = 2 * t_in
    U = np.zeros((t_out, t_in), np.float32)
    for i in range(t_out):
        src = 0.5 * (i + 0.5) - 0.5
        src = max(src, 0.0)
        i0 = min(int(np.floor(src)), t_in - 1)
        i1 = min(i0 + 1, t_in - 1)
        lam = src - i0
        U[i, i0] += 1.0 - lam
        U[i, i1] += lam
    return U


def reflect_pad_matrix(t, pad):
    assert pad < t
    tp = t + 2 * pad
    R = np.zeros((t, tp), np.float32)
    for j in range(tp):
        src = j - pad
        if src < 0:
            src = -src
        elif src >= t:
            src = 2 * (t - 1) - src
        R[src, j] = 1.0
    return R


# ------------------------------ raw parameters -------------------------------
def init_raw_params(key):
    nb0 = find_neighbor(TOPO0_EDGES, E0, dist=1)
    nb1 = find_neighbor(TOPO1_EDGES, E1, dist=1)
    kit = iter(jax.random.split(key, 32))

    def u(shape, fan_in):
        b = 1.0 / np.sqrt(max(fan_in, 1))
        return np.asarray(jax.random.uniform(next(kit), shape, jnp.float32, -b, b))

    r = {}
    # static decoder: SkeletonUnpool(P0, 6) then masked SkeletonLinear(42 -> 21)
    r["w_s"] = u((Y_T_DIM, 42), 42) * linear_mask(nb0, 6, 3)
    r["b_s"] = u((Y_T_DIM,), 42)
    # dynamic stage 0: unpooled channels = 64, out = 32, offset = l_t (24)
    r["wc0"] = u((C_OUT0, 64, K), 64 * K) * linear_mask(nb1, 16, 8)[:, :, None]
    r["bc0"] = u((C_OUT0,), 64 * K)
    r["wo0"] = u((C_OUT0, C_LT), C_LT) * linear_mask(nb1, 6, 8)
    r["bo0"] = u((C_OUT0,), C_LT)
    # dynamic stage 1: unpooled channels = 56, out = 28, offset = Y_t (21)
    r["wc1"] = u((C_OUT1, 56, K), 56 * K) * linear_mask(nb0, 8, 4)[:, :, None]
    r["bc1"] = u((C_OUT1,), 56 * K)
    r["wo1"] = u((C_OUT1, Y_T_DIM), Y_T_DIM) * linear_mask(nb0, 3, 4)
    r["bo1"] = u((C_OUT1,), Y_T_DIM)

    # marker decoder (dense blocks store weights as (in, out))
    def dw(din, dout):
        return np.ascontiguousarray(u((dout, din), din).T), u((dout,), din)

    r["wd0"],  r["bd0"]  = dw(HID, HID)
    r["wd0o"], r["bd0o"] = dw(C_LT, HID)
    r["wr0a"], r["br0a"] = dw(HID, HID)
    r["wr0b"], r["br0b"] = dw(HID, HID)
    r["wd1"],  r["bd1"]  = dw(HID, HID)
    r["wd1o"], r["bd1o"] = dw(Y_T_DIM, HID)
    r["wr1a"], r["br1a"] = dw(HID, HID)
    r["wr1b"], r["br1b"] = dw(HID, HID)
    r["wout"], r["bout"] = dw(HID, OUT_SIZE)
    return r


# ------------- fold upsample+unpool+pad+conv(+crop) into one operator --------
def fold_stage(wc, bc, wo, bo, pool_list, cpe_unpool, t_in, crop_last):
    c_out = wc.shape[0]
    P = unpool_weight(pool_list, cpe_unpool)                 # (C_big, C_small)
    c_small = P.shape[1]
    U = linear_upsample_matrix(t_in)                         # (2*t_in, t_in)
    t2 = 2 * t_in
    R = reflect_pad_matrix(t2, PAD)                          # (t2, t2 + 2*PAD)
    M = U.T @ R                                              # (t_in, t2 + 2*PAD)
    t_out = t2 - 1 if crop_last else t2

    WkP = np.einsum('obk,bc->koc', wc, P)                    # (K, C_out, C_small)
    Mshift = np.stack([M[:, k:k + t_out] for k in range(K)], axis=0)
    big = np.einsum('koc,kit->ciot', WkP, Mshift)            # (C_s, t_in, C_out, t_out)

    w_main = big.reshape(c_small * t_in, c_out * t_out).astype(np.float32)
    w_off = (0.01 * np.repeat(wo.T[:, :, None], t_out, axis=2)
             ).reshape(wo.shape[1], c_out * t_out).astype(np.float32)
    b = np.repeat((bc + 0.01 * bo)[:, None], t_out, axis=1).reshape(-1).astype(np.float32)
    return w_main, w_off, b


# ------------------------------ pack the 4 slabs ------------------------------
def pack_params(raw):
    f32 = np.float32

    # ---- entry layer slab: static decoder + marker dense0 + res0 pre-act ----
    w_in = np.zeros((X_DIM, H_W), f32)
    ws = unpool_weight(P0, 6).T @ raw["w_s"].T               # (24, 21)
    w_in[X_LT:X_LT + C_LT, 0:Y_T_DIM] = ws
    w_in[X_ONE, 0:Y_T_DIM] = raw["b_s"]
    w_in[X_ONE, YROW_W - 1] = 1.0                            # constant-one carrier
    bd0 = raw["bd0"] + raw["bd0o"]
    w_in[X_LC:X_LC + HID, COL_M0:COL_M0 + HID] = raw["wd0"]
    w_in[X_LT:X_LT + C_LT, COL_M0:COL_M0 + HID] = raw["wd0o"]
    w_in[X_ONE, COL_M0:COL_M0 + HID] = bd0
    w_in[X_LC:X_LC + HID, COL_T0:COL_T0 + HID] = raw["wd0"] @ raw["wr0a"]
    w_in[X_LT:X_LT + C_LT, COL_T0:COL_T0 + HID] = raw["wd0o"] @ raw["wr0a"]
    w_in[X_ONE, COL_T0:COL_T0 + HID] = bd0 @ raw["wr0a"] + raw["br0a"]

    # ---- dynamic stage 0 (folded), bf16 ----
    w0m, w0o, b0 = fold_stage(raw["wc0"], raw["bc0"], raw["wo0"], raw["bo0"],
                              P1, 16, T_LAT, crop_last=False)
    w_d0 = np.zeros((X_DIM, D0_OUT), f32)
    w_d0[X_LT:X_LT + C_LT, :] = w0o
    w_d0[X_LM:X_LM + C_LM * T_LAT, :] = w0m
    w_d0[X_ONE, :] = b0

    # ---- dynamic stage 1 (folded, last frame cropped, padded to 896), bf16 ----
    w1m, w1o, b1 = fold_stage(raw["wc1"], raw["bc1"], raw["wo1"], raw["bo1"],
                              P0, 8, 2 * T_LAT, crop_last=True)
    w_d1 = np.zeros((D1_IN, YM_PAD), f32)
    w_d1[0:512, 0:YM_REAL] = w1m
    w_d1[512:512 + Y_T_DIM, 0:YM_REAL] = w1o
    w_d1[D1_IN - 1, 0:YM_REAL] = b1

    # ---- marker slab: rows = [state(64) | y_row(128)], cols = 5 x 128 slots ----
    w_mk = np.zeros((MK_K, MK_N), f32)
    Y0 = 64
    ONE = MK_K - 1
    bd1 = raw["bd1"] + raw["bd1o"]
    # d = m@wd1 + y_t@wd1o + bd1
    w_mk[0:HID, MKC_D:MKC_D + HID] = raw["wd1"]
    w_mk[Y0:Y0 + Y_T_DIM, MKC_D:MKC_D + HID] = raw["wd1o"]
    w_mk[ONE, MKC_D:MKC_D + HID] = bd1
    # res1 pre-act = d@wr1a + br1a  (dense1 folded through res1's first matmul)
    w_mk[0:HID, MKC_T:MKC_T + HID] = raw["wd1"] @ raw["wr1a"]
    w_mk[Y0:Y0 + Y_T_DIM, MKC_T:MKC_T + HID] = raw["wd1o"] @ raw["wr1a"]
    w_mk[ONE, MKC_T:MKC_T + HID] = bd1 @ raw["wr1a"] + raw["br1a"]
    # res0 second matmul
    w_mk[0:HID, MKC_R0B:MKC_R0B + HID] = raw["wr0b"]
    w_mk[ONE, MKC_R0B:MKC_R0B + HID] = raw["br0b"]
    # res1 second matmul
    w_mk[0:HID, MKC_R1B:MKC_R1B + HID] = raw["wr1b"]
    w_mk[ONE, MKC_R1B:MKC_R1B + HID] = raw["br1b"]
    # output dense (48 real outputs in a 128-lane slot)
    w_mk[0:HID, MKC_OUT:MKC_OUT + OUT_SIZE] = raw["wout"]
    w_mk[ONE, MKC_OUT:MKC_OUT + OUT_SIZE] = raw["bout"]

    return {
        "w_in": jnp.asarray(w_in, jnp.float32),
        "w_d0": jnp.asarray(w_d0, jnp.bfloat16),
        "w_d1": jnp.asarray(w_d1, jnp.bfloat16),
        "w_mk": jnp.asarray(w_mk, jnp.float32),
    }


# ----------------------------- the fused kernel ------------------------------
def _decoder_kernel(x_ref, w_in_ref, w_d0_ref, w_d1_ref, w_mk_ref, out_ref):
    f32 = jnp.float32
    bf16 = jnp.bfloat16

    def mm(a, b):
        return jnp.dot(a, b, preferred_element_type=f32)

    def lrelu(v, s):
        return jnp.where(v >= 0.0, v, s * v)

    x = x_ref[...]                                   # (B, 352) f32, col 344 == 1
    x16 = x.astype(bf16)

    # ---- fused entry layer: static decoder + marker dense0 + res0 pre-act ----
    h = mm(x, w_in_ref[...])                         # (B, 384)
    y_row = h[:, 0:YROW_W]                           # Y_t in 0:21, const 1 at 127
    m0 = h[:, COL_M0:COL_M0 + HID]                   # dense0 output
    t0 = h[:, COL_T0:COL_T0 + HID]                   # res0 pre-activation
    y16 = y_row.astype(bf16)

    # ---- dynamic stage 0: folded upsample+unpool+pad+conv (+ l_t offset) ----
    h0 = lrelu(mm(x16, w_d0_ref[...]), 0.2)          # (B, 512)

    # ---- dynamic stage 1: folded op + Y_t offset + bias + last-frame crop ----
    y_m = (mm(h0.astype(bf16), w_d1_ref[0:512, :]) +
           mm(y16, w_d1_ref[512:D1_IN, :]))          # (B, 896)

    # ---- marker branch ----
    w_mk = w_mk_ref[...]                             # (192, 640)
    w_m = w_mk[0:HID, :]                             # state-side weights
    # every Y_t-offset / bias addend in ONE off-critical-path matmul
    off = mm(y_row, w_mk[HID:MK_K, :])               # (B, 640)

    m1 = mm(lrelu(t0, 0.2), w_m[:, MKC_R0B:MKC_R0B + HID]) \
        + off[:, MKC_R0B:MKC_R0B + HID] + m0

    def dense1_res1(m):
        r = mm(m, w_m[:, MKC_D:MKC_D + 256]) + off[:, MKC_D:MKC_D + 256]
        d = r[:, 0:HID]                              # dense1 output (skip path)
        t = lrelu(r[:, MKC_T:MKC_T + HID], 0.2)      # res1 hidden
        return mm(t, w_m[:, MKC_R1B:MKC_R1B + HID]) \
            + off[:, MKC_R1B:MKC_R1B + HID] + d

    m2 = dense1_res1(m1)                             # layers[1] (dense1 + res1)
    m3 = dense1_res1(m2)                             # layers[2] re-applies them
    y_c = mm(lrelu(m3, 0.5), w_m[:, MKC_OUT:MK_N]) + off[:, MKC_OUT:MK_N]  # (B,128)

    # ---- single lane-dense output slab (all stores 128-lane aligned) ----
    out_ref[:, 0:YM_PAD] = y_m
    out_ref[:, YM_PAD:YM_PAD + YROW_W] = y_row
    out_ref[:, YM_PAD + YROW_W:OUT_W] = y_c


def decoder_forward(packed, l_c, l_t, l_m):
    Bx = l_c.shape[0]
    l_m_flat = l_m.reshape(Bx, C_LM * T_LAT)
    x = jnp.concatenate(
        [l_c, l_t, l_m_flat, jnp.ones((Bx, 8), jnp.float32)], axis=1)   # (B, 352)

    flops = 2 * Bx * (X_DIM * H_W + X_DIM * D0_OUT + 512 * YM_PAD
                      + YROW_W * YM_PAD + YROW_W * MK_N + HID * HID
                      + 2 * (HID * 256 + HID * HID) + HID * YROW_W)
    bytes_accessed = (x.size * 4 + packed["w_in"].size * 4
                      + packed["w_d0"].size * 2 + packed["w_d1"].size * 2
                      + packed["w_mk"].size * 4 + Bx * OUT_W * 4)

    vmem = pl.BlockSpec(memory_space=pltpu.MemorySpace.VMEM)
    out = pl.pallas_call(
        _decoder_kernel,
        out_shape=jax.ShapeDtypeStruct((Bx, OUT_W), jnp.float32),
        in_specs=[vmem] * 5,
        out_specs=vmem,
        cost_estimate=pl.CostEstimate(flops=flops, transcendentals=0,
                                      bytes_accessed=bytes_accessed),
    )(x, packed["w_in"], packed["w_d0"], packed["w_d1"], packed["w_mk"])

    Y_m = out[:, 0:YM_REAL].reshape(Bx, C_OUT1, T_OUT1)
    Y_t = out[:, YM_PAD:YM_PAD + Y_T_DIM]
    Y_c = out[:, YM_PAD + YROW_W:YM_PAD + YROW_W + OUT_SIZE]
    return Y_c, Y_t, Y_m


# ----------------- unfused pure-JAX reference (validates the folds) ----------
def reference_forward(raw, l_c, l_t, l_m):
    def lrelu(v, s):
        return jnp.where(v >= 0.0, v, s * v)

    # static decoder
    unpool_s = jnp.asarray(unpool_weight(P0, 6))             # (42, 24)
    y_t = (l_t @ unpool_s.T) @ raw["w_s"].T + raw["b_s"]     # (B, 21)

    def dyn_stage(x, wc, bc, wo, bo, off, pool_list, cpe, crop):
        Bx, C, T = x.shape
        t2 = 2 * T
        src = jnp.clip((jnp.arange(t2) + 0.5) * 0.5 - 0.5, 0.0, T - 1.0)
        i0 = jnp.floor(src).astype(jnp.int32)
        i1 = jnp.minimum(i0 + 1, T - 1)
        lam = src - i0
        xu = x[:, :, i0] * (1.0 - lam) + x[:, :, i1] * lam           # upsample x2
        Pm = jnp.asarray(unpool_weight(pool_list, cpe))
        xb = jnp.einsum('oc,bct->bot', Pm, xu)                       # skeleton unpool
        xp = jnp.pad(xb, ((0, 0), (0, 0), (PAD, PAD)), mode='reflect')
        win = jnp.stack([xp[:, :, k:k + t2] for k in range(K)], axis=-1)
        y = jnp.einsum('ogk,bgtk->bot', wc, win) + bc[None, :, None]
        y = y + 0.01 * (off @ wo.T + bo)[:, :, None]
        return y[:, :, :-1] if crop else y

    h = lrelu(dyn_stage(l_m, raw["wc0"], raw["bc0"], raw["wo0"], raw["bo0"],
                        l_t, P1, 16, False), 0.2)
    y_m = dyn_stage(h, raw["wc1"], raw["bc1"], raw["wo1"], raw["bo1"],
                    y_t, P0, 8, True)

    # marker decoder
    def res(m, wa, ba, wb, bb):
        t = lrelu(m @ wa + ba, 0.2)
        return t @ wb + bb + m

    def dense1(m):
        return m @ raw["wd1"] + y_t @ raw["wd1o"] + raw["bd1"] + raw["bd1o"]

    m = l_c @ raw["wd0"] + l_t @ raw["wd0o"] + raw["bd0"] + raw["bd0o"]
    m = res(m, raw["wr0a"], raw["br0a"], raw["wr0b"], raw["br0b"])
    m = res(dense1(m), raw["wr1a"], raw["br1a"], raw["wr1b"], raw["br1b"])
    m = res(dense1(m), raw["wr1a"], raw["br1a"], raw["wr1b"], raw["br1b"])
    m = lrelu(m, 0.5)
    y_c = m @ raw["wout"] + raw["bout"]
    return y_c, y_t, y_m


# ----------------------------------- main -------------------------------------
if __name__ == "__main__":
    key = jax.random.PRNGKey(0)
    kp, kc, kt, km = jax.random.split(key, 4)
    raw = init_raw_params(kp)
    packed = pack_params(raw)

    l_c = jax.random.normal(kc, (B, HID), jnp.float32)            # marker latent
    l_t = jax.random.normal(kt, (B, C_LT), jnp.float32)           # template latent
    l_m = jax.random.normal(km, (B, C_LM, T_LAT), jnp.float32)    # motion latent (NCT)

    fwd = jax.jit(decoder_forward)
    Y_c, Y_t, Y_m = fwd(packed, l_c, l_t, l_m)
    jax.block_until_ready((Y_c, Y_t, Y_m))

    assert Y_c.shape == (B, OUT_SIZE)
    assert Y_t.shape == (B, Y_T_DIM)
    assert Y_m.shape == (B, C_OUT1, T_OUT1)
    assert all(bool(jnp.all(jnp.isfinite(y))) for y in (Y_c, Y_t, Y_m))

    # numeric validation of the folded operators against an unfused reference
    raw_j = {k: jnp.asarray(v) for k, v in raw.items()}
    R_c, R_t, R_m = reference_forward(raw_j, l_c, l_t, l_m)
    np.testing.assert_allclose(np.asarray(Y_t), np.asarray(R_t), rtol=2e-2, atol=2e-2)
    np.testing.assert_allclose(np.asarray(Y_c), np.asarray(R_c), rtol=5e-2, atol=5e-2)
    np.testing.assert_allclose(np.asarray(Y_m), np.asarray(R_m), rtol=1e-1, atol=1e-1)

    print("KERNEL_OK")
</pallas_src>

<mosaic_0001>
module attributes {stable_mosaic.version = 11 : i64} {
  func.func @_decoder_kernel(%arg0: memref<2x352xf32, #tpu.memory_space<vmem>>, %arg1: memref<352x384xf32, #tpu.memory_space<vmem>>, %arg2: memref<352x512xbf16, #tpu.memory_space<vmem>>, %arg3: memref<640x896xbf16, #tpu.memory_space<vmem>>, %arg4: memref<192x640xf32, #tpu.memory_space<vmem>>, %arg5: memref<2x1152xf32, #tpu.memory_space<vmem>>) attributes {dimension_semantics = [], scalar_prefetch = 0 : i64, scratch_operands = 0 : i64, tpu.core_type = #tpu.core_type<tc>} {
    %c0 = arith.constant 0 : index
    %c0_0 = arith.constant 0 : index
    %0 = vector.load %arg0[%c0, %c0_0] : memref<2x352xf32, #tpu.memory_space<vmem>>, vector<2x352xf32>
    %1 = arith.truncf %0 : vector<2x352xf32> to vector<2x352xbf16>
    %c0_1 = arith.constant 0 : index
    %c0_2 = arith.constant 0 : index
    %2 = vector.load %arg1[%c0_1, %c0_2] : memref<352x384xf32, #tpu.memory_space<vmem>>, vector<352x384xf32>
    %cst = arith.constant dense<0.000000e+00> : vector<2x384xf32>
    %3 = tpu.matmul %0, %2, %cst {dimension_numbers = #tpu.dot_dimension_numbers<[1], [0], [0], [1], [0, 0, 1, 1], [], []>} : vector<2x352xf32>, vector<352x384xf32>, vector<2x384xf32> -> vector<2x384xf32>
    %4 = vector.extract_strided_slice %3 {offsets = [0, 0], sizes = [2, 128], strides = [1, 1]} : vector<2x384xf32> to vector<2x128xf32>
    %5 = vector.extract_strided_slice %3 {offsets = [0, 128], sizes = [2, 64], strides = [1, 1]} : vector<2x384xf32> to vector<2x64xf32>
    %6 = vector.extract_strided_slice %3 {offsets = [0, 256], sizes = [2, 64], strides = [1, 1]} : vector<2x384xf32> to vector<2x64xf32>
    %7 = arith.truncf %4 : vector<2x128xf32> to vector<2x128xbf16>
    %c0_3 = arith.constant 0 : index
    %c0_4 = arith.constant 0 : index
    %8 = vector.load %arg2[%c0_3, %c0_4] : memref<352x512xbf16, #tpu.memory_space<vmem>>, vector<352x512xbf16>
    %cst_5 = arith.constant dense<0.000000e+00> : vector<2x512xf32>
    %9 = tpu.matmul %1, %8, %cst_5 {dimension_numbers = #tpu.dot_dimension_numbers<[1], [0], [0], [1], [0, 0, 1, 1], [], []>} : vector<2x352xbf16>, vector<352x512xbf16>, vector<2x512xf32> -> vector<2x512xf32>
    %cst_6 = arith.constant 0.000000e+00 : f32
    %10 = vector.broadcast %cst_6 : f32 to vector<2x512xf32>
    %11 = arith.cmpf oge, %9, %10 : vector<2x512xf32>
    %cst_7 = arith.constant 2.000000e-01 : f32
    %12 = vector.broadcast %cst_7 : f32 to vector<2x512xf32>
    %13 = arith.mulf %12, %9 : vector<2x512xf32>
    %14 = arith.select %11, %9, %13 : vector<2x512xi1>, vector<2x512xf32>
    %15 = arith.truncf %14 : vector<2x512xf32> to vector<2x512xbf16>
    %c0_8 = arith.constant 0 : index
    %c0_9 = arith.constant 0 : index
    %16 = vector.load %arg3[%c0_8, %c0_9] : memref<640x896xbf16, #tpu.memory_space<vmem>>, vector<512x896xbf16>
    %cst_10 = arith.constant dense<0.000000e+00> : vector<2x896xf32>
    %17 = tpu.matmul %15, %16, %cst_10 {dimension_numbers = #tpu.dot_dimension_numbers<[1], [0], [0], [1], [0, 0, 1, 1], [], []>} : vector<2x512xbf16>, vector<512x896xbf16>, vector<2x896xf32> -> vector<2x896xf32>
    %c512 = arith.constant 512 : index
    %c0_11 = arith.constant 0 : index
    %18 = vector.load %arg3[%c512, %c0_11] : memref<640x896xbf16, #tpu.memory_space<vmem>>, vector<128x896xbf16>
    %cst_12 = arith.constant dense<0.000000e+00> : vector<2x896xf32>
    %19 = tpu.matmul %7, %18, %cst_12 {dimension_numbers = #tpu.dot_dimension_numbers<[1], [0], [0], [1], [0, 0, 1, 1], [], []>} : vector<2x128xbf16>, vector<128x896xbf16>, vector<2x896xf32> -> vector<2x896xf32>
    %20 = arith.addf %17, %19 : vector<2x896xf32>
    %c0_13 = arith.constant 0 : index
    %c0_14 = arith.constant 0 : index
    %21 = vector.load %arg4[%c0_13, %c0_14] : memref<192x640xf32, #tpu.memory_space<vmem>>, vector<192x640xf32>
    %22 = vector.extract_strided_slice %21 {offsets = [0, 0], sizes = [64, 640], strides = [1, 1]} : vector<192x640xf32> to vector<64x640xf32>
    %23 = vector.extract_strided_slice %21 {offsets = [64, 0], sizes = [128, 640], strides = [1, 1]} : vector<192x640xf32> to vector<128x640xf32>
    %cst_15 = arith.constant dense<0.000000e+00> : vector<2x640xf32>
    %24 = tpu.matmul %4, %23, %cst_15 {dimension_numbers = #tpu.dot_dimension_numbers<[1], [0], [0], [1], [0, 0, 1, 1], [], []>} : vector<2x128xf32>, vector<128x640xf32>, vector<2x640xf32> -> vector<2x640xf32>
    %cst_16 = arith.constant 0.000000e+00 : f32
    %25 = vector.broadcast %cst_16 : f32 to vector<2x64xf32>
    %26 = arith.cmpf oge, %6, %25 : vector<2x64xf32>
    %cst_17 = arith.constant 2.000000e-01 : f32
    %27 = vector.broadcast %cst_17 : f32 to vector<2x64xf32>
    %28 = arith.mulf %27, %6 : vector<2x64xf32>
    %29 = arith.select %26, %6, %28 : vector<2x64xi1>, vector<2x64xf32>
    %30 = vector.extract_strided_slice %22 {offsets = [0, 256], sizes = [64, 64], strides = [1, 1]} : vector<64x640xf32> to vector<64x64xf32>
    %cst_18 = arith.constant dense<0.000000e+00> : vector<2x64xf32>
    %31 = tpu.matmul %29, %30, %cst_18 {dimension_numbers = #tpu.dot_dimension_numbers<[1], [0], [0], [1], [0, 0, 1, 1], [], []>} : vector<2x64xf32>, vector<64x64xf32>, vector<2x64xf32> -> vector<2x64xf32>
    %32 = vector.extract_strided_slice %24 {offsets = [0, 256], sizes = [2, 64], strides = [1, 1]} : vector<2x640xf32> to vector<2x64xf32>
    %33 = arith.addf %31, %32 : vector<2x64xf32>
    %34 = arith.addf %33, %5 : vector<2x64xf32>
    %35 = vector.extract_strided_slice %22 {offsets = [0, 0], sizes = [64, 256], strides = [1, 1]} : vector<64x640xf32> to vector<64x256xf32>
    %cst_19 = arith.constant dense<0.000000e+00> : vector<2x256xf32>
    %36 = tpu.matmul %34, %35, %cst_19 {dimension_numbers = #tpu.dot_dimension_numbers<[1], [0], [0], [1], [0, 0, 1, 1], [], []>} : vector<2x64xf32>, vector<64x256xf32>, vector<2x256xf32> -> vector<2x256xf32>
    %37 = vector.extract_strided_slice %24 {offsets = [0, 0], sizes = [2, 256], strides = [1, 1]} : vector<2x640xf32> to vector<2x256xf32>
    %38 = arith.addf %36, %37 : vector<2x256xf32>
    %39 = vector.extract_strided_slice %38 {offsets = [0, 0], sizes = [2, 64], strides = [1, 1]} : vector<2x256xf32> to vector<2x64xf32>
    %40 = vector.extract_strided_slice %38 {offsets = [0, 128], sizes = [2, 64], strides = [1, 1]} : vector<2x256xf32> to vector<2x64xf32>
    %cst_20 = arith.constant 0.000000e+00 : f32
    %41 = vector.broadcast %cst_20 : f32 to vector<2x64xf32>
    %42 = arith.cmpf oge, %40, %41 : vector<2x64xf32>
    %cst_21 = arith.constant 2.000000e-01 : f32
    %43 = vector.broadcast %cst_21 : f32 to vector<2x64xf32>
    %44 = arith.mulf %43, %40 : vector<2x64xf32>
    %45 = arith.select %42, %40, %44 : vector<2x64xi1>, vector<2x64xf32>
    %46 = vector.extract_strided_slice %22 {offsets = [0, 384], sizes = [64, 64], strides = [1, 1]} : vector<64x640xf32> to vector<64x64xf32>
    %cst_22 = arith.constant dense<0.000000e+00> : vector<2x64xf32>
    %47 = tpu.matmul %45, %46, %cst_22 {dimension_numbers = #tpu.dot_dimension_numbers<[1], [0], [0], [1], [0, 0, 1, 1], [], []>} : vector<2x64xf32>, vector<64x64xf32>, vector<2x64xf32> -> vector<2x64xf32>
    %48 = vector.extract_strided_slice %24 {offsets = [0, 384], sizes = [2, 64], strides = [1, 1]} : vector<2x640xf32> to vector<2x64xf32>
    %49 = arith.addf %47, %48 : vector<2x64xf32>
    %50 = arith.addf %49, %39 : vector<2x64xf32>
    %51 = vector.extract_strided_slice %22 {offsets = [0, 0], sizes = [64, 256], strides = [1, 1]} : vector<64x640xf32> to vector<64x256xf32>
    %cst_23 = arith.constant dense<0.000000e+00> : vector<2x256xf32>
    %52 = tpu.matmul %50, %51, %cst_23 {dimension_numbers = #tpu.dot_dimension_numbers<[1], [0], [0], [1], [0, 0, 1, 1], [], []>} : vector<2x64xf32>, vector<64x256xf32>, vector<2x256xf32> -> vector<2x256xf32>
    %53 = vector.extract_strided_slice %24 {offsets = [0, 0], sizes = [2, 256], strides = [1, 1]} : vector<2x640xf32> to vector<2x256xf32>
    %54 = arith.addf %52, %53 : vector<2x256xf32>
    %55 = vector.extract_strided_slice %54 {offsets = [0, 0], sizes = [2, 64], strides = [1, 1]} : vector<2x256xf32> to vector<2x64xf32>
    %56 = vector.extract_strided_slice %54 {offsets = [0, 128], sizes = [2, 64], strides = [1, 1]} : vector<2x256xf32> to vector<2x64xf32>
    %cst_24 = arith.constant 0.000000e+00 : f32
    %57 = vector.broadcast %cst_24 : f32 to vector<2x64xf32>
    %58 = arith.cmpf oge, %56, %57 : vector<2x64xf32>
    %cst_25 = arith.constant 2.000000e-01 : f32
    %59 = vector.broadcast %cst_25 : f32 to vector<2x64xf32>
    %60 = arith.mulf %59, %56 : vector<2x64xf32>
    %61 = arith.select %58, %56, %60 : vector<2x64xi1>, vector<2x64xf32>
    %62 = vector.extract_strided_slice %22 {offsets = [0, 384], sizes = [64, 64], strides = [1, 1]} : vector<64x640xf32> to vector<64x64xf32>
    %cst_26 = arith.constant dense<0.000000e+00> : vector<2x64xf32>
    %63 = tpu.matmul %61, %62, %cst_26 {dimension_numbers = #tpu.dot_dimension_numbers<[1], [0], [0], [1], [0, 0, 1, 1], [], []>} : vector<2x64xf32>, vector<64x64xf32>, vector<2x64xf32> -> vector<2x64xf32>
    %64 = vector.extract_strided_slice %24 {offsets = [0, 384], sizes = [2, 64], strides = [1, 1]} : vector<2x640xf32> to vector<2x64xf32>
    %65 = arith.addf %63, %64 : vector<2x64xf32>
    %66 = arith.addf %65, %55 : vector<2x64xf32>
    %cst_27 = arith.constant 0.000000e+00 : f32
    %67 = vector.broadcast %cst_27 : f32 to vector<2x64xf32>
    %68 = arith.cmpf oge, %66, %67 : vector<2x64xf32>
    %cst_28 = arith.constant 5.000000e-01 : f32
    %69 = vector.broadcast %cst_28 : f32 to vector<2x64xf32>
    %70 = arith.mulf %69, %66 : vector<2x64xf32>
    %71 = arith.select %68, %66, %70 : vector<2x64xi1>, vector<2x64xf32>
    %72 = vector.extract_strided_slice %22 {offsets = [0, 512], sizes = [64, 128], strides = [1, 1]} : vector<64x640xf32> to vector<64x128xf32>
    %cst_29 = arith.constant dense<0.000000e+00> : vector<2x128xf32>
    %73 = tpu.matmul %71, %72, %cst_29 {dimension_numbers = #tpu.dot_dimension_numbers<[1], [0], [0], [1], [0, 0, 1, 1], [], []>} : vector<2x64xf32>, vector<64x128xf32>, vector<2x128xf32> -> vector<2x128xf32>
    %74 = vector.extract_strided_slice %24 {offsets = [0, 512], sizes = [2, 128], strides = [1, 1]} : vector<2x640xf32> to vector<2x128xf32>
    %75 = arith.addf %73, %74 : vector<2x128xf32>
    %c0_30 = arith.constant 0 : index
    %c0_31 = arith.constant 0 : index
    %76 = vector.load %arg5[%c0_30, %c0_31] : memref<2x1152xf32, #tpu.memory_space<vmem>>, vector<2x896xf32>
    tpu.vector_store %arg5[%c0_30, %c0_31], %20 {strides = array<i32>} : memref<2x1152xf32, #tpu.memory_space<vmem>>, vector<2x896xf32>,
    %c0_32 = arith.constant 0 : index
    %c896 = arith.constant 896 : index
    %77 = vector.load %arg5[%c0_32, %c896] : memref<2x1152xf32, #tpu.memory_space<vmem>>, vector<2x128xf32>
    tpu.vector_store %arg5[%c0_32, %c896], %4 {strides = array<i32>} : memref<2x1152xf32, #tpu.memory_space<vmem>>, vector<2x128xf32>,
    %c0_33 = arith.constant 0 : index
    %c1024 = arith.constant 1024 : index
    %78 = vector.load %arg5[%c0_33, %c1024] : memref<2x1152xf32, #tpu.memory_space<vmem>>, vector<2x128xf32>
    tpu.vector_store %arg5[%c0_33, %c1024], %75 {strides = array<i32>} : memref<2x1152xf32, #tpu.memory_space<vmem>>, vector<2x128xf32>,
    return
  }
}

</mosaic_0001>

<bundles_post_ra>
// kernel: decoder_forward.1
= control target key start
LH: loop header
LB: loop body
LE: loop exit
PB: predicated region body
PF: predicated region fallthrough
CT: control target
= control target key end

     0   :  { %10 = vsyncpa [#allocation3], 0  ;;  %s6028_s0 = inlined_call_operand.vmem [shape: f32[2,352], index: 0, kind: input, shape index: {}]   ;;  %s6029_s1 = inlined_call_operand.hbm [shape: f32[352,384], index: 1, kind: input, shape index: {}]   ;;  %s6030_s2 = inlined_call_operand.hbm [shape: bf16[352,512], index: 2, kind: input, shape index: {}]   ;;  %s6031_s3 = inlined_call_operand.hbm [shape: bf16[640,896], index: 3, kind: input, shape index: {}]   ;;  %s6032_s4 = inlined_call_operand.hbm [shape: f32[192,640], index: 4, kind: input, shape index: {}]   ;;  %s6033_s5 = inlined_call_operand.vmem [shape: f32[2,1152], index: 5, kind: output, shape index: {}]  }
   0x1   :  { %11 = vsyncpa [#allocation5], 0 }
   0x2   :  { %12 = vsyncpa [#allocation8], 0  ;;  %s5644_s18 = smov [#allocation4]  }
   0x3   :  { %s32_s19 = sshll.u32 %s5644_s18, 4  ;;  %s33_s19 = int_to_ptr.vmem [resolvable:$true] %s32_s19 }
   0x4   :  { %s5566_s20 = scalar_lea.vmem %s33_s19, 11264  ;;  %p5571_p1 = scmp.lt.s32.totalorder %s33_s19, %s33_s19 }
   0x5   :  { %p5567_p0 = scmp.ne.s32.totalorder %s33_s19, %s5566_s20  ;;  %p5572_p2 = scmp.lt.s32.totalorder %s5566_s20, %s5566_s20 }
   0x7   :  { %p5573_p3 = por %p5572_p2, %p5571_p1 }
   0x9   :  { %p5574_p4 = pnand %p5573_p3, %p5567_p0 }
   0xb   :  { %5577 = shalt.err (!%p5574_p4)
}
   0xc   :  { %s5645_s21 = smov 256   ;;  %s5646_s22 = smov 16  }
   0xd   :  { %38 = dma.hbm_to_vmem [thread:$0]  %s6030_s2, 11264, %s33_s19, [#allocation5], %s5645_s21, %s5645_s21, %s5646_s22  }
   0xe   :  { %s5647_s25 = smov [#allocation2]  }
   0xf   :  { %s20_s26 = sshll.u32 %s5647_s25, 4  ;;  %s21_s26 = int_to_ptr.vmem [resolvable:$true] %s20_s26 }
  0x10   :  { %s5586_s27 = scalar_lea.vmem %s21_s26, 16896  ;;  %p5591_p6 = scmp.lt.s32.totalorder %s21_s26, %s21_s26 }
  0x11   :  { %p5587_p5 = scmp.ne.s32.totalorder %s21_s26, %s5586_s27  ;;  %p5592_p7 = scmp.lt.s32.totalorder %s5586_s27, %s5586_s27 }
  0x13   :  { %p5593_p8 = por %p5592_p7, %p5591_p6 }
  0x15   :  { %p5594_p9 = pnand %p5593_p8, %p5587_p5 }
  0x17   :  { %5597 = shalt.err (!%p5594_p9)
}
  0x18   :  { %s5648_s28 = smov 384   ;;  %s5649_s29 = smov 24  }
  0x19   :  { %26 = dma.hbm_to_vmem [thread:$0]  %s6029_s1, 16896, %s21_s26, [#allocation3], %s5648_s28, %s5648_s28, %s5649_s29  }
  0x1a   :  { %s5650_s7 = smov [#allocation6]  }
  0x1b   :  { %s44_s8 = sshll.u32 %s5650_s7, 4  ;;  %s45_s8 = int_to_ptr.vmem [resolvable:$true] %s44_s8 }
  0x1c   :  { %s5606_s2 = scalar_lea.vmem %s45_s8, 35840  ;;  %p5611_p11 = scmp.lt.s32.totalorder %s45_s8, %s45_s8 }
  0x1d   :  { %p5607_p10 = scmp.ne.s32.totalorder %s45_s8, %s5606_s2  ;;  %p5612_p12 = scmp.lt.s32.totalorder %s5606_s2, %s5606_s2 }
  0x1f   :  { %p5613_p13 = por %p5612_p12, %p5611_p11 }
  0x21   :  { %p5614_p0 = pnand %p5613_p13, %p5607_p10 }
  0x23   :  { %5617 = shalt.err (!%p5614_p0)
}
  0x24   :  { %s5651_s9 = smov 448   ;;  %s5652_s10 = smov 28  }
  0x25   :  { %50 = dma.hbm_to_vmem [thread:$0]  %s6031_s3, 35840, %s45_s8, [#allocation5], %s5651_s9, %s5651_s9, %s5652_s10  }
  0x26   :  { %s5653_s13 = smov [#allocation7]  }
  0x27   :  { %s56_s14 = sshll.u32 %s5653_s13, 4  ;;  %s57_s14 = int_to_ptr.vmem [resolvable:$true] %s56_s14 }
  0x28   :  { %s5626_s1 = scalar_lea.vmem %s57_s14, 15360  ;;  %p5631_p2 = scmp.lt.s32.totalorder %s57_s14, %s57_s14 }
  0x29   :  { %p5627_p1 = scmp.ne.s32.totalorder %s57_s14, %s5626_s1  ;;  %p5632_p3 = scmp.lt.s32.totalorder %s5626_s1, %s5626_s1 }
  0x2b   :  { %p5633_p4 = por %p5632_p3, %p5631_p2 }
  0x2d   :  { %p5634_p5 = pnand %p5633_p4, %p5627_p1 }
  0x2f   :  { %5637 = shalt.err (!%p5634_p5)
}
  0x30   :  { %s5654_s15 = smov 640   ;;  %s5655_s16 = smov 40  }
  0x31   :  { %62 = dma.hbm_to_vmem [thread:$0]  %s6032_s4, 15360, %s57_s14, [#allocation8], %s5654_s15, %s5654_s15, %s5655_s16  }
  0x32   :  { %5638 = dma.done.wait [#allocation3], 16896  }
  0x33   :  { %5639 = vsyncadd [#allocation3], 4294950400 }
  0x34   :  { %5640 = dma.done.wait [#allocation5], 47104  }
  0x35   :  { %5641 = vsyncadd [#allocation5], 4294920192 }
  0x36   :  { %5642 = dma.done.wait [#allocation8], 15360  }
  0x37   :  { %5643 = vsyncadd [#allocation8], 4294951936  ;;  %v5656_v0 = vmov 0.0   ;;  %v146_v1 = vld [vmem:[#allocation2 + $0x170] sm:$0xff]  ;;  %v145_v3 = vld [vmem:[#allocation2 + $0x168] sm:$0xff]  ;;  %v82_v27 = vlaneseq  ;;  %vm232_vm0 = vcmask 785408  }
  0x38   :  { %370 = vmatprep.mubr.f32.mxu1 %v5656_v0  ;;  %v230_v2 = vld [vmem:[#allocation2 + $0x410] sm:$0xff]  ;;  %235 = vmatprep.subr.mxu0 %v146_v1  ;;  %v229_v4 = vld [vmem:[#allocation2 + $0x408] sm:$0xff]  ;;  %v143_v5 = vld [vmem:[#allocation2 + $0x158] sm:$0xff]  ;;  %v5657_v25 = vmov 1983009808   ;;  %vm5658_vm1 = vmmov 0  }
  0x39   :  { %314 = vmatprep.subr.mxu1 %v230_v2  ;;  %v227_v6 = vld [vmem:[#allocation2 + $0x3f8] sm:$0xff]  ;;  %236 = vmatpush1.msra.mxu0 %v145_v3  ;;  %v142_v7 = vld [vmem:[#allocation2 + $0x150] sm:$0xff]  ;;  %v140_v9 = vld [vmem:[#allocation2 + $0x140] sm:$0xff]  ;;  %v80_v26 = vunpack.c.l.s4 %v5657_v25  ;;  %v83_v37 = vshrl.u32 %v82_v27, 7  ;;  %vm3813_vm7 = vcmask 523264  }
  0x3a   :  { %315 = vmatpush1.msra.mxu1 %v229_v4  ;;  %v226_v8 = vld [vmem:[#allocation2 + $0x3f0] sm:$0xff]  ;;  %237 = vmatprep.subr.mxu0 %v143_v5  ;;  %v224_v10 = vld [vmem:[#allocation2 + $0x3e0] sm:$0xff]  ;;  %v139_v11 = vld [vmem:[#allocation2 + $0x138] sm:$0xff] }
  0x3b   :  { %316 = vmatprep.subr.mxu1 %v227_v6  ;;  %v223_v12 = vld [vmem:[#allocation2 + $0x3d8] sm:$0xff]  ;;  %238 = vmatpush1.msra.mxu0 %v142_v7  ;;  %v137_v13 = vld [vmem:[#allocation2 + $0x128] sm:$0xff]  ;;  %v136_v15 = vld [vmem:[#allocation2 + $0x120] sm:$0xff]  ;;  %v81_v36 = vunpack.c.0.s8 %v80_v26 }
  0x3c   :  { %317 = vmatpush1.msra.mxu1 %v226_v8  ;;  %v221_v14 = vld [vmem:[#allocation2 + $0x3c8] sm:$0xff]  ;;  %239 = vmatprep.subr.mxu0 %v140_v9  ;;  %v220_v16 = vld [vmem:[#allocation2 + $0x3c0] sm:$0xff]  ;;  %v134_v17 = vld [vmem:[#allocation2 + $0x110] sm:$0xff] }
  0x3d   :  { %318 = vmatprep.subr.mxu1 %v224_v10  ;;  %240 = vmatpush1.msra.mxu0 %v139_v11  ;;  %v218_v18 = vld [vmem:[#allocation2 + $0x3b0] sm:$0xff]  ;;  %v133_v19 = vld [vmem:[#allocation2 + $0x108] sm:$0xff]  ;;  %v131_v21 = vld [vmem:[#allocation2 + $0xf8] sm:$0xff]  ;;  %v5710_v48 = vsub.s32 %v81_v36, %v83_v37 }
  0x3e   :  { %319 = vmatpush1.msra.mxu1 %v223_v12  ;;  %241 = vmatprep.subr.mxu0 %v137_v13  ;;  %v217_v20 = vld [vmem:[#allocation2 + $0x3a8] sm:$0xff]  ;;  %v215_v22 = vld [vmem:[#allocation2 + $0x398] sm:$0xff]  ;;  %v130_v23 = vld [vmem:[#allocation2 + $0xf0] sm:$0xff] }
  0x3f   :  { %320 = vmatprep.subr.mxu1 %v221_v14  ;;  %242 = vmatpush1.msra.mxu0 %v136_v15  ;;  %v214_v24 = vld [vmem:[#allocation2 + $0x390] sm:$0xff]  ;;  %v128_v28 = vld [vmem:[#allocation2 + $0xe0] sm:$0xff]  ;;  %v127_v30 = vld [vmem:[#allocation2 + $0xd8] sm:$0xff] }
  0x40   :  { %321 = vmatpush1.msra.mxu1 %v220_v16  ;;  %243 = vmatprep.subr.mxu0 %v134_v17  ;;  %v212_v29 = vld [vmem:[#allocation2 + $0x380] sm:$0xff]  ;;  %v211_v31 = vld [vmem:[#allocation2 + $0x378] sm:$0xff]  ;;  %v125_v32 = vld [vmem:[#allocation2 + $0xc8] sm:$0xff] }
  0x41   :  { %322 = vmatprep.subr.mxu1 %v218_v18  ;;  %244 = vmatpush1.msra.mxu0 %v133_v19  ;;  %v209_v33 = vld [vmem:[#allocation2 + $0x368] sm:$0xff]  ;;  %v124_v34 = vld [vmem:[#allocation2 + $0xc0] sm:$0xff]  ;;  %v122_v38 = vld [vmem:[#allocation2 + $0xb0] sm:$0xff] }
  0x42   :  { %323 = vmatpush1.msra.mxu1 %v217_v20  ;;  %245 = vmatprep.subr.mxu0 %v131_v21  ;;  %v208_v35 = vld [vmem:[#allocation2 + $0x360] sm:$0xff]  ;;  %v206_v39 = vld [vmem:[#allocation2 + $0x350] sm:$0xff]  ;;  %v121_v40 = vld [vmem:[#allocation2 + $0xa8] sm:$0xff] }
  0x43   :  { %324 = vmatprep.subr.mxu1 %v215_v22  ;;  %246 = vmatpush1.msra.mxu0 %v130_v23  ;;  %v205_v41 = vld [vmem:[#allocation2 + $0x348] sm:$0xff]  ;;  %v119_v42 = vld [vmem:[#allocation2 + $0x98] sm:$0xff]  ;;  %v5706_v44 = vld [vmem:[%s6028_s0] sm:$0x3f] }
  0x44   :  { %325 = vmatpush1.msra.mxu1 %v214_v24  ;;  %247 = vmatprep.subr.mxu0 %v128_v28  ;;  %v203_v43 = vld [vmem:[#allocation2 + $0x338] sm:$0xff]  ;;  %v118_v45 = vld [vmem:[#allocation2 + $0x90] sm:$0xff]  ;;  %v78_v47 = vcombine.high %v5706_v44, %v5706_v44  ;;  %v116_v49 = vld [vmem:[#allocation2 + $0x80] sm:$0xff] }
  0x45   :  { %326 = vmatprep.subr.mxu1 %v212_v29  ;;  %248 = vmatpush1.msra.mxu0 %v127_v30  ;;  %v202_v46 = vld [vmem:[#allocation2 + $0x330] sm:$0xff]  ;;  %v200_v50 = vld [vmem:[#allocation2 + $0x320] sm:$0xff]  ;;  %v115_v51 = vld [vmem:[#allocation2 + $0x78] sm:$0xff] }
  0x46   :  { %327 = vmatpush1.msra.mxu1 %v211_v31  ;;  %249 = vmatprep.subr.mxu0 %v125_v32  ;;  %v199_v52 = vld [vmem:[#allocation2 + $0x318] sm:$0xff]  ;;  %v113_v53 = vld [vmem:[#allocation2 + $0x68] sm:$0xff]  ;;  %v112_v55 = vld [vmem:[#allocation2 + $0x60] sm:$0xff]  ;;  %v5713_v57 = vrot.slane %v78_v47, %v5710_v48 }
  0x47   :  { %328 = vmatprep.subr.mxu1 %v209_v33  ;;  %250 = vmatpush1.msra.mxu0 %v124_v34  ;;  %v197_v54 = vld [vmem:[#allocation2 + $0x308] sm:$0xff]  ;;  %v196_v56 = vld [vmem:[#allocation2 + $0x300] sm:$0xff]  ;;  %v110_v58 = vld [vmem:[#allocation2 + $0x50] sm:$0xff] }
  0x48   :  { %329 = vmatpush1.msra.mxu1 %v208_v35  ;;  %251 = vmatprep.subr.mxu0 %v122_v38  ;;  %v195_v59 = vld [vmem:[#allocation2 + $0x2f8] sm:$0xff]  ;;  %v109_v60 = vld [vmem:[#allocation2 + $0x48] sm:$0xff]  ;;  %v192_v63 = vld [vmem:[#allocation2 + $0x2e0] sm:$0xff] }
  0x49   :  { %330 = vmatprep.subr.mxu1 %v206_v39  ;;  %252 = vmatpush1.msra.mxu0 %v121_v40  ;;  %v147_v61 = vld [vmem:[#allocation2 + $0x178] sm:$0xff]  ;;  %v106_v1 = vld [vmem:[#allocation2 + $0x30] sm:$0xff]  ;;  %v144_v2 = vld [vmem:[#allocation2 + $0x160] sm:$0xff] }
  0x4a   :  { %331 = vmatpush1.msra.mxu1 %v205_v41  ;;  %253 = vmatprep.subr.mxu0 %v119_v42  ;;  %v107_v62 = vld [vmem:[#allocation2 + $0x38] sm:$0xff]  ;;  %v104_v3 = vld [vmem:[#allocation2 + $0x20] sm:$0xff]  ;;  %v189_v4 = vld [vmem:[#allocation2 + $0x2c8] sm:$0xff] }
  0x4b   :  { %332 = vmatprep.subr.mxu1 %v203_v43  ;;  %254 = vmatpush1.msra.mxu0 %v118_v45  ;;  %v103_v5 = vld [vmem:[#allocation2 + $0x18] sm:$0xff]  ;;  %v141_v6 = vld [vmem:[#allocation2 + $0x148] sm:$0xff]  ;;  %v186_v8 = vld [vmem:[#allocation2 + $0x2b0] sm:$0xff] }
  0x4c   :  { %333 = vmatpush1.msra.mxu1 %v202_v46  ;;  %255 = vmatprep.subr.mxu0 %v116_v49  ;;  %v101_v7 = vld [vmem:[#allocation2 + $0x8] sm:$0xff]  ;;  %v100_v9 = vld [vmem:[#allocation2] sm:$0xff]  ;;  %v138_v10 = vld [vmem:[#allocation2 + $0x130] sm:$0xff] }
  0x4d   :  { %334 = vmatprep.subr.mxu1 %v200_v50  ;;  %256 = vmatpush1.msra.mxu0 %v115_v51  ;;  %v194_v11 = vld [vmem:[#allocation2 + $0x2f0] sm:$0xff]  ;;  %v183_v12 = vld [vmem:[#allocation2 + $0x298] sm:$0xff]  ;;  %v193_v13 = vld [vmem:[#allocation2 + $0x2e8] sm:$0xff] }
  0x4e   :  { %335 = vmatpush1.msra.mxu1 %v199_v52  ;;  %257 = vmatprep.subr.mxu0 %v113_v53  ;;  %v135_v14 = vld [vmem:[#allocation2 + $0x118] sm:$0xff]  ;;  %v180_v16 = vld [vmem:[#allocation2 + $0x280] sm:$0xff]  ;;  %v190_v17 = vld [vmem:[#allocation2 + $0x2d0] sm:$0xff]  ;;  %v5719_v52 = vrot.slane %v5706_v44, %v5710_v48 }
  0x4f   :  { %336 = vmatprep.subr.mxu1 %v197_v54  ;;  %258 = vmatpush1.msra.mxu0 %v112_v55  ;;  %v191_v15 = vld [vmem:[#allocation2 + $0x2d8] sm:$0xff]  ;;  %v132_v18 = vld [vmem:[#allocation2 + $0x100] sm:$0xff]  ;;  %v177_v20 = vld [vmem:[#allocation2 + $0x268] sm:$0xff] }
  0x50   :  { %337 = vmatpush1.msra.mxu1 %v196_v56  ;;  %259 = vmatprep.subr.mxu0 %v110_v58  ;;  %v188_v19 = vld [vmem:[#allocation2 + $0x2c0] sm:$0xff]  ;;  %v187_v21 = vld [vmem:[#allocation2 + $0x2b8] sm:$0xff]  ;;  %v129_v22 = vld [vmem:[#allocation2 + $0xe8] sm:$0xff]  ;;  %v93_v44 = vcombine.high %v5719_v52, %v5719_v52 }
  0x51   :  { %4319 = vmatmul.mubr.msk.f32.vlgmr.msra.gmra.mxu1 %vm232_vm0, %v5713_v57  ;;  %4697 = vmatprep.subr.mxu1 %v195_v59  ;;  %v185_v23 = vld [vmem:[#allocation2 + $0x2a8] sm:$0xff]  ;;  %v174_v24 = vld [vmem:[#allocation2 + $0x250] sm:$0xff]  ;;  %v184_v25 = vld [vmem:[#allocation2 + $0x2a0] sm:$0xff] }
  0x52   :  { %260 = vmatpush1.msra.mxu0 %v109_v60  ;;  %4698 = vmatpush3.msra.mxu1 %v147_v61  ;;  %v126_v26 = vld [vmem:[#allocation2 + $0xd0] sm:$0xff]  ;;  %v171_v28 = vld [vmem:[#allocation2 + $0x238] sm:$0xff]  ;;  %v181_v29 = vld [vmem:[#allocation2 + $0x288] sm:$0xff] }
  0x53   :  { %261 = vmatprep.subr.mxu0 %v107_v62  ;;  %4699 = vmatprep.subr.mxu1 %v192_v63  ;;  %v182_v27 = vld [vmem:[#allocation2 + $0x290] sm:$0xff]  ;;  %v123_v30 = vld [vmem:[#allocation2 + $0xb8] sm:$0xff]  ;;  %v168_v32 = vld [vmem:[#allocation2 + $0x220] sm:$0xff] }
  0x54   :  { %262 = vmatpush1.msra.mxu0 %v106_v1  ;;  %4700 = vmatpush3.msra.mxu1 %v144_v2  ;;  %v179_v31 = vld [vmem:[#allocation2 + $0x278] sm:$0xff]  ;;  %v178_v33 = vld [vmem:[#allocation2 + $0x270] sm:$0xff]  ;;  %v120_v34 = vld [vmem:[#allocation2 + $0xa0] sm:$0xff] }
  0x55   :  { %263 = vmatprep.subr.mxu0 %v104_v3  ;;  %4701 = vmatprep.subr.mxu1 %v189_v4  ;;  %v176_v35 = vld [vmem:[#allocation2 + $0x260] sm:$0xff]  ;;  %v165_v36 = vld [vmem:[#allocation2 + $0x208] sm:$0xff]  ;;  %v175_v37 = vld [vmem:[#allocation2 + $0x258] sm:$0xff] }
  0x56   :  { %264 = vmatpush1.msra.mxu0 %v103_v5  ;;  %4702 = vmatpush3.msra.mxu1 %v141_v6  ;;  %v117_v38 = vld [vmem:[#allocation2 + $0x88] sm:$0xff]  ;;  %v162_v40 = vld [vmem:[#allocation2 + $0x1f0] sm:$0xff]  ;;  %v172_v41 = vld [vmem:[#allocation2 + $0x240] sm:$0xff] }
  0x57   :  { %265 = vmatprep.subr.mxu0 %v101_v7  ;;  %4703 = vmatprep.subr.mxu1 %v186_v8  ;;  %v173_v39 = vld [vmem:[#allocation2 + $0x248] sm:$0xff]  ;;  %v114_v42 = vld [vmem:[#allocation2 + $0x70] sm:$0xff]  ;;  %v159_v45 = vld [vmem:[#allocation2 + $0x1d8] sm:$0xff] }
  0x58   :  { %266 = vmatpush1.msra.mxu0 %v100_v9  ;;  %4704 = vmatpush3.msra.mxu1 %v138_v10  ;;  %v170_v43 = vld [vmem:[#allocation2 + $0x230] sm:$0xff]  ;;  %v169_v46 = vld [vmem:[#allocation2 + $0x228] sm:$0xff]  ;;  %v111_v47 = vld [vmem:[#allocation2 + $0x58] sm:$0xff] }
  0x59   :  { %267 = vmatprep.subr.mxu0 %v194_v11  ;;  %4705 = vmatprep.subr.mxu1 %v183_v12  ;;  %v167_v49 = vld [vmem:[#allocation2 + $0x218] sm:$0xff]  ;;  %v156_v50 = vld [vmem:[#allocation2 + $0x1c0] sm:$0xff]  ;;  %v166_v51 = vld [vmem:[#allocation2 + $0x210] sm:$0xff] }
  0x5a   :  { %268 = vmatpush2.msra.mxu0 %v193_v13  ;;  %4706 = vmatpush3.msra.mxu1 %v135_v14  ;;  %v108_v53 = vld [vmem:[#allocation2 + $0x40] sm:$0xff]  ;;  %v153_v55 = vld [vmem:[#allocation2 + $0x1a8] sm:$0xff]  ;;  %v163_v56 = vld [vmem:[#allocation2 + $0x1f8] sm:$0xff] }
  0x5b   :  { %269 = vmatprep.subr.mxu0 %v191_v15  ;;  %4707 = vmatprep.subr.mxu1 %v180_v16  ;;  %v164_v54 = vld [vmem:[#allocation2 + $0x200] sm:$0xff]  ;;  %v105_v58 = vld [vmem:[#allocation2 + $0x28] sm:$0xff]  ;;  %v150_v60 = vld [vmem:[#allocation2 + $0x190] sm:$0xff] }
  0x5c   :  { %270 = vmatpush2.msra.mxu0 %v190_v17  ;;  %4708 = vmatpush3.msra.mxu1 %v132_v18  ;;  %v161_v59 = vld [vmem:[#allocation2 + $0x1e8] sm:$0xff]  ;;  %v160_v61 = vld [vmem:[#allocation2 + $0x1e0] sm:$0xff]  ;;  %v102_v62 = vld [vmem:[#allocation2 + $0x10] sm:$0xff]  ;;  %v5730_v17 = vpack.c.bf16 %v93_v44, %v93_v44 }
  0x5d   :  { %271 = vmatprep.subr.mxu0 %v188_v19  ;;  %4709 = vmatprep.subr.mxu1 %v177_v20  ;;  %v158_v63 = vld [vmem:[#allocation2 + $0x1d0] sm:$0xff]  ;;  %v157_v1 = vld [vmem:[#allocation2 + $0x1c8] sm:$0xff]  ;;  %v231_v2 = vld [vmem:[#allocation2 + $0x418] sm:$0xff] }
  0x5e   :  { %272 = vmatpush2.msra.mxu0 %v187_v21  ;;  %4710 = vmatpush3.msra.mxu1 %v129_v22  ;;  %v155_v3 = vld [vmem:[#allocation2 + $0x1b8] sm:$0xff]  ;;  %v154_v4 = vld [vmem:[#allocation2 + $0x1b0] sm:$0xff]  ;;  %v228_v5 = vld [vmem:[#allocation2 + $0x400] sm:$0xff] }
  0x5f   :  { %273 = vmatprep.subr.mxu0 %v185_v23  ;;  %4711 = vmatprep.subr.mxu1 %v174_v24  ;;  %v152_v6 = vld [vmem:[#allocation2 + $0x1a0] sm:$0xff]  ;;  %v151_v7 = vld [vmem:[#allocation2 + $0x198] sm:$0xff]  ;;  %v225_v8 = vld [vmem:[#allocation2 + $0x3e8] sm:$0xff] }
  0x60   :  { %274 = vmatpush2.msra.mxu0 %v184_v25  ;;  %4712 = vmatpush3.msra.mxu1 %v126_v26  ;;  %v149_v9 = vld [vmem:[#allocation2 + $0x188] sm:$0xff]  ;;  %v148_v10 = vld [vmem:[#allocation2 + $0x180] sm:$0xff]  ;;  %v222_v11 = vld [vmem:[#allocation2 + $0x3d0] sm:$0xff] }
  0x61   :  { %275 = vmatprep.subr.mxu0 %v182_v27  ;;  %4713 = vmatprep.subr.mxu1 %v171_v28  ;;  %v5028_v12 = vld [vmem:[#allocation4 + $0xe4] ss:$16 sps:$4 sm:$0xff]   ;;  %v5026_v13 = vld [vmem:[#allocation4 + $0xe0] ss:$16 sps:$4 sm:$0xff]   ;;  %v219_v14 = vld [vmem:[#allocation2 + $0x3b8] sm:$0xff] }
  0x62   :  { %276 = vmatpush2.msra.mxu0 %v181_v29  ;;  %4714 = vmatpush3.msra.mxu1 %v123_v30  ;;  %v5031_v15 = vld [vmem:[#allocation4 + $0xc4] ss:$16 sps:$4 sm:$0xff]   ;;  %v5029_v18 = vld [vmem:[#allocation4 + $0xc0] ss:$16 sps:$4 sm:$0xff]   ;;  %v213_v19 = vld [vmem:[#allocation2 + $0x388] sm:$0xff] }
  0x63   :  { %277 = vmatprep.subr.mxu0 %v179_v31  ;;  %4715 = vmatprep.subr.mxu1 %v168_v32  ;;  %v216_v16 = vld [vmem:[#allocation2 + $0x3a0] sm:$0xff]  ;;  %v210_v21 = vld [vmem:[#allocation2 + $0x370] sm:$0xff]  ;;  %v207_v23 = vld [vmem:[#allocation2 + $0x358] sm:$0xff] }
  0x64   :  { %278 = vmatpush2.msra.mxu0 %v178_v33  ;;  %4716 = vmatpush3.msra.mxu1 %v120_v34  ;;  %v5034_v20 = vld [vmem:[#allocation4 + $0xa4] ss:$16 sps:$4 sm:$0xff]   ;;  %v5032_v22 = vld [vmem:[#allocation4 + $0xa0] ss:$16 sps:$4 sm:$0xff]   ;;  %v201_v27 = vld [vmem:[#allocation2 + $0x328] sm:$0xff] }
  0x65   :  { %279 = vmatprep.subr.mxu0 %v176_v35  ;;  %4717 = vmatprep.subr.mxu1 %v165_v36  ;;  %v5037_v24 = vld [vmem:[#allocation4 + $0x84] ss:$16 sps:$4 sm:$0xff]   ;;  %v5035_v26 = vld [vmem:[#allocation4 + $0x80] ss:$16 sps:$4 sm:$0xff]   ;;  %v5659_v36 = vmov 0  }
  0x66   :  { %280 = vmatpush2.msra.mxu0 %v175_v37  ;;  %4718 = vmatpush3.msra.mxu1 %v117_v38  ;;  %v204_v25 = vld [vmem:[#allocation2 + $0x340] sm:$0xff]  ;;  %v198_v28 = vld [vmem:[#allocation2 + $0x310] sm:$0xff] }
  0x67   :  { %281 = vmatprep.subr.mxu0 %v173_v39  ;;  %4719 = vmatprep.subr.mxu1 %v162_v40  ;;  %v5040_v29 = vld [vmem:[#allocation4 + $0x64] ss:$16 sps:$4 sm:$0xff]   ;;  %v5041_v31 = vld [vmem:[#allocation4 + $0x2a0] ss:$16 sps:$4 sm:$0xff]  }
  0x68   :  { %282 = vmatpush2.msra.mxu0 %v172_v41  ;;  %4720 = vmatpush3.msra.mxu1 %v114_v42  ;;  %v5043_v30 = vld [vmem:[#allocation4 + $0x2a4] ss:$16 sps:$4 sm:$0xff]   ;;  %v5038_v32 = vld [vmem:[#allocation4 + $0x60] ss:$16 sps:$4 sm:$0xff]  }
  0x69   :  { %283 = vmatprep.subr.mxu0 %v170_v43  ;;  %4721 = vmatprep.subr.mxu1 %v159_v45  ;;  %v5049_v33 = vld [vmem:[#allocation4 + $0x284] ss:$16 sps:$4 sm:$0xff]   ;;  %v5047_v35 = vld [vmem:[#allocation4 + $0x280] ss:$16 sps:$4 sm:$0xff]  }
  0x6a   :  { %284 = vmatpush2.msra.mxu0 %v169_v46  ;;  %4722 = vmatpush3.msra.mxu1 %v111_v47  ;;  %v5046_v34 = vld [vmem:[#allocation4 + $0x44] ss:$16 sps:$4 sm:$0xff]   ;;  %v5044_v37 = vld [vmem:[#allocation4 + $0x40] ss:$16 sps:$4 sm:$0xff]  }
  0x6b   :  { %285 = vmatprep.subr.mxu0 %v167_v49  ;;  %4723 = vmatprep.subr.mxu1 %v156_v50  ;;  %v5055_v38 = vld [vmem:[#allocation4 + $0x264] ss:$16 sps:$4 sm:$0xff]   ;;  %v5053_v40 = vld [vmem:[#allocation4 + $0x260] ss:$16 sps:$4 sm:$0xff]  }
  0x6c   :  { %286 = vmatpush2.msra.mxu0 %v166_v51  ;;  %4724 = vmatpush3.msra.mxu1 %v108_v53  ;;  %v5052_v39 = vld [vmem:[#allocation4 + $0x24] ss:$16 sps:$4 sm:$0xff]   ;;  %v5050_v41 = vld [vmem:[#allocation4 + $0x20] ss:$16 sps:$4 sm:$0xff]  }
  0x6d   :  { %287 = vmatprep.subr.mxu0 %v164_v54  ;;  %4725 = vmatprep.subr.mxu1 %v153_v55  ;;  %v5061_v42 = vld [vmem:[#allocation4 + $0x244] ss:$16 sps:$4 sm:$0xff]   ;;  %v5059_v45 = vld [vmem:[#allocation4 + $0x240] ss:$16 sps:$4 sm:$0xff]  }
  0x6e   :  { %288 = vmatpush2.msra.mxu0 %v163_v56  ;;  %4726 = vmatpush3.msra.mxu1 %v105_v58  ;;  %v5058_v43 = vld [vmem:[#allocation4 + $0x4] ss:$16 sps:$4 sm:$0xff]   ;;  %v5056_v46 = vld [vmem:[#allocation4] ss:$16 sps:$4 sm:$0xff]   ;;  %v5079_v58 = vld [vmem:[#allocation4 + $0xec] ss:$16 sps:$4 sm:$0xff]  }
  0x6f   :  { %289 = vmatprep.subr.mxu0 %v161_v59  ;;  %4727 = vmatprep.subr.mxu1 %v150_v60  ;;  %v5067_v47 = vld [vmem:[#allocation4 + $0x224] ss:$16 sps:$4 sm:$0xff]   ;;  %v5065_v50 = vld [vmem:[#allocation4 + $0x220] ss:$16 sps:$4 sm:$0xff]   ;;  %v5747_v60 = vpack.c.bf16 %v5713_v57, %v5713_v57 }
  0x70   :  { %290 = vmatpush2.msra.mxu0 %v160_v61  ;;  %4728 = vmatpush3.msra.mxu1 %v102_v62  ;;  %v5064_v49 = vld [vmem:[#allocation4 + $0x1e4] ss:$16 sps:$4 sm:$0xff]   ;;  %v5062_v51 = vld [vmem:[#allocation4 + $0x1e0] ss:$16 sps:$4 sm:$0xff]   ;;  %v5077_v61 = vld [vmem:[#allocation4 + $0xe8] ss:$16 sps:$4 sm:$0xff]  }
  0x71   :  { %441 = vmatprep.mubr.f32.mxu1 %v93_v44  ;;  %291 = vmatprep.subr.mxu0 %v158_v63  ;;  %v5073_v53 = vld [vmem:[#allocation4 + $0x204] ss:$16 sps:$4 sm:$0xff]   ;;  %v5071_v55 = vld [vmem:[#allocation4 + $0x200] ss:$16 sps:$4 sm:$0xff]   ;;  %v5085_v62 = vld [vmem:[#allocation4 + $0xcc] ss:$16 sps:$4 sm:$0xff]  }
  0x72   :  { %442 = vmatmul.mubr.f32.vlgmr.msra.gmra.mxu1 %v5719_v52  ;;  %4851 = vmatprep.subr.mxu1 %v5656_v0  ;;  %v5070_v54 = vld [vmem:[#allocation4 + $0x1c4] ss:$16 sps:$4 sm:$0xff]   ;;  %v5068_v56 = vld [vmem:[#allocation4 + $0x1c0] ss:$16 sps:$4 sm:$0xff]  }
  0x73   :  { %292 = vmatpush2.msra.mxu0 %v157_v1  ;;  %4852 = vmatpush3.msra.mxu1 %v231_v2  ;;  %v5076_v59 = vld [vmem:[#allocation4 + $0x1a4] ss:$16 sps:$4 sm:$0xff]   ;;  %v5083_v1 = vld [vmem:[#allocation4 + $0xc8] ss:$16 sps:$4 sm:$0xff]   ;;  %v5080_v2 = vld [vmem:[#allocation4 + $0x180] ss:$16 sps:$4 sm:$0xff]  }
  0x74   :  { %293 = vmatprep.subr.mxu0 %v155_v3  ;;  %4853 = vmatprep.subr.mxu1 %v5656_v0  ;;  %v5082_v63 = vld [vmem:[#allocation4 + $0x184] ss:$16 sps:$4 sm:$0xff]  }
  0x75   :  { %294 = vmatpush2.msra.mxu0 %v154_v4  ;;  %4854 = vmatpush3.msra.mxu1 %v228_v5  ;;  %v5088_v3 = vld [vmem:[#allocation4 + $0x164] ss:$16 sps:$4 sm:$0xff]   ;;  %v5089_v4 = vld [vmem:[#allocation4 + $0xa8] ss:$16 sps:$4 sm:$0xff]   ;;  %v5086_v5 = vld [vmem:[#allocation4 + $0x160] ss:$16 sps:$4 sm:$0xff]  }
  0x76   :  { %295 = vmatprep.subr.mxu0 %v152_v6  ;;  %4855 = vmatprep.subr.mxu1 %v5656_v0  ;;  %v5097_v6 = vld [vmem:[#allocation4 + $0x8c] ss:$16 sps:$4 sm:$0xff]  }
  0x77   :  { %296 = vmatpush2.msra.mxu0 %v151_v7  ;;  %4856 = vmatpush3.msra.mxu1 %v225_v8  ;;  %v5094_v7 = vld [vmem:[#allocation4 + $0x144] ss:$16 sps:$4 sm:$0xff]   ;;  %v5092_v8 = vld [vmem:[#allocation4 + $0x140] ss:$16 sps:$4 sm:$0xff]  }
  0x78   :  { %297 = vmatprep.subr.mxu0 %v149_v9  ;;  %4857 = vmatprep.subr.mxu1 %v5656_v0  ;;  %v5095_v9 = vld [vmem:[#allocation4 + $0x88] ss:$16 sps:$4 sm:$0xff]  }
  0x79   :  { %298 = vmatpush2.msra.mxu0 %v148_v10  ;;  %299 = vmatprep.mubr.f32.mxu0 %v93_v44  ;;  %v5074_v44 = vld [vmem:[#allocation4 + $0x1a0] ss:$16 sps:$4 sm:$0xff]   ;;  %v5100_v10 = vld [vmem:[#allocation4 + $0x124] ss:$16 sps:$4 sm:$0xff]  }
  0x7a   :  { %4858 = vmatpush3.msra.mxu1 %v222_v11  ;;  %300 = vmatmul.mubr.f32.vlgmr.msra.gmra.mxu0 %v5719_v52  ;;  %v5103_v11 = vld [vmem:[#allocation4 + $0x6c] ss:$16 sps:$4 sm:$0xff]  }
  0x7b   :  { %4859 = vmatprep.subr.mxu1 %v5656_v0  ;;  %1049 = vmatprep.subr.bf16.mxu0 %v5028_v12  ;;  %v5101_v12 = vld [vmem:[#allocation4 + $0x68] ss:$16 sps:$4 sm:$0xff]  }
  0x7c   :  { %4860 = vmatpush3.msra.mxu1 %v219_v14  ;;  %1050 = vmatpush1.bf16.msra.mxu0 %v5026_v13  ;;  %v5098_v13 = vld [vmem:[#allocation4 + $0x120] ss:$16 sps:$4 sm:$0xff]   ;;  %v5109_v14 = vld [vmem:[#allocation4 + $0x4c] ss:$16 sps:$4 sm:$0xff]  }
  0x7d   :  { %4861 = vmatprep.subr.mxu1 %v5656_v0  ;;  %1051 = vmatprep.subr.bf16.mxu0 %v5031_v15  ;;  %v5106_v15 = vld [vmem:[#allocation4 + $0x104] ss:$16 sps:$4 sm:$0xff]  }
  0x7e   :  { %4862 = vmatpush3.msra.mxu1 %v216_v16  ;;  %4875 = vmatprep.mubr.msk.f32.mxu1 %vm5658_vm1, %v5656_v0  ;;  %v5107_v16 = vld [vmem:[#allocation4 + $0x48] ss:$16 sps:$4 sm:$0xff]  }
  0x7f   :  { %4863 = vmatprep.subr.mxu1 %v5656_v0  ;;  %1081 = vmatprep.mubr.bf16.mxu0 %v5730_v17 }
  0x80   :  { %4864 = vmatpush3.msra.mxu1 %v213_v19  ;;  %1052 = vmatpush1.bf16.msra.mxu0 %v5029_v18  ;;  %v5112_v18 = vld [vmem:[#allocation4 + $0x2c] ss:$16 sps:$4 sm:$0xff]   ;;  %v5110_v19 = vld [vmem:[#allocation4 + $0x28] ss:$16 sps:$4 sm:$0xff]  }
  0x81   :  { %4865 = vmatprep.subr.mxu1 %v5656_v0  ;;  %1053 = vmatprep.subr.bf16.mxu0 %v5034_v20  ;;  %v5121_v20 = vld [vmem:[#allocation4 + $0x2ac] ss:$16 sps:$4 sm:$0xff]  }
  0x82   :  { %4866 = vmatpush3.msra.mxu1 %v210_v21  ;;  %v5115_v21 = vld [vmem:[#allocation4 + $0xc] ss:$16 sps:$4 sm:$0xff]  }
  0x83   :  { %4867 = vmatprep.subr.mxu1 %v5656_v0 }
  0x84   :  { %4868 = vmatpush3.msra.mxu1 %v207_v23  ;;  %1054 = vmatpush1.bf16.msra.mxu0 %v5032_v22  ;;  %v5119_v22 = vld [vmem:[#allocation4 + $0x2a8] ss:$16 sps:$4 sm:$0xff]   ;;  %v5754_v23 = vpack.c.bf16 %v5719_v52, %v5719_v52 }
  0x85   :  { %4869 = vmatprep.subr.mxu1 %v5656_v0  ;;  %1055 = vmatprep.subr.bf16.mxu0 %v5037_v24  ;;  %v5113_v24 = vld [vmem:[#allocation4 + $0x8] ss:$16 sps:$4 sm:$0xff]  }
  0x86   :  { %4870 = vmatpush3.msra.mxu1 %v204_v25  ;;  %v5127_v25 = vld [vmem:[#allocation4 + $0x28c] ss:$16 sps:$4 sm:$0xff]   ;;  %v5131_v52 = vld [vmem:[#allocation4 + $0x268] ss:$16 sps:$4 sm:$0xff]  }
  0x87   :  { %4871 = vmatprep.subr.mxu1 %v5656_v0 }
  0x88   :  { %4872 = vmatpush3.msra.mxu1 %v201_v27  ;;  %1056 = vmatpush1.bf16.msra.mxu0 %v5035_v26  ;;  %v5118_v26 = vld [vmem:[#allocation4 + $0x1ec] ss:$16 sps:$4 sm:$0xff]   ;;  %v5125_v27 = vld [vmem:[#allocation4 + $0x288] ss:$16 sps:$4 sm:$0xff]  }
  0x89   :  { %4873 = vmatprep.subr.mxu1 %v5656_v0  ;;  %1057 = vmatprep.subr.bf16.mxu0 %v5040_v29  ;;  %v5133_v29 = vld [vmem:[#allocation4 + $0x26c] ss:$16 sps:$4 sm:$0xff]  }
  0x8a   :  { %4874 = vmatpush3.msra.mxu1 %v198_v28  ;;  %v5116_v28 = vld [vmem:[#allocation4 + $0x1e8] ss:$16 sps:$4 sm:$0xff]  }
  0x8b   :  { %4876 = vmatmul.mubr.msk.f32.vlgmr.msra.gmra.mxu1 %vm232_vm0, %v5713_v57  ;;  %1094 = vmatprep.subr.bf16.mxu1 %v5043_v30  ;;  %v5091_v57 = vld [vmem:[#allocation4 + $0xac] ss:$16 sps:$4 sm:$0xff]  }
  0x8c   :  { %1095 = vmatpush1.bf16.msra.mxu1 %v5041_v31  ;;  %1122 = vmatprep.mubr.bf16.mxu1 %v5659_v36  ;;  %v5124_v30 = vld [vmem:[#allocation4 + $0x1cc] ss:$16 sps:$4 sm:$0xff]  }
  0x8d   :  { %1058 = vmatpush1.bf16.msra.mxu0 %v5038_v32  ;;  %1096 = vmatprep.subr.bf16.mxu1 %v5049_v33  ;;  %v5139_v31 = vld [vmem:[#allocation4 + $0x24c] ss:$16 sps:$4 sm:$0xff]   ;;  %v5122_v32 = vld [vmem:[#allocation4 + $0x1c8] ss:$16 sps:$4 sm:$0xff]  }
  0x8e   :  { %1059 = vmatprep.subr.bf16.mxu0 %v5046_v34  ;;  %v5130_v33 = vld [vmem:[#allocation4 + $0x1ac] ss:$16 sps:$4 sm:$0xff]   ;;  %v5137_v34 = vld [vmem:[#allocation4 + $0x248] ss:$16 sps:$4 sm:$0xff]  }
  0x90   :  { %1097 = vmatpush1.bf16.msra.mxu1 %v5047_v35  ;;  %v5145_v35 = vld [vmem:[#allocation4 + $0x22c] ss:$16 sps:$4 sm:$0xff]  }
  0x91   :  { %1060 = vmatpush1.bf16.msra.mxu0 %v5044_v37  ;;  %1098 = vmatprep.subr.bf16.mxu1 %v5055_v38  ;;  %v5128_v37 = vld [vmem:[#allocation4 + $0x1a8] ss:$16 sps:$4 sm:$0xff]   ;;  %v5136_v38 = vld [vmem:[#allocation4 + $0x18c] ss:$16 sps:$4 sm:$0xff]  }
  0x92   :  { %1061 = vmatprep.subr.bf16.mxu0 %v5052_v39  ;;  %v5143_v39 = vld [vmem:[#allocation4 + $0x228] ss:$16 sps:$4 sm:$0xff]  }
  0x94   :  { %1099 = vmatpush1.bf16.msra.mxu1 %v5053_v40  ;;  %v5134_v40 = vld [vmem:[#allocation4 + $0x188] ss:$16 sps:$4 sm:$0xff]  }
  0x95   :  { %1062 = vmatpush1.bf16.msra.mxu0 %v5050_v41  ;;  %1100 = vmatprep.subr.bf16.mxu1 %v5061_v42  ;;  %v5151_v41 = vld [vmem:[#allocation4 + $0x20c] ss:$16 sps:$4 sm:$0xff]  }
  0x96   :  { %1063 = vmatprep.subr.bf16.mxu0 %v5058_v43  ;;  %v5142_v42 = vld [vmem:[#allocation4 + $0x16c] ss:$16 sps:$4 sm:$0xff]   ;;  %v5149_v43 = vld [vmem:[#allocation4 + $0x208] ss:$16 sps:$4 sm:$0xff]  }
  0x98   :  { %1101 = vmatpush1.bf16.msra.mxu1 %v5059_v45  ;;  %v5160_v45 = vld [vmem:[#allocation6 + $0x88c] ss:$28 sps:$4 sm:$0xff]  }
  0x99   :  { %1064 = vmatpush1.bf16.msra.mxu0 %v5056_v46  ;;  %1102 = vmatprep.subr.bf16.mxu1 %v5067_v47  ;;  %v5140_v46 = vld [vmem:[#allocation4 + $0x168] ss:$16 sps:$4 sm:$0xff]   ;;  %v5148_v47 = vld [vmem:[#allocation4 + $0x14c] ss:$16 sps:$4 sm:$0xff]  }
  0x9a   :  { %1065 = vmatprep.subr.bf16.mxu0 %v5064_v49  ;;  %v5158_v49 = vld [vmem:[#allocation6 + $0x888] ss:$28 sps:$4 sm:$0xff]  }
  0x9c   :  { %1103 = vmatpush1.bf16.msra.mxu1 %v5065_v50  ;;  %v5166_v50 = vld [vmem:[#allocation6 + $0x854] ss:$28 sps:$4 sm:$0xff]  }
  0x9d   :  { %1066 = vmatpush2.bf16.msra.mxu0 %v5062_v51  ;;  %1104 = vmatprep.subr.bf16.mxu1 %v5073_v53  ;;  %v5146_v51 = vld [vmem:[#allocation4 + $0x148] ss:$16 sps:$4 sm:$0xff]   ;;  %v5154_v53 = vld [vmem:[#allocation4 + $0x12c] ss:$16 sps:$4 sm:$0xff]  }
  0x9e   :  { %1067 = vmatprep.subr.bf16.mxu0 %v5070_v54  ;;  %v5164_v54 = vld [vmem:[#allocation6 + $0x850] ss:$28 sps:$4 sm:$0xff]  }
  0xa0   :  { %1105 = vmatpush1.bf16.msra.mxu1 %v5071_v55  ;;  %v5172_v55 = vld [vmem:[#allocation6 + $0x81c] ss:$28 sps:$4 sm:$0xff]  }
  0xa1   :  { %1068 = vmatpush2.bf16.msra.mxu0 %v5068_v56  ;;  %1131 = vmatprep.subr.bf16.mxu1 %v5079_v58  ;;  %v5152_v56 = vld [vmem:[#allocation4 + $0x128] ss:$16 sps:$4 sm:$0xff]   ;;  %v5157_v58 = vld [vmem:[#allocation4 + $0x10c] ss:$16 sps:$4 sm:$0xff]  }
  0xa2   :  { %1069 = vmatprep.subr.bf16.mxu0 %v5076_v59  ;;  %v5170_v59 = vld [vmem:[#allocation6 + $0x818] ss:$28 sps:$4 sm:$0xff]  }
  0xa3   :  { %4409 = vmatmul.mubr.msk.bf16.vlgmr.msra.gmra.mxu1 %vm232_vm0, %v5747_v60 }
  0xa4   :  { %1132 = vmatpush1.bf16.msra.mxu1 %v5077_v61  ;;  %1163 = vmatprep.mubr.bf16.mxu1 %v5730_v17  ;;  %v5104_v17 = vld [vmem:[#allocation4 + $0x100] ss:$16 sps:$4 sm:$0xff]  }
  0xa5   :  { %1070 = vmatpush2.bf16.msra.mxu0 %v5074_v44  ;;  %1133 = vmatprep.subr.bf16.mxu1 %v5085_v62  ;;  %v5178_v61 = vld [vmem:[#allocation6 + $0x7e4] ss:$28 sps:$4 sm:$0xff]   ;;  %v5155_v44 = vld [vmem:[#allocation4 + $0x108] ss:$16 sps:$4 sm:$0xff]   ;;  %v5163_v62 = vld [vmem:[#allocation6 + $0x894] ss:$28 sps:$4 sm:$0xff]  }
  0xa6   :  { %1071 = vmatprep.subr.bf16.mxu0 %v5082_v63  ;;  %v5176_v63 = vld [vmem:[#allocation6 + $0x7e0] ss:$28 sps:$4 sm:$0xff]  }
  0xa8   :  { %1134 = vmatpush1.bf16.msra.mxu1 %v5083_v1  ;;  %v5184_v1 = vld [vmem:[#allocation6 + $0x7ac] ss:$28 sps:$4 sm:$0xff]  }
  0xa9   :  { %1072 = vmatpush2.bf16.msra.mxu0 %v5080_v2  ;;  %1135 = vmatprep.subr.bf16.mxu1 %v5091_v57  ;;  %v5169_v2 = vld [vmem:[#allocation6 + $0x85c] ss:$28 sps:$4 sm:$0xff]   ;;  %v5182_v57 = vld [vmem:[#allocation6 + $0x7a8] ss:$28 sps:$4 sm:$0xff]  }
  0xaa   :  { %1073 = vmatprep.subr.bf16.mxu0 %v5088_v3  ;;  %v5167_v3 = vld [vmem:[#allocation6 + $0x858] ss:$28 sps:$4 sm:$0xff]  }
  0xac   :  { %1136 = vmatpush1.bf16.msra.mxu1 %v5089_v4  ;;  %v5190_v4 = vld [vmem:[#allocation6 + $0x774] ss:$28 sps:$4 sm:$0xff]  }
  0xad   :  { %1074 = vmatpush2.bf16.msra.mxu0 %v5086_v5  ;;  %1137 = vmatprep.subr.bf16.mxu1 %v5097_v6  ;;  %v5175_v5 = vld [vmem:[#allocation6 + $0x824] ss:$28 sps:$4 sm:$0xff]   ;;  %v5188_v6 = vld [vmem:[#allocation6 + $0x770] ss:$28 sps:$4 sm:$0xff]  }
  0xae   :  { %1075 = vmatprep.subr.bf16.mxu0 %v5094_v7  ;;  %v5173_v7 = vld [vmem:[#allocation6 + $0x820] ss:$28 sps:$4 sm:$0xff]  }
  0xb0   :  { %1138 = vmatpush1.bf16.msra.mxu1 %v5095_v9  ;;  %v5181_v9 = vld [vmem:[#allocation6 + $0x7ec] ss:$28 sps:$4 sm:$0xff]  }
  0xb1   :  { %1076 = vmatpush2.bf16.msra.mxu0 %v5092_v8  ;;  %1139 = vmatprep.subr.bf16.mxu1 %v5103_v11  ;;  %v5196_v8 = vld [vmem:[#allocation6 + $0x73c] ss:$28 sps:$4 sm:$0xff]   ;;  %v5202_v11 = vld [vmem:[#allocation6 + $0x704] ss:$28 sps:$4 sm:$0xff]  }
  0xb2   :  { %1077 = vmatprep.subr.bf16.mxu0 %v5100_v10  ;;  %v5194_v10 = vld [vmem:[#allocation6 + $0x738] ss:$28 sps:$4 sm:$0xff]  }
  0xb4   :  { %1140 = vmatpush1.bf16.msra.mxu1 %v5101_v12  ;;  %v5179_v12 = vld [vmem:[#allocation6 + $0x7e8] ss:$28 sps:$4 sm:$0xff]  }
  0xb5   :  { %1078 = vmatpush2.bf16.msra.mxu0 %v5098_v13  ;;  %1141 = vmatprep.subr.bf16.mxu1 %v5109_v14  ;;  %v5187_v13 = vld [vmem:[#allocation6 + $0x7b4] ss:$28 sps:$4 sm:$0xff]   ;;  %v5200_v14 = vld [vmem:[#allocation6 + $0x700] ss:$28 sps:$4 sm:$0xff]  }
  0xb6   :  { %1079 = vmatprep.subr.bf16.mxu0 %v5106_v15  ;;  %v5208_v15 = vld [vmem:[#allocation6 + $0x89c] ss:$28 sps:$4 sm:$0xff]  }
  0xb8   :  { %1142 = vmatpush1.bf16.msra.mxu1 %v5107_v16  ;;  %v5185_v16 = vld [vmem:[#allocation6 + $0x7b0] ss:$28 sps:$4 sm:$0xff]  }
  0xb9   :  { %1080 = vmatpush2.bf16.msra.mxu0 %v5104_v17  ;;  %1143 = vmatprep.subr.bf16.mxu1 %v5112_v18  ;;  %v5193_v17 = vld [vmem:[#allocation6 + $0x77c] ss:$28 sps:$4 sm:$0xff]  }
  0xba   :  { %1176 = vmatprep.subr.bf16.mxu0 %v5121_v20  ;;  %v5191_v18 = vld [vmem:[#allocation6 + $0x778] ss:$28 sps:$4 sm:$0xff]   ;;  %v5197_v20 = vld [vmem:[#allocation6 + $0x740] ss:$28 sps:$4 sm:$0xff]  }
  0xbc   :  { %1082 = vmatmul.mubr.bf16.vlgmr.msra.gmra.mxu0 %v5754_v23  ;;  %1144 = vmatpush1.bf16.msra.mxu1 %v5110_v19  ;;  %v5199_v19 = vld [vmem:[#allocation6 + $0x744] ss:$28 sps:$4 sm:$0xff]  }
  0xbd   :  { %1145 = vmatprep.subr.bf16.mxu1 %v5115_v21  ;;  %1177 = vmatpush1.bf16.msra.mxu0 %v5119_v22  ;;  %v5205_v21 = vld [vmem:[#allocation6 + $0x70c] ss:$28 sps:$4 sm:$0xff]  }
  0xbe   :  { %1178 = vmatprep.subr.bf16.mxu0 %v5127_v25  ;;  %1204 = vmatprep.mubr.bf16.mxu0 %v5659_v36  ;;  %v5203_v22 = vld [vmem:[#allocation6 + $0x708] ss:$28 sps:$4 sm:$0xff]  }
  0xc0   :  { %1146 = vmatpush1.bf16.msra.mxu1 %v5113_v24 }
  0xc1   :  { %1147 = vmatprep.subr.bf16.mxu1 %v5118_v26  ;;  %1179 = vmatpush1.bf16.msra.mxu0 %v5125_v27 }
  0xc2   :  { %1180 = vmatprep.subr.bf16.mxu0 %v5133_v29 }
  0xc4   :  { %1148 = vmatpush2.bf16.msra.mxu1 %v5116_v28 }
  0xc5   :  { %1149 = vmatprep.subr.bf16.mxu1 %v5124_v30  ;;  %1181 = vmatpush1.bf16.msra.mxu0 %v5131_v52  ;;  %v5206_v52 = vld [vmem:[#allocation6 + $0x898] ss:$28 sps:$4 sm:$0xff]  }
  0xc6   :  { %1182 = vmatprep.subr.bf16.mxu0 %v5139_v31  ;;  %v5209_v31 = vld [vmem:[#allocation6 + $0x8a0] ss:$28 sps:$4 sm:$0xff]  }
  0xc8   :  { %1150 = vmatpush2.bf16.msra.mxu1 %v5122_v32 }
  0xc9   :  { %1151 = vmatprep.subr.bf16.mxu1 %v5130_v33  ;;  %1183 = vmatpush1.bf16.msra.mxu0 %v5137_v34  ;;  %v5212_v34 = vld [vmem:[#allocation6 + $0x864] ss:$28 sps:$4 sm:$0xff]  }
  0xca   :  { %1184 = vmatprep.subr.bf16.mxu0 %v5145_v35  ;;  %v5210_v35 = vld [vmem:[#allocation6 + $0x860] ss:$28 sps:$4 sm:$0xff]  }
  0xcc   :  { %1152 = vmatpush2.bf16.msra.mxu1 %v5128_v37  ;;  %v5213_v37 = vld [vmem:[#allocation6 + $0x868] ss:$28 sps:$4 sm:$0xff]  }
  0xcd   :  { %1153 = vmatprep.subr.bf16.mxu1 %v5136_v38  ;;  %1185 = vmatpush1.bf16.msra.mxu0 %v5143_v39  ;;  %v5216_v38 = vld [vmem:[#allocation6 + $0x82c] ss:$28 sps:$4 sm:$0xff]  }
  0xce   :  { %1186 = vmatprep.subr.bf16.mxu0 %v5151_v41  ;;  %v5214_v39 = vld [vmem:[#allocation6 + $0x828] ss:$28 sps:$4 sm:$0xff]   ;;  %v5220_v41 = vld [vmem:[#allocation6 + $0x7f4] ss:$28 sps:$4 sm:$0xff]  }
  0xd0   :  { %1154 = vmatpush2.bf16.msra.mxu1 %v5134_v40  ;;  %v5217_v40 = vld [vmem:[#allocation6 + $0x830] ss:$28 sps:$4 sm:$0xff]  }
  0xd1   :  { %1155 = vmatprep.subr.bf16.mxu1 %v5142_v42  ;;  %1187 = vmatpush1.bf16.msra.mxu0 %v5149_v43  ;;  %v5218_v42 = vld [vmem:[#allocation6 + $0x7f0] ss:$28 sps:$4 sm:$0xff]   ;;  %v5221_v43 = vld [vmem:[#allocation6 + $0x7f8] ss:$28 sps:$4 sm:$0xff]  }
  0xd2   :  { %1837 = vmatprep.subr.bf16.mxu0 %v5160_v45  ;;  %v5224_v45 = vld [vmem:[#allocation6 + $0x7bc] ss:$28 sps:$4 sm:$0xff]  }
  0xd4   :  { %1156 = vmatpush2.bf16.msra.mxu1 %v5140_v46  ;;  %4410 = vmatmul.mubr.msk.bf16.vlgmr.msra.gmra.mxu0 %vm232_vm0, %v5747_v60  ;;  %v5161_v60 = vld [vmem:[#allocation6 + $0x890] ss:$28 sps:$4 sm:$0xff]  }
  0xd5   :  { %1157 = vmatprep.subr.bf16.mxu1 %v5148_v47  ;;  %1838 = vmatpush1.bf16.msra.mxu0 %v5158_v49  ;;  %v5222_v49 = vld [vmem:[#allocation6 + $0x7b8] ss:$28 sps:$4 sm:$0xff]  }
  0xd6   :  { %1839 = vmatprep.subr.bf16.mxu0 %v5166_v50  ;;  %1869 = vmatprep.mubr.bf16.mxu0 %v5659_v36  ;;  %v5225_v50 = vld [vmem:[#allocation6 + $0x7c0] ss:$28 sps:$4 sm:$0xff]  }
  0xd8   :  { %1158 = vmatpush2.bf16.msra.mxu1 %v5146_v51  ;;  %v5228_v51 = vld [vmem:[#allocation6 + $0x784] ss:$28 sps:$4 sm:$0xff]  }
  0xd9   :  { %1159 = vmatprep.subr.bf16.mxu1 %v5154_v53  ;;  %1840 = vmatpush1.bf16.msra.mxu0 %v5164_v54  ;;  %v5226_v53 = vld [vmem:[#allocation6 + $0x780] ss:$28 sps:$4 sm:$0xff]   ;;  %v5229_v54 = vld [vmem:[#allocation6 + $0x788] ss:$28 sps:$4 sm:$0xff]  }
  0xda   :  { %1841 = vmatprep.subr.bf16.mxu0 %v5172_v55  ;;  %v5232_v55 = vld [vmem:[#allocation6 + $0x74c] ss:$28 sps:$4 sm:$0xff]  }
  0xdc   :  { %1160 = vmatpush2.bf16.msra.mxu1 %v5152_v56  ;;  %v5230_v56 = vld [vmem:[#allocation6 + $0x748] ss:$28 sps:$4 sm:$0xff]  }
  0xdd   :  { %1161 = vmatprep.subr.bf16.mxu1 %v5157_v58  ;;  %1842 = vmatpush1.bf16.msra.mxu0 %v5170_v59  ;;  %v5233_v58 = vld [vmem:[#allocation6 + $0x750] ss:$28 sps:$4 sm:$0xff]  }
  0xde   :  { %1843 = vmatprep.subr.bf16.mxu0 %v5178_v61  ;;  %v5236_v59 = vld [vmem:[#allocation6 + $0x714] ss:$28 sps:$4 sm:$0xff]  }
  0xdf   :  { %v5234_v61 = vld [vmem:[#allocation6 + $0x710] ss:$28 sps:$4 sm:$0xff]  }
  0xe0   :  { %1162 = vmatpush2.bf16.msra.mxu1 %v5155_v44  ;;  %v5237_v44 = vld [vmem:[#allocation6 + $0x718] ss:$28 sps:$4 sm:$0xff]  }
  0xe1   :  { %1878 = vmatprep.subr.bf16.mxu1 %v5163_v62  ;;  %1844 = vmatpush1.bf16.msra.mxu0 %v5176_v63  ;;  %v5240_v62 = vld [vmem:[#allocation6 + $0x18c] ss:$28 sps:$4 sm:$0xff]  }
  0xe2   :  { %1845 = vmatprep.subr.bf16.mxu0 %v5184_v1  ;;  %v5252_v63 = vld [vmem:[#allocation6 + $0x50c] ss:$28 sps:$4 sm:$0xff]  }
  0xe3   :  { %1164 = vmatmul.mubr.bf16.vlgmr.msra.gmra.mxu1 %v5754_v23  ;;  %v5250_v1 = vld [vmem:[#allocation6 + $0x508] ss:$28 sps:$4 sm:$0xff]  }
  0xe4   :  { %1879 = vmatpush1.bf16.msra.mxu1 %v5161_v60  ;;  %1910 = vmatprep.mubr.bf16.mxu1 %v5659_v36  ;;  %v5238_v60 = vld [vmem:[#allocation6 + $0x188] ss:$28 sps:$4 sm:$0xff]  }
  0xe5   :  { %1880 = vmatprep.subr.bf16.mxu1 %v5169_v2  ;;  %1846 = vmatpush1.bf16.msra.mxu0 %v5182_v57  ;;  %v5243_v2 = vld [vmem:[#allocation6 + $0x154] ss:$28 sps:$4 sm:$0xff]  }
  0xe6   :  { %1847 = vmatprep.subr.bf16.mxu0 %v5190_v4  ;;  %v5258_v57 = vld [vmem:[#allocation6 + $0x4d4] ss:$28 sps:$4 sm:$0xff]  }
  0xe7   :  { %v5256_v4 = vld [vmem:[#allocation6 + $0x4d0] ss:$28 sps:$4 sm:$0xff]  }
  0xe8   :  { %1881 = vmatpush1.bf16.msra.mxu1 %v5167_v3  ;;  %v5241_v3 = vld [vmem:[#allocation6 + $0x150] ss:$28 sps:$4 sm:$0xff]  }
  0xe9   :  { %1882 = vmatprep.subr.bf16.mxu1 %v5175_v5  ;;  %1848 = vmatpush1.bf16.msra.mxu0 %v5188_v6  ;;  %v5246_v5 = vld [vmem:[#allocation6 + $0x11c] ss:$28 sps:$4 sm:$0xff]  }
  0xea   :  { %1849 = vmatprep.subr.bf16.mxu0 %v5196_v8  ;;  %v5264_v6 = vld [vmem:[#allocation6 + $0x49c] ss:$28 sps:$4 sm:$0xff]  }
  0xec   :  { %1883 = vmatpush1.bf16.msra.mxu1 %v5173_v7 }
  0xed   :  { %1884 = vmatprep.subr.bf16.mxu1 %v5181_v9  ;;  %1850 = vmatpush1.bf16.msra.mxu0 %v5194_v10  ;;  %v5244_v9 = vld [vmem:[#allocation6 + $0x118] ss:$28 sps:$4 sm:$0xff]  }
  0xee   :  { %1851 = vmatprep.subr.bf16.mxu0 %v5202_v11  ;;  %v5262_v10 = vld [vmem:[#allocation6 + $0x498] ss:$28 sps:$4 sm:$0xff]   ;;  %v5249_v11 = vld [vmem:[#allocation6 + $0xe4] ss:$28 sps:$4 sm:$0xff]  }
  0xf0   :  { %1885 = vmatpush1.bf16.msra.mxu1 %v5179_v12  ;;  %v5270_v12 = vld [vmem:[#allocation6 + $0x464] ss:$28 sps:$4 sm:$0xff]  }
  0xf1   :  { %1886 = vmatprep.subr.bf16.mxu1 %v5187_v13  ;;  %1852 = vmatpush1.bf16.msra.mxu0 %v5200_v14 }
  0xf2   :  { %1919 = vmatprep.subr.bf16.mxu0 %v5208_v15  ;;  %v5247_v15 = vld [vmem:[#allocation6 + $0xe0] ss:$28 sps:$4 sm:$0xff]  }
  0xf4   :  { %1887 = vmatpush1.bf16.msra.mxu1 %v5185_v16  ;;  %v5268_v16 = vld [vmem:[#allocation6 + $0x460] ss:$28 sps:$4 sm:$0xff]  }
  0xf5   :  { %1888 = vmatprep.subr.bf16.mxu1 %v5193_v17  ;;  %v5255_v17 = vld [vmem:[#allocation6 + $0xac] ss:$28 sps:$4 sm:$0xff]  }
  0xf8   :  { %1889 = vmatpush1.bf16.msra.mxu1 %v5191_v18  ;;  %v5276_v18 = vld [vmem:[#allocation6 + $0x42c] ss:$28 sps:$4 sm:$0xff]  }
  0xf9   :  { %1890 = vmatprep.subr.bf16.mxu1 %v5199_v19  ;;  %v5253_v19 = vld [vmem:[#allocation6 + $0xa8] ss:$28 sps:$4 sm:$0xff]  }
  0xfc   :  { %1891 = vmatpush1.bf16.msra.mxu1 %v5197_v20  ;;  %v5274_v20 = vld [vmem:[#allocation6 + $0x428] ss:$28 sps:$4 sm:$0xff]  }
  0xfd   :  { %1892 = vmatprep.subr.bf16.mxu1 %v5205_v21  ;;  %v5261_v21 = vld [vmem:[#allocation6 + $0x74] ss:$28 sps:$4 sm:$0xff]  }
 0x100   :  { %1893 = vmatpush1.bf16.msra.mxu1 %v5203_v22  ;;  %v5282_v22 = vld [vmem:[#allocation6 + $0x3f4] ss:$28 sps:$4 sm:$0xff]  }
 0x101   :  { %4878 = vmatprep.subr.bf16.mxu1 %v5656_v0 }
 0x111   :  { %v372_v23 = vpop.f32.mrf.mxu1 }
 0x113   :  { %v374_v24 = vpop.f32.mrf.mxu1 }
 0x132   :  { %v4729_v25 = vpop.f32.mrf.mxu1 }
 0x134   :  { %v4730_v26 = vpop.f32.mrf.mxu1 }
 0x135   :  { %v4731_v27 = vadd.f32 %v4730_v26, %v4729_v25  ;;  %v5267_v25 = vld [vmem:[#allocation6 + $0x3c] ss:$28 sps:$4 sm:$0xff]  }
 0x136   :  { %v5288_v26 = vld [vmem:[#allocation6 + $0x3bc] ss:$28 sps:$4 sm:$0xff]  }
 0x13a   :  { %v301_v28 = vpop.f32.mrf.mxu0 }
 0x13b   :  { %v5764_v29 = vadd.f32 %v372_v23, %v301_v28  ;;  %v5259_v23 = vld [vmem:[#allocation6 + $0x70] ss:$28 sps:$4 sm:$0xff]   ;;  %v5286_v28 = vld [vmem:[#allocation6 + $0x3b8] ss:$28 sps:$4 sm:$0xff]  }
 0x13c   :  { %v303_v30 = vpop.f32.mrf.mxu0 }
 0x13d   :  { %4310 = vst [vmem:[%s6033_s5 + $0xe] sm:$0x3] %v5764_v29  ;;  %v5770_v32 = vadd.f32 %v374_v24, %v303_v30  ;;  %v5774_v33 = vpack.c.bf16 %v5764_v29, %v5764_v29  ;;  %v5280_v24 = vld [vmem:[#allocation6 + $0x3f0] ss:$28 sps:$4 sm:$0xff]   ;;  %v5273_v30 = vld [vmem:[#allocation6 + $0x4] ss:$28 sps:$4 sm:$0xff]  }
 0x13f   :  { %1870 = vmatmul.mubr.bf16.vlgmr.msra.gmra.mxu0 %v5774_v33  ;;  %1911 = vmatmul.mubr.bf16.vlgmr.msra.gmra.mxu1 %v5774_v33 }
 0x140   :  { %1920 = vmatpush1.bf16.msra.mxu0 %v5206_v52  ;;  %4879 = vmatpush3.bf16.msra.mxu1 %v5209_v31  ;;  %v5294_v52 = vld [vmem:[#allocation6 + $0x384] ss:$28 sps:$4 sm:$0xff]  }
 0x141   :  { %1921 = vmatprep.subr.bf16.mxu0 %v5212_v34  ;;  %4880 = vmatprep.subr.bf16.mxu1 %v5656_v0  ;;  %v5271_v31 = vld [vmem:[#allocation6] ss:$28 sps:$4 sm:$0xff]   ;;  %v5279_v34 = vld [vmem:[#allocation6 + $0x34c] ss:$28 sps:$4 sm:$0xff]  }
 0x142   :  { %1951 = vmatprep.mubr.bf16.mxu0 %v5659_v36  ;;  %4894 = vmatprep.mubr.msk.bf16.mxu1 %vm5658_vm1, %v5656_v0 }
 0x144   :  { %1922 = vmatpush1.bf16.msra.mxu0 %v5210_v35  ;;  %4881 = vmatpush3.bf16.msra.mxu1 %v5213_v37  ;;  %v5300_v35 = vld [vmem:[#allocation6 + $0x6cc] ss:$28 sps:$4 sm:$0xff]  }
 0x145   :  { %1923 = vmatprep.subr.bf16.mxu0 %v5216_v38  ;;  %4882 = vmatprep.subr.bf16.mxu1 %v5656_v0  ;;  %v5277_v38 = vld [vmem:[#allocation6 + $0x348] ss:$28 sps:$4 sm:$0xff]  }
 0x148   :  { %1924 = vmatpush1.bf16.msra.mxu0 %v5214_v39  ;;  %4883 = vmatpush3.bf16.msra.mxu1 %v5217_v40  ;;  %v5298_v39 = vld [vmem:[#allocation6 + $0x6c8] ss:$28 sps:$4 sm:$0xff]  }
 0x149   :  { %1925 = vmatprep.subr.bf16.mxu0 %v5220_v41  ;;  %4884 = vmatprep.subr.bf16.mxu1 %v5656_v0  ;;  %v5285_v41 = vld [vmem:[#allocation6 + $0x314] ss:$28 sps:$4 sm:$0xff]  }
 0x14b   :  { %v513_v36 = vpop.f32.mrf.mxu1 }
 0x14c   :  { %v5784_v46 = vadd.f32 %v4731_v27, %v513_v36  ;;  %1926 = vmatpush1.bf16.msra.mxu0 %v5218_v42  ;;  %4885 = vmatpush3.bf16.msra.mxu1 %v5221_v43  ;;  %v5265_v27 = vld [vmem:[#allocation6 + $0x38] ss:$28 sps:$4 sm:$0xff]  }
 0x14d   :  { %v4877_v47 = vpop.f32.mrf.mxu1  ;;  %1927 = vmatprep.subr.bf16.mxu0 %v5224_v45  ;;  %4886 = vmatprep.subr.bf16.mxu1 %v5656_v0  ;;  %v5306_v42 = vld [vmem:[#allocation6 + $0x694] ss:$28 sps:$4 sm:$0xff]  }
 0x14e   :  { %v5283_v45 = vld [vmem:[#allocation6 + $0x310] ss:$28 sps:$4 sm:$0xff]   ;;  %vm3810_vm6 = vcmp.ge.f32.partialorder %v5784_v46, 0.0 }
 0x150   :  { %1928 = vmatpush1.bf16.msra.mxu0 %v5222_v49  ;;  %4887 = vmatpush3.bf16.msra.mxu1 %v5225_v50  ;;  %v5304_v49 = vld [vmem:[#allocation6 + $0x690] ss:$28 sps:$4 sm:$0xff]   ;;  %v5291_v50 = vld [vmem:[#allocation6 + $0x2dc] ss:$28 sps:$4 sm:$0xff]  }
 0x151   :  { %1929 = vmatprep.subr.bf16.mxu0 %v5228_v51  ;;  %4888 = vmatprep.subr.bf16.mxu1 %v5656_v0 }
 0x154   :  { %1930 = vmatpush1.bf16.msra.mxu0 %v5226_v53  ;;  %4889 = vmatpush3.bf16.msra.mxu1 %v5229_v54  ;;  %v5312_v54 = vld [vmem:[#allocation6 + $0x65c] ss:$28 sps:$4 sm:$0xff]  }
 0x155   :  { %1931 = vmatprep.subr.bf16.mxu0 %v5232_v55  ;;  %4890 = vmatprep.subr.bf16.mxu1 %v5656_v0 }
 0x158   :  { %1932 = vmatpush1.bf16.msra.mxu0 %v5230_v56  ;;  %4891 = vmatpush3.bf16.msra.mxu1 %v5233_v58  ;;  %v5289_v56 = vld [vmem:[#allocation6 + $0x2d8] ss:$28 sps:$4 sm:$0xff]  }
 0x159   :  { %1933 = vmatprep.subr.bf16.mxu0 %v5236_v59  ;;  %4892 = vmatprep.subr.bf16.mxu1 %v5656_v0  ;;  %v5310_v58 = vld [vmem:[#allocation6 + $0x658] ss:$28 sps:$4 sm:$0xff]   ;;  %v5297_v59 = vld [vmem:[#allocation6 + $0x2a4] ss:$28 sps:$4 sm:$0xff]  }
 0x15c   :  { %1934 = vmatpush1.bf16.msra.mxu0 %v5234_v61  ;;  %4893 = vmatpush3.bf16.msra.mxu1 %v5237_v44  ;;  %v5318_v61 = vld [vmem:[#allocation6 + $0x624] ss:$28 sps:$4 sm:$0xff]  }
 0x15d   :  { %3152 = vmatprep.subr.bf16.mxu0 %v5240_v62  ;;  %3193 = vmatprep.subr.bf16.mxu1 %v5252_v63  ;;  %v5295_v44 = vld [vmem:[#allocation6 + $0x2a0] ss:$28 sps:$4 sm:$0xff]   ;;  %v5303_v63 = vld [vmem:[#allocation6 + $0x26c] ss:$28 sps:$4 sm:$0xff]  }
 0x15e   :  { %v5316_v62 = vld [vmem:[#allocation6 + $0x620] ss:$28 sps:$4 sm:$0xff]  }
 0x15f   :  { %1952 = vmatmul.mubr.bf16.vlgmr.msra.gmra.mxu0 %v5774_v33  ;;  %4895 = vmatmul.mubr.bf16.vlgmr.msra.gmra.mxu1 %v5774_v33  ;;  %v5292_v33 = vld [vmem:[#allocation6 + $0x380] ss:$28 sps:$4 sm:$0xff]  }
 0x160   :  { %3153 = vmatpush1.bf16.msra.mxu0 %v5238_v60  ;;  %3194 = vmatpush1.bf16.msra.mxu1 %v5250_v1  ;;  %v5324_v60 = vld [vmem:[#allocation6 + $0x5ec] ss:$28 sps:$4 sm:$0xff]  }
 0x161   :  { %3154 = vmatprep.subr.bf16.mxu0 %v5243_v2  ;;  %3195 = vmatprep.subr.bf16.mxu1 %v5258_v57  ;;  %v5301_v1 = vld [vmem:[#allocation6 + $0x268] ss:$28 sps:$4 sm:$0xff]   ;;  %v5309_v57 = vld [vmem:[#allocation6 + $0x234] ss:$28 sps:$4 sm:$0xff]  }
 0x162   :  { %v5322_v2 = vld [vmem:[#allocation6 + $0x5e8] ss:$28 sps:$4 sm:$0xff]  }
 0x163   :  { %v5792_v7 = vpop.f32.mrf.mxu1 }
 0x164   :  { %3155 = vmatpush1.bf16.msra.mxu0 %v5241_v3  ;;  %3196 = vmatpush1.bf16.msra.mxu1 %v5256_v4  ;;  %v5330_v3 = vld [vmem:[#allocation6 + $0x5b4] ss:$28 sps:$4 sm:$0xff]  }
 0x165   :  { %v1126_v8 = vpop.f32.mrf.mxu1  ;;  %3156 = vmatprep.subr.bf16.mxu0 %v5246_v5  ;;  %3197 = vmatprep.subr.bf16.mxu1 %v5264_v6  ;;  %v5307_v4 = vld [vmem:[#allocation6 + $0x230] ss:$28 sps:$4 sm:$0xff]   ;;  %v5315_v6 = vld [vmem:[#allocation6 + $0x1fc] ss:$28 sps:$4 sm:$0xff]  }
 0x166   :  { %v5328_v5 = vld [vmem:[#allocation6 + $0x5b0] ss:$28 sps:$4 sm:$0xff]  }
 0x167   :  { %v1128_v13 = vpop.f32.mrf.mxu1 }
 0x168   :  { %3157 = vmatpush1.bf16.msra.mxu0 %v5244_v9  ;;  %3198 = vmatpush1.bf16.msra.mxu1 %v5262_v10  ;;  %v5321_v13 = vld [vmem:[#allocation6 + $0x1c4] ss:$28 sps:$4 sm:$0xff]  }
 0x169   :  { %v1129_v14 = vpop.f32.mrf.mxu1  ;;  %3158 = vmatprep.subr.bf16.mxu0 %v5249_v11  ;;  %3199 = vmatprep.subr.bf16.mxu1 %v5270_v12  ;;  %v5313_v11 = vld [vmem:[#allocation6 + $0x1f8] ss:$28 sps:$4 sm:$0xff]  }
 0x16a   :  { %v5334_v12 = vld [vmem:[#allocation6 + $0x578] ss:$28 sps:$4 sm:$0xff]  }
 0x16c   :  { %3159 = vmatpush1.bf16.msra.mxu0 %v5247_v15  ;;  %3200 = vmatpush1.bf16.msra.mxu1 %v5268_v16  ;;  %v5342_v15 = vld [vmem:[#allocation6 + $0x544] ss:$28 sps:$4 sm:$0xff]  }
 0x16d   :  { %3160 = vmatprep.subr.bf16.mxu0 %v5255_v17  ;;  %3201 = vmatprep.subr.bf16.mxu1 %v5276_v18  ;;  %v5319_v18 = vld [vmem:[#allocation6 + $0x1c0] ss:$28 sps:$4 sm:$0xff]  }
 0x170   :  { %3161 = vmatpush1.bf16.msra.mxu0 %v5253_v19  ;;  %3202 = vmatpush1.bf16.msra.mxu1 %v5274_v20  ;;  %v5340_v19 = vld [vmem:[#allocation6 + $0x540] ss:$28 sps:$4 sm:$0xff]   ;;  %v5327_v20 = vld [vmem:[#allocation6 + $0x194] ss:$28 sps:$4 sm:$0xff]  }
 0x171   :  { %3162 = vmatprep.subr.bf16.mxu0 %v5261_v21  ;;  %3203 = vmatprep.subr.bf16.mxu1 %v5282_v22  ;;  %v5348_v21 = vld [vmem:[#allocation6 + $0x514] ss:$28 sps:$4 sm:$0xff]  }
 0x174   :  { %3163 = vmatpush1.bf16.msra.mxu0 %v5259_v23  ;;  %3204 = vmatpush1.bf16.msra.mxu1 %v5280_v24  ;;  %v5325_v23 = vld [vmem:[#allocation6 + $0x190] ss:$28 sps:$4 sm:$0xff]  }
 0x175   :  { %3164 = vmatprep.subr.bf16.mxu0 %v5267_v25  ;;  %3205 = vmatprep.subr.bf16.mxu1 %v5288_v26  ;;  %v5333_v25 = vld [vmem:[#allocation6 + $0x15c] ss:$28 sps:$4 sm:$0xff]  }
 0x176   :  { %v5331_v26 = vld [vmem:[#allocation6 + $0x158] ss:$28 sps:$4 sm:$0xff]  }
 0x178   :  { %3165 = vmatpush1.bf16.msra.mxu0 %v5265_v27  ;;  %3206 = vmatpush1.bf16.msra.mxu1 %v5286_v28  ;;  %v5339_v27 = vld [vmem:[#allocation6 + $0x124] ss:$28 sps:$4 sm:$0xff]  }
 0x179   :  { %3166 = vmatprep.subr.bf16.mxu0 %v5273_v30  ;;  %3207 = vmatprep.subr.bf16.mxu1 %v5294_v52 }
 0x17c   :  { %v1083_v37 = vpop.f32.mrf.mxu0  ;;  %3167 = vmatpush1.bf16.msra.mxu0 %v5271_v31  ;;  %3208 = vmatpush1.bf16.msra.mxu1 %v5292_v33  ;;  %v5337_v31 = vld [vmem:[#allocation6 + $0x120] ss:$28 sps:$4 sm:$0xff]  }
 0x17d   :  { %3168 = vmatprep.subr.bf16.mxu0 %v5279_v34  ;;  %3209 = vmatprep.subr.bf16.mxu1 %v5300_v35  ;;  %v1125_v9 = vadd.f32 %v5792_v7, %v1083_v37  ;;  %v5345_v35 = vld [vmem:[#allocation6 + $0xec] ss:$28 sps:$4 sm:$0xff]  }
 0x17e   :  { %v1085_v40 = vpop.f32.mrf.mxu0 }
 0x17f   :  { %v1127_v43 = vadd.f32 %v1126_v8, %v1085_v40  ;;  %v5336_v8 = vld [vmem:[#allocation6 + $0x57c] ss:$28 sps:$4 sm:$0xff]   ;;  %v1217_v16 = vmul.f32 0.2, %v1125_v9  ;;  %vm1213_vm3 = vcmp.ge.f32.partialorder %v1125_v9, 0.0 }
 0x180   :  { %v1087_v36 = vpop.f32.mrf.mxu0  ;;  %3169 = vmatpush2.bf16.msra.mxu0 %v5277_v38  ;;  %3210 = vmatpush2.bf16.msra.mxu1 %v5298_v39 }
 0x181   :  { %vm1214_vm2 = vcmp.ge.f32.partialorder %v1127_v43, 0.0  ;;  %v1218_v47 = vmul.f32 0.2, %v1127_v43  ;;  %3170 = vmatprep.subr.bf16.mxu0 %v5285_v41  ;;  %3211 = vmatprep.subr.bf16.mxu1 %v5306_v42  ;;  %v1221_v22 = vsel %vm1213_vm3, %v1125_v9, %v1217_v16  ;;  %v5343_v41 = vld [vmem:[#allocation6 + $0xe8] ss:$28 sps:$4 sm:$0xff]  }
 0x182   :  { %v1088_v51 = vpop.f32.mrf.mxu0  ;;  %v5798_v24 = vpack.c.bf16 %v1221_v22, %v1221_v22  ;;  %v5346_v36 = vld [vmem:[#allocation6 + $0x510] ss:$28 sps:$4 sm:$0xff]   ;;  %v5379_v9 = vld [vmem:[#allocation6 + $0x318] ss:$28 sps:$4 sm:$0xff]  }
 0x183   :  { %v1222_v53 = vsel %vm1214_vm2, %v1127_v43, %v1218_v47  ;;  %v5351_v43 = vld [vmem:[#allocation6 + $0xb4] ss:$28 sps:$4 sm:$0xff]   ;;  %v5357_v51 = vld [vmem:[#allocation6 + $0x7c] ss:$28 sps:$4 sm:$0xff]  }
 0x184   :  { %v5794_v55 = vpack.c.bf16 %v1222_v53, %v1222_v53  ;;  %3171 = vmatpush2.bf16.msra.mxu0 %v5283_v45  ;;  %3212 = vmatpush2.bf16.msra.mxu1 %v5304_v49  ;;  %v5354_v49 = vld [vmem:[#allocation6 + $0x4dc] ss:$28 sps:$4 sm:$0xff]   ;;  %v5396_v16 = vld [vmem:[#allocation6 + $0x6d4] ss:$28 sps:$4 sm:$0xff]  }
 0x185   :  { %3172 = vmatprep.subr.bf16.mxu0 %v5291_v50  ;;  %3213 = vmatprep.subr.bf16.mxu1 %v5312_v54  ;;  %v5349_v50 = vld [vmem:[#allocation6 + $0xb0] ss:$28 sps:$4 sm:$0xff]   ;;  %v5352_v53 = vld [vmem:[#allocation6 + $0x4d8] ss:$28 sps:$4 sm:$0xff]   ;;  %v5360_v54 = vld [vmem:[#allocation6 + $0x4a4] ss:$28 sps:$4 sm:$0xff]  }
 0x186   :  { %3184 = vmatprep.mubr.bf16.mxu0 %v5794_v55  ;;  %v5400_v22 = vld [vmem:[#allocation6 + $0x698] ss:$28 sps:$4 sm:$0xff]  }
 0x188   :  { %3173 = vmatpush2.bf16.msra.mxu0 %v5289_v56  ;;  %3214 = vmatpush2.bf16.msra.mxu1 %v5310_v58  ;;  %v5355_v56 = vld [vmem:[#allocation6 + $0x78] ss:$28 sps:$4 sm:$0xff]   ;;  %v5363_v58 = vld [vmem:[#allocation6 + $0x44] ss:$28 sps:$4 sm:$0xff]  }
 0x189   :  { %3174 = vmatprep.subr.bf16.mxu0 %v5297_v59  ;;  %3215 = vmatprep.subr.bf16.mxu1 %v5318_v61  ;;  %v5358_v59 = vld [vmem:[#allocation6 + $0x4a0] ss:$28 sps:$4 sm:$0xff]   ;;  %v5366_v61 = vld [vmem:[#allocation6 + $0x46c] ss:$28 sps:$4 sm:$0xff]  }
 0x18c   :  { %3175 = vmatpush2.bf16.msra.mxu0 %v5295_v44  ;;  %3216 = vmatpush2.bf16.msra.mxu1 %v5316_v62  ;;  %v5361_v44 = vld [vmem:[#allocation6 + $0x40] ss:$28 sps:$4 sm:$0xff]   ;;  %v5369_v62 = vld [vmem:[#allocation6 + $0xc] ss:$28 sps:$4 sm:$0xff]  }
 0x18d   :  { %3176 = vmatprep.subr.bf16.mxu0 %v5303_v63  ;;  %3217 = vmatprep.subr.bf16.mxu1 %v5324_v60  ;;  %v5364_v63 = vld [vmem:[#allocation6 + $0x468] ss:$28 sps:$4 sm:$0xff]   ;;  %v5372_v60 = vld [vmem:[#allocation6 + $0x434] ss:$28 sps:$4 sm:$0xff]  }
 0x190   :  { %3177 = vmatpush2.bf16.msra.mxu0 %v5301_v1  ;;  %3218 = vmatpush2.bf16.msra.mxu1 %v5322_v2  ;;  %v5367_v1 = vld [vmem:[#allocation6 + $0x8] ss:$28 sps:$4 sm:$0xff]   ;;  %v5375_v2 = vld [vmem:[#allocation6 + $0x354] ss:$28 sps:$4 sm:$0xff]  }
 0x191   :  { %3178 = vmatprep.subr.bf16.mxu0 %v5309_v57  ;;  %3219 = vmatprep.subr.bf16.mxu1 %v5330_v3  ;;  %v5370_v57 = vld [vmem:[#allocation6 + $0x430] ss:$28 sps:$4 sm:$0xff]   ;;  %v5378_v3 = vld [vmem:[#allocation6 + $0x3fc] ss:$28 sps:$4 sm:$0xff]  }
 0x194   :  { %v1206_v10 = vpop.f32.mrf.mxu0  ;;  %3179 = vmatpush2.bf16.msra.mxu0 %v5307_v4  ;;  %3220 = vmatpush2.bf16.msra.mxu1 %v5328_v5  ;;  %v5373_v4 = vld [vmem:[#allocation6 + $0x350] ss:$28 sps:$4 sm:$0xff]   ;;  %v5381_v5 = vld [vmem:[#allocation6 + $0x31c] ss:$28 sps:$4 sm:$0xff]  }
 0x195   :  { %3180 = vmatprep.subr.bf16.mxu0 %v5315_v6  ;;  %3221 = vmatprep.subr.bf16.mxu1 %v5336_v8  ;;  %v5376_v6 = vld [vmem:[#allocation6 + $0x3f8] ss:$28 sps:$4 sm:$0xff]   ;;  %v5384_v8 = vld [vmem:[#allocation6 + $0x3c4] ss:$28 sps:$4 sm:$0xff]  }
 0x196   :  { %v1208_v14 = vpop.f32.mrf.mxu0 }
 0x198   :  { %v1210_v17 = vpop.f32.mrf.mxu0  ;;  %3181 = vmatpush2.bf16.msra.mxu0 %v5313_v11  ;;  %3222 = vmatpush2.bf16.msra.mxu1 %v5334_v12  ;;  %v5382_v11 = vld [vmem:[#allocation6 + $0x3c0] ss:$28 sps:$4 sm:$0xff]   ;;  %v5390_v12 = vld [vmem:[#allocation6 + $0x38c] ss:$28 sps:$4 sm:$0xff]  }
 0x199   :  { %3182 = vmatprep.subr.bf16.mxu0 %v5321_v13  ;;  %3223 = vmatprep.subr.bf16.mxu1 %v5342_v15  ;;  %v5385_v13 = vld [vmem:[#allocation6 + $0x2e0] ss:$28 sps:$4 sm:$0xff]   ;;  %v5388_v15 = vld [vmem:[#allocation6 + $0x388] ss:$28 sps:$4 sm:$0xff]  }
 0x19a   :  { %v1211_v7 = vpop.f32.mrf.mxu0  ;;  %v5391_v17 = vld [vmem:[#allocation6 + $0x2a8] ss:$28 sps:$4 sm:$0xff]  }
 0x19b   :  { %v5397_v7 = vld [vmem:[#allocation6 + $0x270] ss:$28 sps:$4 sm:$0xff]  }
 0x19c   :  { %3183 = vmatpush2.bf16.msra.mxu0 %v5319_v18  ;;  %3224 = vmatpush2.bf16.msra.mxu1 %v5340_v19  ;;  %v5399_v18 = vld [vmem:[#allocation6 + $0x274] ss:$28 sps:$4 sm:$0xff]  }
 0x19d   :  { %3234 = vmatprep.subr.bf16.mxu0 %v5327_v20  ;;  %3275 = vmatprep.subr.bf16.mxu1 %v5348_v21  ;;  %v5394_v19 = vld [vmem:[#allocation6 + $0x6d0] ss:$28 sps:$4 sm:$0xff]   ;;  %v5402_v20 = vld [vmem:[#allocation6 + $0x69c] ss:$28 sps:$4 sm:$0xff]  }
 0x19e   :  { %v5405_v21 = vld [vmem:[#allocation6 + $0x23c] ss:$28 sps:$4 sm:$0xff]  }
 0x19f   :  { %3185 = vmatmul.mubr.bf16.vlgmr.msra.gmra.mxu0 %v5798_v24 }
 0x1a0   :  { %3235 = vmatpush1.bf16.msra.mxu0 %v5325_v23  ;;  %3266 = vmatprep.mubr.bf16.mxu0 %v5794_v55  ;;  %v5408_v23 = vld [vmem:[#allocation6 + $0x664] ss:$28 sps:$4 sm:$0xff]  }
 0x1a1   :  { %3236 = vmatprep.subr.bf16.mxu0 %v5333_v25  ;;  %v5403_v25 = vld [vmem:[#allocation6 + $0x238] ss:$28 sps:$4 sm:$0xff]  }
 0x1a3   :  { %v1165_v28 = vpop.f32.mrf.mxu1 }
 0x1a4   :  { %v1207_v30 = vadd.f32 %v1206_v10, %v1165_v28  ;;  %3237 = vmatpush1.bf16.msra.mxu0 %v5331_v26  ;;  %v5387_v10 = vld [vmem:[#allocation6 + $0x2e4] ss:$28 sps:$4 sm:$0xff]   ;;  %v5414_v28 = vld [vmem:[#allocation6 + $0x62c] ss:$28 sps:$4 sm:$0xff]  }
 0x1a5   :  { %v1167_v52 = vpop.f32.mrf.mxu1  ;;  %3238 = vmatprep.subr.bf16.mxu0 %v5339_v27  ;;  %v5411_v26 = vld [vmem:[#allocation6 + $0x204] ss:$28 sps:$4 sm:$0xff]  }
 0x1a6   :  { %vm1215_vm4 = vcmp.ge.f32.partialorder %v1207_v30, 0.0  ;;  %v1219_v33 = vmul.f32 0.2, %v1207_v30  ;;  %v1209_v34 = vadd.f32 %v1208_v14, %v1167_v52  ;;  %v5393_v14 = vld [vmem:[#allocation6 + $0x2ac] ss:$28 sps:$4 sm:$0xff]  }
 0x1a7   :  { %v1169_v37 = vpop.f32.mrf.mxu1  ;;  %v5406_v27 = vld [vmem:[#allocation6 + $0x660] ss:$28 sps:$4 sm:$0xff]   ;;  %v5417_v52 = vld [vmem:[#allocation6 + $0x1cc] ss:$28 sps:$4 sm:$0xff]  }
 0x1a8   :  { %vm1216_vm5 = vcmp.ge.f32.partialorder %v1209_v34, 0.0  ;;  %v1220_v38 = vmul.f32 0.2, %v1209_v34  ;;  %v1223_v39 = vsel %vm1215_vm4, %v1207_v30, %v1219_v33  ;;  %3239 = vmatpush1.bf16.msra.mxu0 %v5337_v31  ;;  %v5409_v30 = vld [vmem:[#allocation6 + $0x200] ss:$28 sps:$4 sm:$0xff]  }
 0x1a9   :  { %v1170_v40 = vpop.f32.mrf.mxu1  ;;  %3240 = vmatprep.subr.bf16.mxu0 %v5345_v35  ;;  %v5804_v47 = vpack.c.bf16 %v1223_v39, %v1223_v39  ;;  %v5412_v31 = vld [vmem:[#allocation6 + $0x628] ss:$28 sps:$4 sm:$0xff]   ;;  %v5420_v33 = vld [vmem:[#allocation6 + $0x5f4] ss:$28 sps:$4 sm:$0xff]   ;;  %v5423_v35 = vld [vmem:[#allocation6 + $0x19c] ss:$28 sps:$4 sm:$0xff]  }
 0x1aa   :  { %v1224_v42 = vsel %vm1216_vm5, %v1209_v34, %v1220_v38  ;;  %v5415_v34 = vld [vmem:[#allocation6 + $0x1c8] ss:$28 sps:$4 sm:$0xff]   ;;  %v5418_v37 = vld [vmem:[#allocation6 + $0x5f0] ss:$28 sps:$4 sm:$0xff]   ;;  %v5426_v38 = vld [vmem:[#allocation6 + $0x5bc] ss:$28 sps:$4 sm:$0xff]  }
 0x1ab   :  { %v5802_v45 = vpack.c.bf16 %v1224_v42, %v1224_v42  ;;  %v5421_v39 = vld [vmem:[#allocation6 + $0x198] ss:$28 sps:$4 sm:$0xff]   ;;  %v5429_v40 = vld [vmem:[#allocation6 + $0x164] ss:$28 sps:$4 sm:$0xff]  }
 0x1ac   :  { %3241 = vmatpush1.bf16.msra.mxu0 %v5343_v41  ;;  %v5424_v41 = vld [vmem:[#allocation6 + $0x5b8] ss:$28 sps:$4 sm:$0xff]   ;;  %v5432_v42 = vld [vmem:[#allocation6 + $0x584] ss:$28 sps:$4 sm:$0xff]  }
 0x1ad   :  { %3225 = vmatprep.mubr.bf16.mxu1 %v5802_v45  ;;  %3242 = vmatprep.subr.bf16.mxu0 %v5351_v43  ;;  %v5427_v43 = vld [vmem:[#allocation6 + $0x160] ss:$28 sps:$4 sm:$0xff]  }
 0x1ae   :  { %3226 = vmatmul.mubr.bf16.vlgmr.msra.gmra.mxu1 %v5804_v47 }
 0x1af   :  { %3276 = vmatpush1.bf16.msra.mxu1 %v5346_v36  ;;  %3307 = vmatprep.mubr.bf16.mxu1 %v5802_v45  ;;  %v5435_v36 = vld [vmem:[#allocation6 + $0x12c] ss:$28 sps:$4 sm:$0xff]  }
 0x1b0   :  { %3277 = vmatprep.subr.bf16.mxu1 %v5354_v49  ;;  %3243 = vmatpush1.bf16.msra.mxu0 %v5349_v50  ;;  %v5430_v49 = vld [vmem:[#allocation6 + $0x580] ss:$28 sps:$4 sm:$0xff]   ;;  %v5438_v50 = vld [vmem:[#allocation6 + $0x54c] ss:$28 sps:$4 sm:$0xff]  }
 0x1b1   :  { %3244 = vmatprep.subr.bf16.mxu0 %v5357_v51  ;;  %v5433_v51 = vld [vmem:[#allocation6 + $0x128] ss:$28 sps:$4 sm:$0xff]  }
 0x1b3   :  { %3278 = vmatpush1.bf16.msra.mxu1 %v5352_v53  ;;  %v5441_v53 = vld [vmem:[#allocation6 + $0xf4] ss:$28 sps:$4 sm:$0xff]  }
 0x1b4   :  { %3279 = vmatprep.subr.bf16.mxu1 %v5360_v54  ;;  %3245 = vmatpush1.bf16.msra.mxu0 %v5355_v56  ;;  %v5436_v54 = vld [vmem:[#allocation6 + $0x548] ss:$28 sps:$4 sm:$0xff]   ;;  %v5444_v56 = vld [vmem:[#allocation6 + $0x51c] ss:$28 sps:$4 sm:$0xff]  }
 0x1b5   :  { %3246 = vmatprep.subr.bf16.mxu0 %v5363_v58  ;;  %v5439_v58 = vld [vmem:[#allocation6 + $0xf0] ss:$28 sps:$4 sm:$0xff]  }
 0x1b7   :  { %3280 = vmatpush1.bf16.msra.mxu1 %v5358_v59  ;;  %v5447_v59 = vld [vmem:[#allocation6 + $0xbc] ss:$28 sps:$4 sm:$0xff]  }
 0x1b8   :  { %3281 = vmatprep.subr.bf16.mxu1 %v5366_v61  ;;  %3247 = vmatpush1.bf16.msra.mxu0 %v5361_v44  ;;  %v5442_v61 = vld [vmem:[#allocation6 + $0x518] ss:$28 sps:$4 sm:$0xff]   ;;  %v5450_v44 = vld [vmem:[#allocation6 + $0x4e4] ss:$28 sps:$4 sm:$0xff]  }
 0x1b9   :  { %3248 = vmatprep.subr.bf16.mxu0 %v5369_v62  ;;  %v5445_v62 = vld [vmem:[#allocation6 + $0xb8] ss:$28 sps:$4 sm:$0xff]  }
 0x1bb   :  { %3282 = vmatpush1.bf16.msra.mxu1 %v5364_v63  ;;  %v5453_v63 = vld [vmem:[#allocation6 + $0x84] ss:$28 sps:$4 sm:$0xff]  }
 0x1bc   :  { %3283 = vmatprep.subr.bf16.mxu1 %v5372_v60  ;;  %3249 = vmatpush1.bf16.msra.mxu0 %v5367_v1  ;;  %v5448_v60 = vld [vmem:[#allocation6 + $0x4e0] ss:$28 sps:$4 sm:$0xff]   ;;  %v5456_v1 = vld [vmem:[#allocation6 + $0x4ac] ss:$28 sps:$4 sm:$0xff]  }
 0x1bd   :  { %3250 = vmatprep.subr.bf16.mxu0 %v5375_v2  ;;  %v5451_v2 = vld [vmem:[#allocation6 + $0x80] ss:$28 sps:$4 sm:$0xff]  }
 0x1bf   :  { %3284 = vmatpush1.bf16.msra.mxu1 %v5370_v57  ;;  %v5459_v57 = vld [vmem:[#allocation6 + $0x4c] ss:$28 sps:$4 sm:$0xff]  }
 0x1c0   :  { %3285 = vmatprep.subr.bf16.mxu1 %v5378_v3  ;;  %3251 = vmatpush2.bf16.msra.mxu0 %v5373_v4  ;;  %v5454_v3 = vld [vmem:[#allocation6 + $0x4a8] ss:$28 sps:$4 sm:$0xff]   ;;  %v5462_v4 = vld [vmem:[#allocation6 + $0x474] ss:$28 sps:$4 sm:$0xff]  }
 0x1c1   :  { %3252 = vmatprep.subr.bf16.mxu0 %v5381_v5  ;;  %v5457_v5 = vld [vmem:[#allocation6 + $0x48] ss:$28 sps:$4 sm:$0xff]  }
 0x1c3   :  { %3286 = vmatpush1.bf16.msra.mxu1 %v5376_v6  ;;  %v5465_v6 = vld [vmem:[#allocation6 + $0x14] ss:$28 sps:$4 sm:$0xff]  }
 0x1c4   :  { %3287 = vmatprep.subr.bf16.mxu1 %v5384_v8  ;;  %3253 = vmatpush2.bf16.msra.mxu0 %v5379_v9  ;;  %v5460_v8 = vld [vmem:[#allocation6 + $0x470] ss:$28 sps:$4 sm:$0xff]   ;;  %v5468_v9 = vld [vmem:[#allocation6 + $0x43c] ss:$28 sps:$4 sm:$0xff]  }
 0x1c5   :  { %3254 = vmatprep.subr.bf16.mxu0 %v5387_v10  ;;  %v5463_v10 = vld [vmem:[#allocation6 + $0x10] ss:$28 sps:$4 sm:$0xff]  }
 0x1c7   :  { %3288 = vmatpush1.bf16.msra.mxu1 %v5382_v11  ;;  %v5471_v11 = vld [vmem:[#allocation6 + $0x35c] ss:$28 sps:$4 sm:$0xff]  }
 0x1c8   :  { %3289 = vmatprep.subr.bf16.mxu1 %v5390_v12  ;;  %3255 = vmatpush2.bf16.msra.mxu0 %v5385_v13  ;;  %v5466_v12 = vld [vmem:[#allocation6 + $0x438] ss:$28 sps:$4 sm:$0xff]   ;;  %v5474_v13 = vld [vmem:[#allocation6 + $0x404] ss:$28 sps:$4 sm:$0xff]  }
 0x1c9   :  { %3256 = vmatprep.subr.bf16.mxu0 %v5393_v14  ;;  %v5469_v14 = vld [vmem:[#allocation6 + $0x358] ss:$28 sps:$4 sm:$0xff]  }
 0x1cb   :  { %3290 = vmatpush1.bf16.msra.mxu1 %v5388_v15  ;;  %v5477_v15 = vld [vmem:[#allocation6 + $0x324] ss:$28 sps:$4 sm:$0xff]  }
 0x1cc   :  { %3291 = vmatprep.subr.bf16.mxu1 %v5396_v16  ;;  %3257 = vmatpush2.bf16.msra.mxu0 %v5391_v17  ;;  %v5472_v16 = vld [vmem:[#allocation6 + $0x400] ss:$28 sps:$4 sm:$0xff]  }
 0x1cd   :  { %3258 = vmatprep.subr.bf16.mxu0 %v5399_v18 }
 0x1cf   :  { %3292 = vmatpush2.bf16.msra.mxu1 %v5394_v19  ;;  %v5480_v19 = vld [vmem:[#allocation6 + $0x3cc] ss:$28 sps:$4 sm:$0xff]  }
 0x1d0   :  { %3293 = vmatprep.subr.bf16.mxu1 %v5402_v20  ;;  %3259 = vmatpush2.bf16.msra.mxu0 %v5397_v7  ;;  %v5475_v20 = vld [vmem:[#allocation6 + $0x320] ss:$28 sps:$4 sm:$0xff]  }
 0x1d1   :  { %3260 = vmatprep.subr.bf16.mxu0 %v5405_v21 }
 0x1d3   :  { %3294 = vmatpush2.bf16.msra.mxu1 %v5400_v22  ;;  %v5483_v22 = vld [vmem:[#allocation6 + $0x2ec] ss:$28 sps:$4 sm:$0xff]  }
 0x1d4   :  { %3295 = vmatprep.subr.bf16.mxu1 %v5408_v23  ;;  %3261 = vmatpush2.bf16.msra.mxu0 %v5403_v25  ;;  %v5478_v23 = vld [vmem:[#allocation6 + $0x3c8] ss:$28 sps:$4 sm:$0xff]  }
 0x1d5   :  { %3262 = vmatprep.subr.bf16.mxu0 %v5411_v26 }
 0x1d7   :  { %3296 = vmatpush2.bf16.msra.mxu1 %v5406_v27  ;;  %v5486_v27 = vld [vmem:[#allocation6 + $0x394] ss:$28 sps:$4 sm:$0xff]  }
 0x1d8   :  { %3297 = vmatprep.subr.bf16.mxu1 %v5414_v28  ;;  %3263 = vmatpush2.bf16.msra.mxu0 %v5409_v30  ;;  %v5481_v28 = vld [vmem:[#allocation6 + $0x2e8] ss:$28 sps:$4 sm:$0xff]  }
 0x1d9   :  { %3264 = vmatprep.subr.bf16.mxu0 %v5417_v52 }
 0x1db   :  { %3298 = vmatpush2.bf16.msra.mxu1 %v5412_v31  ;;  %v5489_v31 = vld [vmem:[#allocation6 + $0x2b4] ss:$28 sps:$4 sm:$0xff]  }
 0x1dc   :  { %3299 = vmatprep.subr.bf16.mxu1 %v5420_v33  ;;  %3265 = vmatpush2.bf16.msra.mxu0 %v5415_v34  ;;  %v5484_v33 = vld [vmem:[#allocation6 + $0x390] ss:$28 sps:$4 sm:$0xff]   ;;  %v5492_v34 = vld [vmem:[#allocation6 + $0x6dc] ss:$28 sps:$4 sm:$0xff]  }
 0x1dd   :  { %3316 = vmatprep.subr.bf16.mxu0 %v5423_v35  ;;  %v5487_v35 = vld [vmem:[#allocation6 + $0x2b0] ss:$28 sps:$4 sm:$0xff]  }
 0x1df   :  { %3300 = vmatpush2.bf16.msra.mxu1 %v5418_v37  ;;  %3267 = vmatmul.mubr.bf16.vlgmr.msra.gmra.mxu0 %v5798_v24  ;;  %v5495_v37 = vld [vmem:[#allocation6 + $0x27c] ss:$28 sps:$4 sm:$0xff]  }
 0x1e0   :  { %3301 = vmatprep.subr.bf16.mxu1 %v5426_v38  ;;  %3317 = vmatpush1.bf16.msra.mxu0 %v5421_v39  ;;  %v5490_v38 = vld [vmem:[#allocation6 + $0x6d8] ss:$28 sps:$4 sm:$0xff]   ;;  %v5498_v39 = vld [vmem:[#allocation6 + $0x6a4] ss:$28 sps:$4 sm:$0xff]  }
 0x1e1   :  { %3348 = vmatprep.mubr.bf16.mxu0 %v5794_v55  ;;  %3318 = vmatprep.subr.bf16.mxu0 %v5429_v40  ;;  %v5493_v40 = vld [vmem:[#allocation6 + $0x278] ss:$28 sps:$4 sm:$0xff]  }
 0x1e3   :  { %3302 = vmatpush2.bf16.msra.mxu1 %v5424_v41  ;;  %v5501_v41 = vld [vmem:[#allocation6 + $0x244] ss:$28 sps:$4 sm:$0xff]  }
 0x1e4   :  { %3303 = vmatprep.subr.bf16.mxu1 %v5432_v42  ;;  %3319 = vmatpush1.bf16.msra.mxu0 %v5427_v43  ;;  %v5496_v42 = vld [vmem:[#allocation6 + $0x6a0] ss:$28 sps:$4 sm:$0xff]   ;;  %v5504_v43 = vld [vmem:[#allocation6 + $0x66c] ss:$28 sps:$4 sm:$0xff]  }
 0x1e5   :  { %3320 = vmatprep.subr.bf16.mxu0 %v5435_v36  ;;  %v5499_v36 = vld [vmem:[#allocation6 + $0x240] ss:$28 sps:$4 sm:$0xff]  }
 0x1e7   :  { %3304 = vmatpush2.bf16.msra.mxu1 %v5430_v49  ;;  %v5507_v49 = vld [vmem:[#allocation6 + $0x20c] ss:$28 sps:$4 sm:$0xff]  }
 0x1e8   :  { %3305 = vmatprep.subr.bf16.mxu1 %v5438_v50  ;;  %3321 = vmatpush1.bf16.msra.mxu0 %v5433_v51  ;;  %v5502_v50 = vld [vmem:[#allocation6 + $0x668] ss:$28 sps:$4 sm:$0xff]   ;;  %v5510_v51 = vld [vmem:[#allocation6 + $0x634] ss:$28 sps:$4 sm:$0xff]  }
 0x1e9   :  { %3322 = vmatprep.subr.bf16.mxu0 %v5441_v53  ;;  %v5505_v53 = vld [vmem:[#allocation6 + $0x208] ss:$28 sps:$4 sm:$0xff]  }
 0x1eb   :  { %3306 = vmatpush2.bf16.msra.mxu1 %v5436_v54  ;;  %v5513_v54 = vld [vmem:[#allocation6 + $0x1d4] ss:$28 sps:$4 sm:$0xff]  }
 0x1ec   :  { %3357 = vmatprep.subr.bf16.mxu1 %v5444_v56  ;;  %3323 = vmatpush1.bf16.msra.mxu0 %v5439_v58  ;;  %v5508_v56 = vld [vmem:[#allocation6 + $0x630] ss:$28 sps:$4 sm:$0xff]   ;;  %v5516_v58 = vld [vmem:[#allocation6 + $0x5fc] ss:$28 sps:$4 sm:$0xff]  }
 0x1ed   :  { %3324 = vmatprep.subr.bf16.mxu0 %v5447_v59  ;;  %v5511_v59 = vld [vmem:[#allocation6 + $0x1d0] ss:$28 sps:$4 sm:$0xff]  }
 0x1ee   :  { %3308 = vmatmul.mubr.bf16.vlgmr.msra.gmra.mxu1 %v5804_v47 }
 0x1ef   :  { %3358 = vmatpush1.bf16.msra.mxu1 %v5442_v61  ;;  %3389 = vmatprep.mubr.bf16.mxu1 %v5802_v45  ;;  %v5517_v61 = vld [vmem:[#allocation6 + $0x360] ss:$28 sps:$4 sm:$0xff]  }
 0x1f0   :  { %3359 = vmatprep.subr.bf16.mxu1 %v5450_v44  ;;  %3325 = vmatpush1.bf16.msra.mxu0 %v5445_v62  ;;  %v5514_v44 = vld [vmem:[#allocation6 + $0x5f8] ss:$28 sps:$4 sm:$0xff]   ;;  %v5521_v62 = vld [vmem:[#allocation6 + $0x5c4] ss:$28 sps:$4 sm:$0xff]  }
 0x1f1   :  { %3326 = vmatprep.subr.bf16.mxu0 %v5453_v63  ;;  %v5518_v63 = vld [vmem:[#allocation6 + $0x1a0] ss:$28 sps:$4 sm:$0xff]  }
 0x1f3   :  { %3360 = vmatpush1.bf16.msra.mxu1 %v5448_v60  ;;  %v5522_v60 = vld [vmem:[#allocation6 + $0x328] ss:$28 sps:$4 sm:$0xff]  }
 0x1f4   :  { %3361 = vmatprep.subr.bf16.mxu1 %v5456_v1  ;;  %3327 = vmatpush1.bf16.msra.mxu0 %v5451_v2  ;;  %v5519_v1 = vld [vmem:[#allocation6 + $0x5c0] ss:$28 sps:$4 sm:$0xff]  }
 0x1f5   :  { %3328 = vmatprep.subr.bf16.mxu0 %v5459_v57 }
 0x1f7   :  { %3362 = vmatpush1.bf16.msra.mxu1 %v5454_v3  ;;  %v5526_v3 = vld [vmem:[#allocation6 + $0x58c] ss:$28 sps:$4 sm:$0xff]  }
 0x1f8   :  { %3363 = vmatprep.subr.bf16.mxu1 %v5462_v4  ;;  %3329 = vmatpush1.bf16.msra.mxu0 %v5457_v5  ;;  %v5523_v4 = vld [vmem:[#allocation6 + $0x168] ss:$28 sps:$4 sm:$0xff]  }
 0x1f9   :  { %3330 = vmatprep.subr.bf16.mxu0 %v5465_v6 }
 0x1fb   :  { %3364 = vmatpush1.bf16.msra.mxu1 %v5460_v8  ;;  %v5527_v8 = vld [vmem:[#allocation6 + $0x2f0] ss:$28 sps:$4 sm:$0xff]  }
 0x1fc   :  { %3365 = vmatprep.subr.bf16.mxu1 %v5468_v9  ;;  %3331 = vmatpush1.bf16.msra.mxu0 %v5463_v10  ;;  %v5524_v9 = vld [vmem:[#allocation6 + $0x588] ss:$28 sps:$4 sm:$0xff]  }
 0x1fd   :  { %3332 = vmatprep.subr.bf16.mxu0 %v5471_v11 }
 0x1ff   :  { %3366 = vmatpush1.bf16.msra.mxu1 %v5466_v12  ;;  %v5813_v17 = vpop.f32.mrf.mxu0  ;;  %v5815_v18 = vpop.f32.mrf.mxu1  ;;  %v5531_v12 = vld [vmem:[#allocation6 + $0x554] ss:$28 sps:$4 sm:$0xff]  }
 0x200   :  { %3367 = vmatprep.subr.bf16.mxu1 %v5474_v13  ;;  %3333 = vmatpush2.bf16.msra.mxu0 %v5469_v14  ;;  %v5528_v13 = vld [vmem:[#allocation6 + $0x130] ss:$28 sps:$4 sm:$0xff]  }
 0x201   :  { %v5817_v7 = vpop.f32.mrf.mxu0  ;;  %v5819_v21 = vpop.f32.mrf.mxu1  ;;  %3334 = vmatprep.subr.bf16.mxu0 %v5477_v15 }
 0x203   :  { %3368 = vmatpush1.bf16.msra.mxu1 %v5472_v16  ;;  %v1875_v25 = vpop.f32.mrf.mxu0  ;;  %v1916_v26 = vpop.f32.mrf.mxu1  ;;  %v5532_v16 = vld [vmem:[#allocation6 + $0x2b8] ss:$28 sps:$4 sm:$0xff]  }
 0x204   :  { %3369 = vmatprep.subr.bf16.mxu1 %v5480_v19  ;;  %3335 = vmatpush2.bf16.msra.mxu0 %v5475_v20  ;;  %v5534_v19 = vld [vmem:[#allocation6 + $0x6e0] ss:$28 sps:$4 sm:$0xff]   ;;  %v5533_v20 = vld [vmem:[#allocation6 + $0xf8] ss:$28 sps:$4 sm:$0xff]   ;;  %v5538_v25 = vld [vmem:[#allocation6 + $0x6a8] ss:$28 sps:$4 sm:$0xff]  }
 0x205   :  { %v1876_v30 = vpop.f32.mrf.mxu0  ;;  %v1917_v52 = vpop.f32.mrf.mxu1  ;;  %3336 = vmatprep.subr.bf16.mxu0 %v5483_v22  ;;  %v5536_v22 = vld [vmem:[#allocation6 + $0x280] ss:$28 sps:$4 sm:$0xff]  }
 0x206   :  { %v5537_v26 = vld [vmem:[#allocation6 + $0xc0] ss:$28 sps:$4 sm:$0xff]   ;;  %v5542_v30 = vld [vmem:[#allocation6 + $0x670] ss:$28 sps:$4 sm:$0xff]   ;;  %v5541_v52 = vld [vmem:[#allocation6 + $0x88] ss:$28 sps:$4 sm:$0xff]  }
 0x207   :  { %3370 = vmatpush1.bf16.msra.mxu1 %v5478_v23  ;;  %v5535_v23 = vld [vmem:[#allocation6 + $0x520] ss:$28 sps:$4 sm:$0xff]  }
 0x208   :  { %3371 = vmatprep.subr.bf16.mxu1 %v5486_v27  ;;  %3337 = vmatpush2.bf16.msra.mxu0 %v5481_v28  ;;  %v5540_v27 = vld [vmem:[#allocation6 + $0x248] ss:$28 sps:$4 sm:$0xff]  }
 0x209   :  { %3338 = vmatprep.subr.bf16.mxu0 %v5489_v31  ;;  %v5539_v28 = vld [vmem:[#allocation6 + $0x4e8] ss:$28 sps:$4 sm:$0xff]   ;;  %v5544_v31 = vld [vmem:[#allocation6 + $0x210] ss:$28 sps:$4 sm:$0xff]  }
 0x20b   :  { %3372 = vmatpush1.bf16.msra.mxu1 %v5484_v33  ;;  %v5543_v33 = vld [vmem:[#allocation6 + $0x4b0] ss:$28 sps:$4 sm:$0xff]  }
 0x20c   :  { %3373 = vmatprep.subr.bf16.mxu1 %v5492_v34  ;;  %3339 = vmatpush2.bf16.msra.mxu0 %v5487_v35  ;;  %v5546_v34 = vld [vmem:[#allocation6 + $0x638] ss:$28 sps:$4 sm:$0xff]   ;;  %v5545_v35 = vld [vmem:[#allocation6 + $0x50] ss:$28 sps:$4 sm:$0xff]  }
 0x20d   :  { %3340 = vmatprep.subr.bf16.mxu0 %v5495_v37  ;;  %v5548_v37 = vld [vmem:[#allocation6 + $0x1d8] ss:$28 sps:$4 sm:$0xff]  }
 0x20f   :  { %3374 = vmatpush2.bf16.msra.mxu1 %v5490_v38  ;;  %v5547_v38 = vld [vmem:[#allocation6 + $0x478] ss:$28 sps:$4 sm:$0xff]  }
 0x210   :  { %3375 = vmatprep.subr.bf16.mxu1 %v5498_v39  ;;  %3341 = vmatpush2.bf16.msra.mxu0 %v5493_v40  ;;  %v5550_v39 = vld [vmem:[#allocation6 + $0x600] ss:$28 sps:$4 sm:$0xff]  }
 0x211   :  { %3342 = vmatprep.subr.bf16.mxu0 %v5501_v41  ;;  %v5551_v40 = vld [vmem:[#allocation6 + $0x440] ss:$28 sps:$4 sm:$0xff]  }
 0x212   :  { %v3594_v41 = vld [vmem:[#allocation7 + $0x3a0] sm:$0xff] }
 0x213   :  { %3376 = vmatpush2.bf16.msra.mxu1 %v5496_v42  ;;  %v5552_v42 = vld [vmem:[#allocation6 + $0x5c8] ss:$28 sps:$4 sm:$0xff]  }
 0x214   :  { %3377 = vmatprep.subr.bf16.mxu1 %v5504_v43  ;;  %3343 = vmatpush2.bf16.msra.mxu0 %v5499_v36  ;;  %v3593_v43 = vld [vmem:[#allocation7 + $0x398] sm:$0xff] }
 0x215   :  { %3344 = vmatprep.subr.bf16.mxu0 %v5507_v49  ;;  %v3589_v36 = vld [vmem:[#allocation7 + $0x378] sm:$0xff]  ;;  %v5553_v49 = vld [vmem:[#allocation6 + $0x408] ss:$28 sps:$4 sm:$0xff]  }
 0x217   :  { %3378 = vmatpush2.bf16.msra.mxu1 %v5502_v50  ;;  %v3588_v50 = vld [vmem:[#allocation7 + $0x370] sm:$0xff] }
 0x218   :  { %3379 = vmatprep.subr.bf16.mxu1 %v5510_v51  ;;  %3345 = vmatpush2.bf16.msra.mxu0 %v5505_v53  ;;  %v5554_v51 = vld [vmem:[#allocation6 + $0x590] ss:$28 sps:$4 sm:$0xff]  }
 0x219   :  { %3346 = vmatprep.subr.bf16.mxu0 %v5513_v54  ;;  %v3584_v53 = vld [vmem:[#allocation7 + $0x350] sm:$0xff]  ;;  %v3583_v54 = vld [vmem:[#allocation7 + $0x348] sm:$0xff] }
 0x21b   :  { %3380 = vmatpush2.bf16.msra.mxu1 %v5508_v56  ;;  %v3579_v56 = vld [vmem:[#allocation7 + $0x328] sm:$0xff] }
 0x21c   :  { %3381 = vmatprep.subr.bf16.mxu1 %v5516_v58  ;;  %3347 = vmatpush2.bf16.msra.mxu0 %v5511_v59  ;;  %v5555_v58 = vld [vmem:[#allocation6 + $0x3d0] ss:$28 sps:$4 sm:$0xff]   ;;  %v3578_v59 = vld [vmem:[#allocation7 + $0x320] sm:$0xff] }
 0x21d   :  { %4754 = vmatprep.subr.bf16.mxu0 %v5517_v61  ;;  %v5556_v61 = vld [vmem:[#allocation6 + $0x558] ss:$28 sps:$4 sm:$0xff]  }
 0x21f   :  { %3382 = vmatpush2.bf16.msra.mxu1 %v5514_v44  ;;  %v5821_v2 = vpop.f32.mrf.mxu0  ;;  %v5823_v57 = vpop.f32.mrf.mxu1  ;;  %3349 = vmatmul.mubr.bf16.vlgmr.msra.gmra.mxu0 %v5798_v24  ;;  %v3574_v44 = vld [vmem:[#allocation7 + $0x300] sm:$0xff] }
 0x220   :  { %3383 = vmatprep.subr.bf16.mxu1 %v5521_v62  ;;  %4755 = vmatpush3.bf16.msra.mxu0 %v5518_v63  ;;  %v3569_v62 = vld [vmem:[#allocation7 + $0x2d8] sm:$0xff] }
 0x221   :  { %3430 = vmatprep.mubr.bf16.mxu0 %v5794_v55  ;;  %v5827_v5 = vpop.f32.mrf.mxu0  ;;  %v4896_v6 = vpop.f32.mrf.mxu1  ;;  %4756 = vmatprep.subr.bf16.mxu0 %v5522_v60  ;;  %v5529_v55 = vld [vmem:[#allocation6 + $0x550] ss:$28 sps:$4 sm:$0xff]   ;;  %v5557_v63 = vld [vmem:[#allocation6 + $0x398] ss:$28 sps:$4 sm:$0xff]  }
 0x222   :  { %v3568_v60 = vld [vmem:[#allocation7 + $0x2d0] sm:$0xff]  ;;  %v3559_v6 = vld [vmem:[#allocation7 + $0x288] sm:$0xff] }
 0x223   :  { %3384 = vmatpush2.bf16.msra.mxu1 %v5519_v1  ;;  %v1957_v10 = vpop.f32.mrf.mxu0  ;;  %v1997_v11 = vpop.f32.mrf.mxu1  ;;  %v3564_v1 = vld [vmem:[#allocation7 + $0x2b0] sm:$0xff] }
 0x224   :  { %3385 = vmatprep.subr.bf16.mxu1 %v5526_v3  ;;  %4757 = vmatpush3.bf16.msra.mxu0 %v5523_v4  ;;  %v3596_v3 = vld [vmem:[#allocation7 + $0x3b0] sm:$0xff]  ;;  %v3563_v4 = vld [vmem:[#allocation7 + $0x2a8] sm:$0xff]  ;;  %v3554_v10 = vld [vmem:[#allocation7 + $0x260] sm:$0xff] }
 0x225   :  { %v1958_v14 = vpop.f32.mrf.mxu0  ;;  %v4897_v15 = vpop.f32.mrf.mxu1  ;;  %4758 = vmatprep.subr.bf16.mxu0 %v5527_v8  ;;  %v3558_v8 = vld [vmem:[#allocation7 + $0x280] sm:$0xff]  ;;  %v3591_v11 = vld [vmem:[#allocation7 + $0x388] sm:$0xff] }
 0x226   :  { %v3549_v14 = vld [vmem:[#allocation7 + $0x238] sm:$0xff]  ;;  %v3586_v15 = vld [vmem:[#allocation7 + $0x360] sm:$0xff] }
 0x227   :  { %3386 = vmatpush2.bf16.msra.mxu1 %v5524_v9  ;;  %v3595_v9 = vld [vmem:[#allocation7 + $0x3a8] sm:$0xff] }
 0x228   :  { %3387 = vmatprep.subr.bf16.mxu1 %v5531_v12  ;;  %4759 = vmatpush3.bf16.msra.mxu0 %v5528_v13  ;;  %v3553_v12 = vld [vmem:[#allocation7 + $0x258] sm:$0xff]  ;;  %v3590_v13 = vld [vmem:[#allocation7 + $0x380] sm:$0xff] }
 0x229   :  { %4760 = vmatprep.subr.bf16.mxu0 %v5532_v16  ;;  %v3548_v16 = vld [vmem:[#allocation7 + $0x230] sm:$0xff] }
 0x22b   :  { %3388 = vmatpush2.bf16.msra.mxu1 %v5529_v55  ;;  %v3585_v55 = vld [vmem:[#allocation7 + $0x358] sm:$0xff] }
 0x22c   :  { %4776 = vmatprep.subr.bf16.mxu1 %v5534_v19  ;;  %4761 = vmatpush3.bf16.msra.mxu0 %v5533_v20  ;;  %v3544_v19 = vld [vmem:[#allocation7 + $0x210] sm:$0xff]  ;;  %v3581_v20 = vld [vmem:[#allocation7 + $0x338] sm:$0xff] }
 0x22d   :  { %4762 = vmatprep.subr.bf16.mxu0 %v5536_v22  ;;  %v3543_v22 = vld [vmem:[#allocation7 + $0x208] sm:$0xff] }
 0x22e   :  { %3390 = vmatmul.mubr.bf16.vlgmr.msra.gmra.mxu1 %v5804_v47 }
 0x22f   :  { %4777 = vmatpush3.bf16.msra.mxu1 %v5535_v23  ;;  %3470 = vmatprep.mubr.bf16.mxu1 %v5802_v45  ;;  %v5549_v45 = vld [vmem:[#allocation6 + $0x18] ss:$28 sps:$4 sm:$0xff]  }
 0x230   :  { %4778 = vmatprep.subr.bf16.mxu1 %v5538_v25  ;;  %4763 = vmatpush3.bf16.msra.mxu0 %v5537_v26  ;;  %v3580_v23 = vld [vmem:[#allocation7 + $0x330] sm:$0xff]  ;;  %v3538_v26 = vld [vmem:[#allocation7 + $0x1e0] sm:$0xff] }
 0x231   :  { %4764 = vmatprep.subr.bf16.mxu0 %v5540_v27  ;;  %v3576_v25 = vld [vmem:[#allocation7 + $0x310] sm:$0xff]  ;;  %v3575_v27 = vld [vmem:[#allocation7 + $0x308] sm:$0xff] }
 0x233   :  { %4779 = vmatpush3.bf16.msra.mxu1 %v5539_v28  ;;  %v3534_v28 = vld [vmem:[#allocation7 + $0x1c0] sm:$0xff] }
 0x234   :  { %4780 = vmatprep.subr.bf16.mxu1 %v5542_v30  ;;  %4765 = vmatpush3.bf16.msra.mxu0 %v5541_v52  ;;  %v3571_v30 = vld [vmem:[#allocation7 + $0x2e8] sm:$0xff]  ;;  %v3533_v52 = vld [vmem:[#allocation7 + $0x1b8] sm:$0xff] }
 0x235   :  { %4766 = vmatprep.subr.bf16.mxu0 %v5544_v31  ;;  %v3570_v31 = vld [vmem:[#allocation7 + $0x2e0] sm:$0xff] }
 0x237   :  { %4781 = vmatpush3.bf16.msra.mxu1 %v5543_v33  ;;  %v3529_v33 = vld [vmem:[#allocation7 + $0x198] sm:$0xff] }
 0x238   :  { %4782 = vmatprep.subr.bf16.mxu1 %v5546_v34  ;;  %4767 = vmatpush3.bf16.msra.mxu0 %v5545_v35  ;;  %v3566_v34 = vld [vmem:[#allocation7 + $0x2c0] sm:$0xff]  ;;  %v3528_v35 = vld [vmem:[#allocation7 + $0x190] sm:$0xff] }
 0x239   :  { %4768 = vmatprep.subr.bf16.mxu0 %v5548_v37  ;;  %v3565_v37 = vld [vmem:[#allocation7 + $0x2b8] sm:$0xff] }
 0x23b   :  { %4783 = vmatpush3.bf16.msra.mxu1 %v5547_v38  ;;  %v3524_v38 = vld [vmem:[#allocation7 + $0x170] sm:$0xff] }
 0x23c   :  { %4784 = vmatprep.subr.bf16.mxu1 %v5550_v39  ;;  %4769 = vmatpush3.bf16.msra.mxu0 %v5549_v45  ;;  %v3561_v39 = vld [vmem:[#allocation7 + $0x298] sm:$0xff]  ;;  %v3523_v45 = vld [vmem:[#allocation7 + $0x168] sm:$0xff] }
 0x23d   :  { %3598 = vmatprep.subr.mxu0 %v3594_v41  ;;  %v3519_v41 = vld [vmem:[#allocation7 + $0x148] sm:$0xff] }
 0x23f   :  { %4785 = vmatpush3.bf16.msra.mxu1 %v5551_v40  ;;  %3431 = vmatmul.mubr.bf16.vlgmr.msra.gmra.mxu0 %v5798_v24  ;;  %v3573_v24 = vld [vmem:[#allocation7 + $0x2f8] sm:$0xff]  ;;  %v3560_v40 = vld [vmem:[#allocation7 + $0x290] sm:$0xff] }
 0x240   :  { %4786 = vmatprep.subr.bf16.mxu1 %v5552_v42  ;;  %3599 = vmatpush1.msra.mxu0 %v3593_v43  ;;  %v3556_v42 = vld [vmem:[#allocation7 + $0x270] sm:$0xff]  ;;  %v3518_v43 = vld [vmem:[#allocation7 + $0x140] sm:$0xff] }
 0x241   :  { %3662 = vmatprep.mubr.f32.mxu0 %v5656_v0  ;;  %3600 = vmatprep.subr.mxu0 %v3589_v36  ;;  %v3555_v36 = vld [vmem:[#allocation7 + $0x268] sm:$0xff] }
 0x242   :  { %3601 = vmatpush1.msra.mxu0 %v3588_v50  ;;  %v3550_v50 = vld [vmem:[#allocation7 + $0x240] sm:$0xff] }
 0x243   :  { %4787 = vmatpush3.bf16.msra.mxu1 %v5553_v49  ;;  %3602 = vmatprep.subr.mxu0 %v3584_v53  ;;  %v3551_v49 = vld [vmem:[#allocation7 + $0x248] sm:$0xff]  ;;  %v3546_v53 = vld [vmem:[#allocation7 + $0x220] sm:$0xff] }
 0x244   :  { %4788 = vmatprep.subr.bf16.mxu1 %v5554_v51  ;;  %3603 = vmatpush1.msra.mxu0 %v3583_v54  ;;  %v3597_v51 = vld [vmem:[#allocation7 + $0x3b8] sm:$0xff] }
 0x245   :  { %3604 = vmatprep.subr.mxu0 %v3579_v56  ;;  %v3545_v56 = vld [vmem:[#allocation7 + $0x218] sm:$0xff] }
 0x246   :  { %3605 = vmatpush1.msra.mxu0 %v3578_v59  ;;  %v3541_v59 = vld [vmem:[#allocation7 + $0x1f8] sm:$0xff] }
 0x247   :  { %4789 = vmatpush3.bf16.msra.mxu1 %v5555_v58  ;;  %3606 = vmatprep.subr.mxu0 %v3574_v44  ;;  %v3592_v58 = vld [vmem:[#allocation7 + $0x390] sm:$0xff] }
 0x248   :  { %4790 = vmatprep.subr.bf16.mxu1 %v5556_v61  ;;  %3607 = vmatpush1.msra.mxu0 %v3573_v24  ;;  %v3540_v44 = vld [vmem:[#allocation7 + $0x1f0] sm:$0xff]  ;;  %v3587_v24 = vld [vmem:[#allocation7 + $0x368] sm:$0xff] }
 0x249   :  { %3608 = vmatprep.subr.mxu0 %v3569_v62  ;;  %v3536_v62 = vld [vmem:[#allocation7 + $0x1d0] sm:$0xff] }
 0x24a   :  { %3609 = vmatpush1.msra.mxu0 %v3568_v60  ;;  %v3535_v60 = vld [vmem:[#allocation7 + $0x1c8] sm:$0xff] }
 0x24b   :  { %4791 = vmatpush3.bf16.msra.mxu1 %v5557_v63  ;;  %3610 = vmatprep.subr.mxu0 %v3564_v1  ;;  %v3582_v1 = vld [vmem:[#allocation7 + $0x340] sm:$0xff] }
 0x24c   :  { %3669 = vmatprep.subr.mxu1 %v3596_v3  ;;  %3611 = vmatpush1.msra.mxu0 %v3563_v4  ;;  %v3531_v3 = vld [vmem:[#allocation7 + $0x1a8] sm:$0xff] }
 0x24d   :  { %3612 = vmatprep.subr.mxu0 %v3559_v6  ;;  %v3530_v6 = vld [vmem:[#allocation7 + $0x1a0] sm:$0xff] }
 0x24e   :  { %3471 = vmatmul.mubr.bf16.vlgmr.msra.gmra.mxu1 %v5804_v47  ;;  %3613 = vmatpush1.msra.mxu0 %v3558_v8  ;;  %v3539_v47 = vld [vmem:[#allocation7 + $0x1e8] sm:$0xff]  ;;  %v3577_v8 = vld [vmem:[#allocation7 + $0x318] sm:$0xff] }
 0x24f   :  { %3670 = vmatpush1.msra.mxu1 %v3595_v9  ;;  %3614 = vmatprep.subr.mxu0 %v3554_v10  ;;  %v3526_v9 = vld [vmem:[#allocation7 + $0x180] sm:$0xff]  ;;  %v3525_v10 = vld [vmem:[#allocation7 + $0x178] sm:$0xff] }
 0x250   :  { %3671 = vmatprep.subr.mxu1 %v3591_v11  ;;  %3615 = vmatpush1.msra.mxu0 %v3553_v12  ;;  %v3572_v11 = vld [vmem:[#allocation7 + $0x2f0] sm:$0xff]  ;;  %v3521_v12 = vld [vmem:[#allocation7 + $0x158] sm:$0xff] }
 0x251   :  { %3672 = vmatpush1.msra.mxu1 %v3590_v13  ;;  %3616 = vmatprep.subr.mxu0 %v3549_v14  ;;  %v3520_v13 = vld [vmem:[#allocation7 + $0x150] sm:$0xff]  ;;  %v3567_v14 = vld [vmem:[#allocation7 + $0x2c8] sm:$0xff] }
 0x252   :  { %3673 = vmatprep.subr.mxu1 %v3586_v15  ;;  %3617 = vmatpush1.msra.mxu0 %v3548_v16  ;;  %v3562_v16 = vld [vmem:[#allocation7 + $0x2a0] sm:$0xff] }
 0x253   :  { %3674 = vmatpush1.msra.mxu1 %v3585_v55  ;;  %3618 = vmatprep.subr.mxu0 %v3544_v19  ;;  %v3515_v19 = vld [vmem:[#allocation7 + $0x128] sm:$0xff] }
 0x254   :  { %3675 = vmatprep.subr.mxu1 %v3581_v20  ;;  %3619 = vmatpush1.msra.mxu0 %v3543_v22 }
 0x255   :  { %3676 = vmatpush1.msra.mxu1 %v3580_v23  ;;  %3620 = vmatprep.subr.mxu0 %v3539_v47  ;;  %v3557_v23 = vld [vmem:[#allocation7 + $0x278] sm:$0xff]  ;;  %v3510_v47 = vld [vmem:[#allocation7 + $0x100] sm:$0xff] }
 0x256   :  { %3677 = vmatprep.subr.mxu1 %v3576_v25  ;;  %3621 = vmatpush1.msra.mxu0 %v3538_v26  ;;  %v3552_v26 = vld [vmem:[#allocation7 + $0x250] sm:$0xff] }
 0x257   :  { %3678 = vmatpush1.msra.mxu1 %v3575_v27  ;;  %3622 = vmatprep.subr.mxu0 %v3534_v28  ;;  %v3505_v27 = vld [vmem:[#allocation7 + $0xd8] sm:$0xff] }
 0x258   :  { %3679 = vmatprep.subr.mxu1 %v3571_v30  ;;  %3623 = vmatpush1.msra.mxu0 %v3533_v52  ;;  %v3547_v30 = vld [vmem:[#allocation7 + $0x228] sm:$0xff] }
 0x259   :  { %3680 = vmatpush1.msra.mxu1 %v3570_v31  ;;  %3624 = vmatprep.subr.mxu0 %v3529_v33  ;;  %v3500_v31 = vld [vmem:[#allocation7 + $0xb0] sm:$0xff]  ;;  %v3542_v33 = vld [vmem:[#allocation7 + $0x200] sm:$0xff] }
 0x25a   :  { %3681 = vmatprep.subr.mxu1 %v3566_v34  ;;  %3625 = vmatpush1.msra.mxu0 %v3528_v35  ;;  %v3495_v34 = vld [vmem:[#allocation7 + $0x88] sm:$0xff]  ;;  %v3537_v35 = vld [vmem:[#allocation7 + $0x1d8] sm:$0xff] }
 0x25b   :  { %3682 = vmatpush1.msra.mxu1 %v3565_v37  ;;  %3626 = vmatprep.subr.mxu0 %v3524_v38  ;;  %v3490_v37 = vld [vmem:[#allocation7 + $0x60] sm:$0xff]  ;;  %v3532_v38 = vld [vmem:[#allocation7 + $0x1b0] sm:$0xff] }
 0x25c   :  { %3683 = vmatprep.subr.mxu1 %v3561_v39  ;;  %3627 = vmatpush1.msra.mxu0 %v3523_v45  ;;  %v3485_v39 = vld [vmem:[#allocation7 + $0x38] sm:$0xff]  ;;  %v3811_v45 = vmul.f32 0.2, %v5784_v46 }
 0x25d   :  { %3684 = vmatpush1.msra.mxu1 %v3560_v40  ;;  %3628 = vmatprep.subr.mxu0 %v3519_v41  ;;  %v3527_v40 = vld [vmem:[#allocation7 + $0x188] sm:$0xff]  ;;  %v3480_v41 = vld [vmem:[#allocation7 + $0x10] sm:$0xff] }
 0x25e   :  { %3685 = vmatprep.subr.mxu1 %v3556_v42  ;;  %3629 = vmatpush1.msra.mxu0 %v3518_v43  ;;  %v3522_v42 = vld [vmem:[#allocation7 + $0x160] sm:$0xff]  ;;  %v3812_v43 = vsel %vm3810_vm6, %v5784_v46, %v3811_v45 }
 0x25f   :  { %3686 = vmatpush1.msra.mxu1 %v3555_v36  ;;  %v3186_v54 = vpop.f32.mrf.mxu0  ;;  %3663 = vmatmul.mubr.f32.vlgmr.msra.gmra.mxu0 %v5764_v29 }
 0x260   :  { %3687 = vmatprep.subr.mxu1 %v3551_v49  ;;  %4898 = vmatprep.subr.mxu0 %v5656_v0  ;;  %v3187_v15 = vadd.f32 %v3186_v54, %v5813_v17 }
 0x261   :  { %3688 = vmatpush1.msra.mxu1 %v3550_v50  ;;  %4899 = vmatpush3.msra.mxu0 %v3597_v51  ;;  %v3188_v61 = vpop.f32.mrf.mxu0 }
 0x262   :  { %3689 = vmatprep.subr.mxu1 %v3546_v53  ;;  %4900 = vmatprep.subr.mxu0 %v5656_v0  ;;  %v3189_v20 = vadd.f32 %v3188_v61, %v5817_v7  ;;  %v5884_v61 = vld [vmem:[#allocation7 + $0x118] sm:$0xff] }
 0x263   :  { %3690 = vmatpush1.msra.mxu1 %v3545_v56  ;;  %4901 = vmatpush3.msra.mxu0 %v3592_v58  ;;  %v3190_v63 = vpop.f32.mrf.mxu0 }
 0x264   :  { %3691 = vmatprep.subr.mxu1 %v3541_v59  ;;  %4902 = vmatprep.subr.mxu0 %v5656_v0 }
 0x265   :  { %3692 = vmatpush1.msra.mxu1 %v3540_v44  ;;  %4903 = vmatpush3.msra.mxu0 %v3587_v24  ;;  %v3191_v4 = vpop.f32.mrf.mxu0  ;;  %v5886_v44 = vld [vmem:[#allocation7 + $0xf8] sm:$0xff] }
 0x266   :  { %3693 = vmatprep.subr.mxu1 %v3536_v62  ;;  %4904 = vmatprep.subr.mxu0 %v5656_v0  ;;  %v5888_v62 = vld [vmem:[#allocation7 + $0xf0] sm:$0xff]  ;;  %v5902_v4 = vld [vmem:[#allocation7 + $0xa8] sm:$0xff] }
 0x267   :  { %3694 = vmatpush1.msra.mxu1 %v3535_v60  ;;  %4905 = vmatpush3.msra.mxu0 %v3582_v1  ;;  %v5891_v60 = vld [vmem:[#allocation7 + $0xd0] sm:$0xff] }
 0x268   :  { %3695 = vmatprep.subr.mxu1 %v3531_v3  ;;  %4906 = vmatprep.subr.mxu0 %v5656_v0 }
 0x269   :  { %3696 = vmatpush1.msra.mxu1 %v3530_v6  ;;  %4907 = vmatpush3.msra.mxu0 %v3577_v8  ;;  %v5905_v6 = vld [vmem:[#allocation7 + $0xa0] sm:$0xff] }
 0x26a   :  { %3697 = vmatprep.subr.mxu1 %v3526_v9  ;;  %4908 = vmatprep.subr.mxu0 %v5656_v0  ;;  %v5908_v9 = vld [vmem:[#allocation7 + $0x80] sm:$0xff] }
 0x26b   :  { %3698 = vmatpush1.msra.mxu1 %v3525_v10  ;;  %4909 = vmatpush3.msra.mxu0 %v3572_v11  ;;  %v5911_v10 = vld [vmem:[#allocation7 + $0x78] sm:$0xff] }
 0x26c   :  { %3699 = vmatprep.subr.mxu1 %v3521_v12  ;;  %4910 = vmatprep.subr.mxu0 %v5656_v0  ;;  %v5917_v11 = vld [vmem:[#allocation7 + $0x58] sm:$0xff]  ;;  %v5922_v12 = vld [vmem:[#allocation7 + $0x50] sm:$0xff] }
 0x26d   :  { %3700 = vmatpush1.msra.mxu1 %v3520_v13  ;;  %3733 = vmatprep.mubr.f32.mxu1 %v5656_v0  ;;  %v5925_v13 = vld [vmem:[#allocation7 + $0x30] sm:$0xff] }
 0x26e   :  { %4911 = vmatpush3.msra.mxu0 %v3567_v14  ;;  %v3227_v55 = vpop.f32.mrf.mxu1  ;;  %3734 = vmatmul.mubr.f32.vlgmr.msra.gmra.mxu1 %v5764_v29  ;;  %v5928_v14 = vld [vmem:[#allocation7 + $0x28] sm:$0xff] }
 0x26f   :  { %4912 = vmatprep.subr.mxu0 %v5656_v0  ;;  %v5847_v22 = vadd.f32 %v3227_v55, %v3187_v15  ;;  %4933 = vmatprep.subr.mxu1 %v5656_v0  ;;  %v5931_v15 = vld [vmem:[#allocation7 + $0x8] sm:$0xff]  ;;  %v5937_v55 = vld [vmem:[#allocation7 + $0x130] sm:$0xff] }
 0x270   :  { %4913 = vmatpush3.msra.mxu0 %v3562_v16  ;;  %v3229_v17 = vpop.f32.mrf.mxu1  ;;  %4934 = vmatpush3.msra.mxu1 %v3515_v19  ;;  %v5934_v16 = vld [vmem:[#allocation7] sm:$0xff]  ;;  %v5939_v19 = vld [vmem:[#allocation7 + $0x108] sm:$0xff] }
 0x271   :  { %4914 = vmatprep.subr.mxu0 %v5656_v0  ;;  %v5851_v25 = vadd.f32 %v3229_v17, %v3189_v20  ;;  %4935 = vmatprep.subr.mxu1 %v5656_v0  ;;  %v5943_v20 = vld [vmem:[#allocation7 + $0xe0] sm:$0xff] }
 0x272   :  { %4915 = vmatpush3.msra.mxu0 %v3557_v23  ;;  %v3231_v7 = vpop.f32.mrf.mxu1  ;;  %4936 = vmatpush3.msra.mxu1 %v3510_v47 }
 0x273   :  { %v4273_v28 = vcombine.low %v5847_v22, %v5851_v25  ;;  %4916 = vmatprep.subr.mxu0 %v5656_v0  ;;  %4937 = vmatprep.subr.mxu1 %v5656_v0  ;;  %v5947_v22 = vld [vmem:[#allocation7 + $0xb8] sm:$0xff] }
 0x274   :  { %4917 = vmatpush3.msra.mxu0 %v3552_v26  ;;  %v3232_v52 = vpop.f32.mrf.mxu1  ;;  %4938 = vmatpush3.msra.mxu1 %v3505_v27 }
 0x275   :  { %4918 = vmatprep.subr.mxu0 %v5656_v0  ;;  %4939 = vmatprep.subr.mxu1 %v5656_v0  ;;  %v4281_v1 = vrot.slane %v4273_v28, %v5710_v48 }
 0x276   :  { %4919 = vmatpush3.msra.mxu0 %v3547_v30  ;;  %4940 = vmatpush3.msra.mxu1 %v3500_v31 }
 0x277   :  { %4920 = vmatprep.subr.mxu0 %v5656_v0  ;;  %4941 = vmatprep.subr.mxu1 %v5656_v0 }
 0x278   :  { %4921 = vmatpush3.msra.mxu0 %v3542_v33  ;;  %4942 = vmatpush3.msra.mxu1 %v3495_v34 }
 0x279   :  { %4922 = vmatprep.subr.mxu0 %v5656_v0  ;;  %4943 = vmatprep.subr.mxu1 %v5656_v0 }
 0x27a   :  { %4923 = vmatpush3.msra.mxu0 %v3537_v35  ;;  %4944 = vmatpush3.msra.mxu1 %v3490_v37 }
 0x27b   :  { %4924 = vmatprep.subr.mxu0 %v5656_v0  ;;  %4945 = vmatprep.subr.mxu1 %v5656_v0 }
 0x27c   :  { %4925 = vmatpush3.msra.mxu0 %v3532_v38  ;;  %4946 = vmatpush3.msra.mxu1 %v3485_v39 }
 0x27d   :  { %4926 = vmatprep.subr.mxu0 %v5656_v0  ;;  %4947 = vmatprep.subr.mxu1 %v5656_v0 }
 0x27e   :  { %4927 = vmatpush3.msra.mxu0 %v3527_v40  ;;  %4948 = vmatpush3.msra.mxu1 %v3480_v41 }
 0x27f   :  { %4949 = vmatprep.mubr.msk.f32.mxu1 %vm5658_vm1, %v5656_v0  ;;  %4928 = vmatprep.subr.mxu0 %v5656_v0 }
 0x280   :  { %4950 = vmatmul.mubr.msk.f32.vlgmr.msra.gmra.mxu1 %vm3813_vm7, %v3812_v43  ;;  %4929 = vmatpush3.msra.mxu0 %v3522_v42 }
 0x281   :  { %4930 = vmatprep.mubr.msk.f32.mxu0 %vm5658_vm1, %v5656_v0  ;;  %4952 = vmatprep.subr.mxu1 %v5656_v0 }
 0x282   :  { %4931 = vmatmul.mubr.f32.vlgmr.msra.gmra.mxu0 %v5764_v29  ;;  %4968 = vmatprep.mubr.msk.f32.mxu1 %vm5658_vm1, %v5656_v0  ;;  %v3514_v29 = vld [vmem:[#allocation7 + $0x120] sm:$0xff] }
 0x283   :  { %3955 = vmatprep.mubr.f32.mxu0 %v5656_v0  ;;  %3907 = vmatprep.subr.mxu0 %v3514_v29 }
 0x284   :  { %3908 = vmatpush1.msra.mxu0 %v5884_v61  ;;  %4953 = vmatpush3.msra.mxu1 %v5937_v55 }
 0x285   :  { %3909 = vmatprep.subr.mxu0 %v5886_v44  ;;  %4954 = vmatprep.subr.mxu1 %v5656_v0 }
 0x286   :  { %3910 = vmatpush1.msra.mxu0 %v5888_v62  ;;  %4955 = vmatpush3.msra.mxu1 %v5939_v19 }
 0x287   :  { %3911 = vmatprep.subr.mxu0 %v5891_v60  ;;  %4956 = vmatprep.subr.mxu1 %v5656_v0 }
 0x288   :  { %4957 = vmatpush3.msra.mxu1 %v5943_v20 }
 0x289   :  { %4958 = vmatprep.subr.mxu1 %v5656_v0 }
 0x28a   :  { %4959 = vmatpush3.msra.mxu1 %v5947_v22 }
 0x28b   :  { %4960 = vmatprep.subr.mxu1 %v5656_v0 }
 0x29f   :  { %v3268_v46 = vpop.f32.mrf.mxu0 }
 0x2a0   :  { %v3269_v53 = vadd.f32 %v3268_v46, %v5815_v18 }
 0x2a1   :  { %v3270_v36 = vpop.f32.mrf.mxu0 }
 0x2a2   :  { %v3271_v54 = vadd.f32 %v3270_v36, %v5819_v21  ;;  %v5894_v21 = vld [vmem:[#allocation7 + $0xc8] sm:$0xff] }
 0x2a3   :  { %v3272_v49 = vpop.f32.mrf.mxu0  ;;  %3912 = vmatpush1.msra.mxu0 %v5894_v21 }
 0x2a4   :  { %3913 = vmatprep.subr.mxu0 %v5902_v4 }
 0x2a5   :  { %v3273_v50 = vpop.f32.mrf.mxu0  ;;  %3914 = vmatpush1.msra.mxu0 %v5905_v6 }
 0x2a6   :  { %3915 = vmatprep.subr.mxu0 %v5908_v9 }
 0x2a7   :  { %3916 = vmatpush1.msra.mxu0 %v5911_v10 }
 0x2a8   :  { %3917 = vmatprep.subr.mxu0 %v5917_v11 }
 0x2a9   :  { %3918 = vmatpush1.msra.mxu0 %v5922_v12 }
 0x2aa   :  { %3919 = vmatprep.subr.mxu0 %v5925_v13 }
 0x2ab   :  { %3920 = vmatpush1.msra.mxu0 %v5928_v14 }
 0x2ac   :  { %3921 = vmatprep.subr.mxu0 %v5931_v15 }
 0x2ad   :  { %3922 = vmatpush1.msra.mxu0 %v5934_v16 }
 0x2ae   :  { %v3309_v51 = vpop.f32.mrf.mxu1  ;;  %4058 = vmatprep.subr.mxu0 %v3514_v29 }
 0x2af   :  { %v3310_v58 = vadd.f32 %v3309_v51, %v3269_v53 }
 0x2b0   :  { %v3311_v56 = vpop.f32.mrf.mxu1 }
 0x2b1   :  { %v3312_v59 = vadd.f32 %v3311_v56, %v3271_v54 }
 0x2b2   :  { %v3313_v24 = vpop.f32.mrf.mxu1 }
 0x2b3   :  { %v4274_v63 = vcombine.low %v3310_v58, %v3312_v59 }
 0x2b4   :  { %v3314_v18 = vpop.f32.mrf.mxu1 }
 0x2b5   :  { %v4288_v3 = vrot.slane %v4274_v63, %v5710_v48 }
 0x2b7   :  { %v4289_v8 = vcombine.low %v4281_v1, %v4288_v3 }
 0x2b9   :  { %4308 = vst [vmem:[%s6033_s5] sm:$0xff] %v4289_v8 }
 0x2df   :  { %v3350_v23 = vpop.f32.mrf.mxu0 }
 0x2e0   :  { %v3351_v35 = vadd.f32 %v3350_v23, %v5821_v2  ;;  %v3487_v23 = vld [vmem:[#allocation7 + $0x48] sm:$0xff] }
 0x2e1   :  { %v3352_v17 = vpop.f32.mrf.mxu0 }
 0x2e2   :  { %v3353_v34 = vadd.f32 %v3352_v17, %v5827_v5  ;;  %v3482_v17 = vld [vmem:[#allocation7 + $0x20] sm:$0xff] }
 0x2e3   :  { %v3354_v47 = vpop.f32.mrf.mxu0 }
 0x2e5   :  { %v3355_v25 = vpop.f32.mrf.mxu0 }
 0x2ee   :  { %v3391_v26 = vpop.f32.mrf.mxu1 }
 0x2ef   :  { %v3392_v45 = vadd.f32 %v3391_v26, %v3351_v35 }
 0x2f0   :  { %v3393_v7 = vpop.f32.mrf.mxu1 }
 0x2f1   :  { %v3394_v37 = vadd.f32 %v3393_v7, %v3353_v34 }
 0x2f2   :  { %v3395_v27 = vpop.f32.mrf.mxu1 }
 0x2f3   :  { %v4290_v41 = vcombine.low %v3392_v45, %v3394_v37 }
 0x2f4   :  { %v3396_v28 = vpop.f32.mrf.mxu1 }
 0x2f5   :  { %v4297_v50 = vrot.slane %v4290_v41, %v5710_v48 }
 0x2ff   :  { %v4770_v30 = vpop.f32.mrf.mxu0 }
 0x301   :  { %v4771_v52 = vpop.f32.mrf.mxu0 }
 0x302   :  { %v4772_v38 = vadd.f32 %v4771_v52, %v4770_v30 }
 0x303   :  { %v4773_v31 = vpop.f32.mrf.mxu0 }
 0x304   :  { %v3433_v42 = vadd.f32 %v4772_v38, %v5823_v57 }
 0x305   :  { %v4774_v33 = vpop.f32.mrf.mxu0 }
 0x30e   :  { %v4792_v39 = vpop.f32.mrf.mxu1 }
 0x310   :  { %v4793_v40 = vpop.f32.mrf.mxu1 }
 0x311   :  { %v4794_v43 = vadd.f32 %v4793_v40, %v4792_v39 }
 0x312   :  { %v4795_v46 = vpop.f32.mrf.mxu1 }
 0x313   :  { %v3473_v36 = vadd.f32 %v4794_v43, %v3433_v42 }
 0x314   :  { %v4796_v49 = vpop.f32.mrf.mxu1 }
 0x315   :  { %v4304_v51 = vrot.slane %v3473_v36, %v5710_v48 }
 0x317   :  { %v4305_v53 = vcombine.low %v4297_v50, %v4304_v51 }
 0x319   :  { %4309 = vst [vmem:[%s6033_s5 + $0x8] sm:$0x3f] %v4305_v53 }
 0x31f   :  { %v5961_v5 = vpop.f32.mrf.mxu0 }
 0x321   :  { %v5965_v56 = vpop.f32.mrf.mxu0 }
 0x32e   :  { %v3735_v2 = vpop.f32.mrf.mxu1 }
 0x330   :  { %v5963_v54 = vpop.f32.mrf.mxu1 }
 0x340   :  { %v3883_v57 = vpop.f32.mrf.mxu1 }
 0x341   :  { %v3884_v58 = vadd.f32 %v3883_v57, %v3735_v2 }
 0x342   :  { %v5967_v59 = vpop.f32.mrf.mxu0  ;;  %v4951_v29 = vpop.f32.mrf.mxu1 }
 0x343   :  { %v3887_v24 = vadd.f32 %v3884_v58, %v5770_v32  ;;  %v3496_v32 = vld [vmem:[#allocation7 + $0x90] sm:$0xff] }
 0x344   :  { %v4932_v48 = vpop.f32.mrf.mxu0  ;;  %4961 = vmatpush3.msra.mxu1 %v3496_v32 }
 0x345   :  { %4692 = vmatmul.mubr.msk.f32.vlgmr.msra.gmra.mxu0 %vm3813_vm7, %v3887_v24  ;;  %4962 = vmatprep.subr.mxu1 %v5656_v0 }
 0x346   :  { %4059 = vmatpush1.msra.mxu0 %v5884_v61  ;;  %4106 = vmatprep.mubr.f32.mxu0 %v5656_v0  ;;  %v3491_v61 = vld [vmem:[#allocation7 + $0x68] sm:$0xff] }
 0x347   :  { %4060 = vmatprep.subr.mxu0 %v5886_v44  ;;  %4963 = vmatpush3.msra.mxu1 %v3491_v61  ;;  %v3486_v44 = vld [vmem:[#allocation7 + $0x40] sm:$0xff] }
 0x348   :  { %4061 = vmatpush1.msra.mxu0 %v5888_v62  ;;  %4964 = vmatprep.subr.mxu1 %v5656_v0  ;;  %v3481_v62 = vld [vmem:[#allocation7 + $0x18] sm:$0xff] }
 0x349   :  { %4062 = vmatprep.subr.mxu0 %v5891_v60  ;;  %4965 = vmatpush3.msra.mxu1 %v3486_v44 }
 0x34a   :  { %4063 = vmatpush1.msra.mxu0 %v5894_v21  ;;  %4966 = vmatprep.subr.mxu1 %v5656_v0 }
 0x34b   :  { %4064 = vmatprep.subr.mxu0 %v5902_v4  ;;  %4967 = vmatpush3.msra.mxu1 %v3481_v62 }
 0x34c   :  { %4065 = vmatpush1.msra.mxu0 %v5905_v6  ;;  %4971 = vmatprep.subr.mxu1 %v5656_v0 }
 0x34d   :  { %4066 = vmatprep.subr.mxu0 %v5908_v9 }
 0x34e   :  { %4067 = vmatpush1.msra.mxu0 %v5911_v10  ;;  %v3517_v10 = vld [vmem:[#allocation7 + $0x138] sm:$0xff] }
 0x34f   :  { %4068 = vmatprep.subr.mxu0 %v5917_v11  ;;  %v3512_v11 = vld [vmem:[#allocation7 + $0x110] sm:$0xff] }
 0x350   :  { %4069 = vmatpush1.msra.mxu0 %v5922_v12  ;;  %v3507_v12 = vld [vmem:[#allocation7 + $0xe8] sm:$0xff] }
 0x351   :  { %4070 = vmatprep.subr.mxu0 %v5925_v13  ;;  %v3502_v13 = vld [vmem:[#allocation7 + $0xc0] sm:$0xff] }
 0x352   :  { %4071 = vmatpush1.msra.mxu0 %v5928_v14 }
 0x353   :  { %4072 = vmatprep.subr.mxu0 %v5931_v15 }
 0x354   :  { %4073 = vmatpush1.msra.mxu0 %v5934_v16 }
 0x355   :  { %4990 = vmatprep.subr.mxu0 %v5656_v0 }
 0x405   :  { %v3957_v63 = vpop.f32.mrf.mxu0 }
 0x406   :  { %v3958_v4 = vadd.f32 %v3957_v63, %v5961_v5 }
 0x407   :  { %v3959_v60 = vpop.f32.mrf.mxu0 }
 0x408   :  { %v3960_v18 = vadd.f32 %v3959_v60, %v5965_v56 }
 0x40a   :  { %vm3962_vm8 = vcmp.ge.f32.partialorder %v3960_v18, 0.0  ;;  %v3963_v21 = vmul.f32 0.2, %v3960_v18 }
 0x40c   :  { %v3964_v1 = vsel %vm3962_vm8, %v3960_v18, %v3963_v21 }
 0x40d   :  { %4969 = vmatmul.mubr.msk.f32.vlgmr.msra.gmra.mxu1 %vm3813_vm7, %v3964_v1 }
 0x40e   :  { %4972 = vmatpush3.msra.mxu1 %v5937_v55  ;;  %4987 = vmatprep.mubr.msk.f32.mxu1 %vm5658_vm1, %v5656_v0 }
 0x40f   :  { %4973 = vmatprep.subr.mxu1 %v5656_v0 }
 0x410   :  { %4974 = vmatpush3.msra.mxu1 %v5939_v19 }
 0x411   :  { %4975 = vmatprep.subr.mxu1 %v5656_v0 }
 0x412   :  { %4976 = vmatpush3.msra.mxu1 %v5943_v20  ;;  %v3497_v20 = vld [vmem:[#allocation7 + $0x98] sm:$0xff] }
 0x413   :  { %4977 = vmatprep.subr.mxu1 %v5656_v0 }
 0x414   :  { %4978 = vmatpush3.msra.mxu1 %v5947_v22  ;;  %v3492_v22 = vld [vmem:[#allocation7 + $0x70] sm:$0xff] }
 0x415   :  { %4979 = vmatprep.subr.mxu1 %v5656_v0 }
 0x416   :  { %4980 = vmatpush3.msra.mxu1 %v3496_v32 }
 0x417   :  { %4981 = vmatprep.subr.mxu1 %v5656_v0 }
 0x418   :  { %4982 = vmatpush3.msra.mxu1 %v3491_v61 }
 0x419   :  { %4983 = vmatprep.subr.mxu1 %v5656_v0 }
 0x41a   :  { %4984 = vmatpush3.msra.mxu1 %v3486_v44 }
 0x41b   :  { %4985 = vmatprep.subr.mxu1 %v5656_v0 }
 0x41c   :  { %4986 = vmatpush3.msra.mxu1 %v3481_v62 }
 0x4cd   :  { %v4034_v3 = vpop.f32.mrf.mxu1 }
 0x4ce   :  { %v4035_v6 = vadd.f32 %v4034_v3, %v5963_v54 }
 0x4cf   :  { %v4970_v8 = vpop.f32.mrf.mxu1 }
 0x4d0   :  { %v4038_v9 = vadd.f32 %v4035_v6, %v3958_v4 }
 0x4d2   :  { %4694 = vmatmul.mubr.msk.f32.vlgmr.msra.gmra.mxu0 %vm3813_vm7, %v4038_v9 }
 0x4d3   :  { %5006 = vmatprep.mubr.msk.f32.mxu0 %vm5658_vm1, %v5656_v0  ;;  %4991 = vmatpush3.msra.mxu0 %v3517_v10 }
 0x4d4   :  { %4992 = vmatprep.subr.mxu0 %v5656_v0 }
 0x4d5   :  { %4993 = vmatpush3.msra.mxu0 %v3512_v11 }
 0x4d6   :  { %4994 = vmatprep.subr.mxu0 %v5656_v0 }
 0x4d7   :  { %4995 = vmatpush3.msra.mxu0 %v3507_v12 }
 0x4d8   :  { %4996 = vmatprep.subr.mxu0 %v5656_v0 }
 0x4d9   :  { %4997 = vmatpush3.msra.mxu0 %v3502_v13 }
 0x4da   :  { %4998 = vmatprep.subr.mxu0 %v5656_v0 }
 0x4db   :  { %4999 = vmatpush3.msra.mxu0 %v3497_v20 }
 0x4dc   :  { %5000 = vmatprep.subr.mxu0 %v5656_v0 }
 0x4dd   :  { %5001 = vmatpush3.msra.mxu0 %v3492_v22 }
 0x4de   :  { %5002 = vmatprep.subr.mxu0 %v5656_v0 }
 0x4df   :  { %5003 = vmatpush3.msra.mxu0 %v3487_v23 }
 0x4e0   :  { %5004 = vmatprep.subr.mxu0 %v5656_v0 }
 0x4e1   :  { %5005 = vmatpush3.msra.mxu0 %v3482_v17 }
 0x592   :  { %v4108_v14 = vpop.f32.mrf.mxu0 }
 0x593   :  { %v4109_v25 = vadd.f32 %v4108_v14, %v5961_v5 }
 0x594   :  { %v4110_v15 = vpop.f32.mrf.mxu0 }
 0x595   :  { %v4111_v16 = vadd.f32 %v4110_v15, %v5965_v56 }
 0x597   :  { %vm4113_vm9 = vcmp.ge.f32.partialorder %v4111_v16, 0.0  ;;  %v4114_v55 = vmul.f32 0.2, %v4111_v16 }
 0x599   :  { %v4115_v19 = vsel %vm4113_vm9, %v4111_v16, %v4114_v55 }
 0x59a   :  { %4988 = vmatmul.mubr.msk.f32.vlgmr.msra.gmra.mxu1 %vm3813_vm7, %v4115_v19 }
 0x65a   :  { %v4185_v47 = vpop.f32.mrf.mxu1 }
 0x65b   :  { %v4186_v26 = vadd.f32 %v4185_v47, %v5963_v54 }
 0x65c   :  { %v4989_v7 = vpop.f32.mrf.mxu1 }
 0x65d   :  { %v4189_v27 = vadd.f32 %v4186_v26, %v4109_v25 }
 0x65f   :  { %vm4190_vm10 = vcmp.ge.f32.partialorder %v4189_v27, 0.0  ;;  %v4191_v28 = vmul.f32 0.5, %v4189_v27 }
 0x661   :  { %v4192_v30 = vsel %vm4190_vm10, %v4189_v27, %v4191_v28 }
 0x662   :  { %5007 = vmatmul.mubr.msk.f32.vlgmr.msra.gmra.mxu0 %vm3813_vm7, %v4192_v30 }
 0x722   :  { %v4262_v52 = vpop.f32.mrf.mxu0 }
 0x723   :  { %v4263_v31 = vadd.f32 %v4262_v52, %v5967_v59 }
 0x724   :  { %v5008_v33 = vpop.f32.mrf.mxu0 }
 0x725   :  { %4311 = vst [vmem:[%s6033_s5 + $0x10] sm:$0x3] %v4263_v31 }
 0x726   :  { %4316 = vsyncpa [#allocation3], 1 }
 0x727   :  { %4317 = vsyncpa [#allocation5], 1 }
 0x728   :  { %4318 = vsyncpa [#allocation8], 1 }

</bundles_post_ra>
